<compile_context>
chip_gen: v6e
topology: v6e:2x2x1
jax: 0.10.0
libtpu: 0.0.40
codegen_flags: <defaults>
</compile_context>

<pallas_src>
import functools

import jax
import jax.numpy as jnp
from jax.experimental import pallas as pl
from jax.experimental.pallas import tpu as pltpu


# ----------------------------------------------------------------------------
# Fused GroupNorm on top of a conv accumulator (bias folded analytically)
# ----------------------------------------------------------------------------
def _group_norm_from_acc(acc, b, g, bt, gmat, n, p, cout, cg, eps):
    """acc: (n*p, cout) f32 conv output WITHOUT bias; b/g/bt: (1, cout) f32
    conv bias / GN gamma / GN beta; gmat: (cout, cout) same-group indicator.
    Returns (n, p, cout) f32 GroupNorm(acc + b)."""
    y3 = acc.reshape(n, p, cout)
    col_sum = jnp.sum(y3, axis=1)                     # (n, cout) reduce over P
    col_sq = jnp.sum(y3 * y3, axis=1)                 # (n, cout)
    # statistics of y = acc + b, without materializing y:
    sum_y = col_sum + p * b                           # (n, cout)
    sum_y2 = col_sq + 2.0 * b * col_sum + p * (b * b)
    inv_cnt = 1.0 / (p * cg)
    mean = jnp.dot(sum_y, gmat, preferred_element_type=jnp.float32) * inv_cnt
    ex2 = jnp.dot(sum_y2, gmat, preferred_element_type=jnp.float32) * inv_cnt
    var = ex2 - mean * mean
    inv = jax.lax.rsqrt(var + eps)                    # EUP slot
    scale = g * inv                                   # (n, cout)
    shift = (b - mean) * scale + bt                   # (n, cout)
    return y3 * scale[:, None, :] + shift[:, None, :]


# ----------------------------------------------------------------------------
# Single fused kernel: conv1+GN+ReLU -> conv2+GN ; shortcut 1x1+GN ; add+ReLU
# ----------------------------------------------------------------------------
def _down_block_kernel(xs_ref, w1_ref, w2_ref, we_ref, pv_ref, gmat_ref,
                       o_ref, hpad_ref, *, s1, Ho, Wo, Cin, Cout, N, pad, eps):
    """xs_ref  : (s1*s1, N, Hq, Wq, Cin) bf16 phase-split padded input
    w1_ref  : (9*Cin, Cout) bf16      w2_ref: (9*Cout, Cout) bf16
    we_ref  : (Cin, Cout) bf16        pv_ref: (9, Cout) f32  [b1,g1,bt1,b2,g2,bt2,be,ge,bte]
    gmat_ref: (Cout, Cout) f32 same-group indicator
    o_ref   : (N, Ho*Wo, Cout) f32    hpad_ref: (N, Ho+2, Wo+2, Cout) bf16 scratch
    """
    P = Ho * Wo
    Cg = 16
    gmat = gmat_ref[...]

    # ---- conv1: 3x3 stride s1 pad 1 as ONE fused-K MXU dot -------------------
    parts = []
    for i in range(3):
        for j in range(3):
            ph = (i % s1) * s1 + (j % s1)                  # phase of this tap
            i0, j0 = i // s1, j // s1                      # contiguous offset
            patch = xs_ref[ph, :, i0:i0 + Ho, j0:j0 + Wo, :]   # (N,Ho,Wo,Cin) bf16
            parts.append(patch.reshape(N * P, Cin))
    lhs1 = jnp.concatenate(parts, axis=-1)                 # (N*P, 9*Cin) bf16
    acc1 = jnp.dot(lhs1, w1_ref[...], preferred_element_type=jnp.float32)

    h = _group_norm_from_acc(acc1, pv_ref[0:1, :], pv_ref[1:2, :], pv_ref[2:3, :],
                             gmat, N, P, Cout, Cg, eps)
    h = jnp.maximum(h, 0.0)                                # ReLU

    # ---- intermediate stays in VMEM: bf16 halo-padded scratch ----------------
    hpad_ref[...] = jnp.zeros_like(hpad_ref)
    hpad_ref[:, 1:1 + Ho, 1:1 + Wo, :] = (
        h.reshape(N, Ho, Wo, Cout).astype(jnp.bfloat16))

    # ---- conv2: 3x3 stride 1 pad 1 as ONE fused-K MXU dot --------------------
    parts2 = []
    for i in range(3):
        for j in range(3):
            patch = hpad_ref[:, i:i + Ho, j:j + Wo, :]     # (N,Ho,Wo,Cout) bf16
            parts2.append(patch.reshape(N * P, Cout))
    lhs2 = jnp.concatenate(parts2, axis=-1)                # (N*P, 9*Cout) bf16
    acc2 = jnp.dot(lhs2, w2_ref[...], preferred_element_type=jnp.float32)
    out2 = _group_norm_from_acc(acc2, pv_ref[3:4, :], pv_ref[4:5, :], pv_ref[5:6, :],
                                gmat, N, P, Cout, Cg, eps)

    # ---- shortcut: 1x1 stride-s1 conv + GN, reusing the resident xs slab -----
    phe = pad % s1
    pe = phe * s1 + phe                                    # phase holding x[::s1, ::s1]
    oe = pad // s1
    xe = xs_ref[pe, :, oe:oe + Ho, oe:oe + Wo, :].reshape(N * P, Cin)
    acce = jnp.dot(xe, we_ref[...], preferred_element_type=jnp.float32)
    extra = _group_norm_from_acc(acce, pv_ref[6:7, :], pv_ref[7:8, :], pv_ref[8:9, :],
                                 gmat, N, P, Cout, Cg, eps)

    # ---- residual add + final ReLU -------------------------------------------
    o_ref[...] = jnp.maximum(extra + out2, 0.0).astype(o_ref.dtype)


# ----------------------------------------------------------------------------
# RestNetDownBlock forward (mirrors the PyTorch module) + params
# ----------------------------------------------------------------------------
def down_block_fwd(params, x_nchw, stride, eps=1e-5):
    """forward(): extra = GN(conv1x1(x)); out = GN(conv2(relu(GN(conv1(x)))));
    return relu(extra + out).  Input/output are NCHW like PyTorch."""
    s1, s2 = int(stride[0]), int(stride[1])
    # The residual add in the reference module forces conv2's output spatial
    # shape to equal the 1x1-shortcut's, which requires stride[1] == 1.
    assert s2 == 1, "stride[1] must be 1 (residual shapes must match, as in PyTorch)"

    w1, b1 = params["conv1"]["w"], params["conv1"]["b"]
    w2, b2 = params["conv2"]["w"], params["conv2"]["b"]
    we, be = params["extra_conv"]["w"], params["extra_conv"]["b"]
    g1, bt1 = params["gn1"]["gamma"], params["gn1"]["beta"]
    g2, bt2 = params["gn2"]["gamma"], params["gn2"]["beta"]
    ge, bte = params["extra_gn"]["gamma"], params["extra_gn"]["beta"]

    N, Cin, H, W = x_nchw.shape
    Cout = w1.shape[-1]
    assert Cout % 16 == 0, "GroupNorm(out_channels // 16) needs out_channels % 16 == 0"
    pad = 1
    Ho = (H + 2 * pad - 3) // s1 + 1
    Wo = (W + 2 * pad - 3) // s1 + 1
    P = Ho * Wo
    Hp, Wp = H + 2 * pad, W + 2 * pad
    Hq, Wq = -(-Hp // s1), -(-Wp // s1)          # ceil-div (phase grid extent)

    # NHWC bf16 activations (halves HBM->VMEM DMA; MXU operands are bf16 anyway).
    x = jnp.transpose(x_nchw, (0, 2, 3, 1)).astype(jnp.bfloat16)
    xp = jnp.pad(x, ((0, 0), (pad, Hq * s1 - H - pad),
                     (pad, Wq * s1 - W - pad), (0, 0)))
    # Phase split: one cheap HBM pass; every in-kernel tap slice is contiguous.
    if s1 == 1:
        xs = xp[None]                                          # (1, N, Hq, Wq, Cin)
    else:
        xs = (xp.reshape(N, Hq, s1, Wq, s1, Cin)
                .transpose(2, 4, 0, 1, 3, 5)
                .reshape(s1 * s1, N, Hq, Wq, Cin))             # (s1*s1, N, Hq, Wq, Cin)

    w1f = w1.reshape(9 * Cin, Cout).astype(jnp.bfloat16)       # fused-K weights
    w2f = w2.reshape(9 * Cout, Cout).astype(jnp.bfloat16)
    wef = we.reshape(Cin, Cout).astype(jnp.bfloat16)
    pv = jnp.stack([b1, g1, bt1, b2, g2, bt2, be, ge, bte]).astype(jnp.float32)
    cidx = jnp.arange(Cout, dtype=jnp.int32) // 16
    gmat = (cidx[:, None] == cidx[None, :]).astype(jnp.float32)  # same-group indicator

    # VMEM working-set estimate + explicit limit (v7x has 64 MiB physical VMEM).
    in_bytes = (xs.size + w1f.size + w2f.size + wef.size) * 2 + (pv.size + gmat.size) * 4
    out_bytes = N * P * Cout * 4
    hpad_bytes = N * (Ho + 2) * (Wo + 2) * Cout * 2
    tmp_bytes = N * P * (9 * Cin + 9 * Cout) * 2 + 8 * N * P * Cout * 4
    est = 2 * (in_bytes + out_bytes) + hpad_bytes + tmp_bytes
    assert est < 24 * 1024 * 1024, "working set too large for the single-tile fused kernel"
    # TODO(synk): add a spatial grid axis (tiled GN stats + accumulator) for
    # resolutions whose working set exceeds VMEM instead of the assert above.

    kern = functools.partial(_down_block_kernel, s1=s1, Ho=Ho, Wo=Wo,
                             Cin=Cin, Cout=Cout, N=N, pad=pad, eps=eps)

    out = pl.pallas_call(
        kern,
        out_shape=jax.ShapeDtypeStruct((N, P, Cout), jnp.float32),
        grid=(1,),
        in_specs=[
            pl.BlockSpec(xs.shape, lambda i: (0, 0, 0, 0, 0)),
            pl.BlockSpec(w1f.shape, lambda i: (0, 0)),
            pl.BlockSpec(w2f.shape, lambda i: (0, 0)),
            pl.BlockSpec(wef.shape, lambda i: (0, 0)),
            pl.BlockSpec(pv.shape, lambda i: (0, 0)),
            pl.BlockSpec(gmat.shape, lambda i: (0, 0)),
        ],
        out_specs=pl.BlockSpec((N, P, Cout), lambda i: (0, 0, 0)),
        scratch_shapes=[pltpu.VMEM((N, Ho + 2, Wo + 2, Cout), jnp.bfloat16)],
        compiler_params=pltpu.CompilerParams(
            dimension_semantics=("arbitrary",),
            vmem_limit_bytes=max(32 * 1024 * 1024, 2 * est)),
    )(xs, w1f, w2f, wef, pv, gmat)

    out = out.reshape(N, Ho, Wo, Cout)
    return jnp.transpose(out, (0, 3, 1, 2)).astype(jnp.float32)   # NCHW


def _conv_params(key, kh, kw, cin, cout):
    k1, k2 = jax.random.split(key)
    fan_in = kh * kw * cin
    w = jax.random.normal(k1, (kh, kw, cin, cout), jnp.float32) / jnp.sqrt(fan_in)
    b = jax.random.normal(k2, (cout,), jnp.float32) * 0.01
    return {"w": w, "b": b}


def _gn_params(key, c):
    k1, k2 = jax.random.split(key)
    return {"gamma": 1.0 + 0.1 * jax.random.normal(k1, (c,), jnp.float32),
            "beta": 0.1 * jax.random.normal(k2, (c,), jnp.float32)}


def init_down_block(key, cin, cout):
    ks = jax.random.split(key, 6)
    return {"conv1": _conv_params(ks[0], 3, 3, cin, cout),
            "gn1": _gn_params(ks[1], cout),
            "conv2": _conv_params(ks[2], 3, 3, cout, cout),
            "gn2": _gn_params(ks[3], cout),
            "extra_conv": _conv_params(ks[4], 1, 1, cin, cout),
            "extra_gn": _gn_params(ks[5], cout)}


# ----------------------------------------------------------------------------
# Pure-JAX reference (for correctness check only)
# ----------------------------------------------------------------------------
def _reference_down_block(params, x_nchw, stride, eps=1e-5):
    def conv(x, w, b, s, p):
        y = jax.lax.conv_general_dilated(
            x, w, window_strides=(s, s), padding=[(p, p), (p, p)],
            dimension_numbers=("NHWC", "HWIO", "NHWC"))
        return y + b.reshape(1, 1, 1, -1)

    def gn(x, gamma, beta, groups):
        N, H, W, C = x.shape
        xg = x.reshape(N, H * W, groups, C // groups)
        mean = jnp.mean(xg, axis=(1, 3), keepdims=True)
        var = jnp.mean((xg - mean) ** 2, axis=(1, 3), keepdims=True)
        xn = ((xg - mean) / jnp.sqrt(var + eps)).reshape(N, H, W, C)
        return xn * gamma.reshape(1, 1, 1, -1) + beta.reshape(1, 1, 1, -1)

    x = jnp.transpose(x_nchw, (0, 2, 3, 1))
    cout = params["conv1"]["w"].shape[-1]
    G = cout // 16
    extra = gn(conv(x, params["extra_conv"]["w"], params["extra_conv"]["b"],
                    stride[0], 0),
               params["extra_gn"]["gamma"], params["extra_gn"]["beta"], G)
    h = jax.nn.relu(gn(conv(x, params["conv1"]["w"], params["conv1"]["b"],
                            stride[0], 1),
                       params["gn1"]["gamma"], params["gn1"]["beta"], G))
    out = gn(conv(h, params["conv2"]["w"], params["conv2"]["b"], stride[1], 1),
             params["gn2"]["gamma"], params["gn2"]["beta"], G)
    return jnp.transpose(jax.nn.relu(extra + out), (0, 3, 1, 2))


# ----------------------------------------------------------------------------
if __name__ == "__main__":
    key = jax.random.PRNGKey(0)
    k_in, k_par = jax.random.split(key)

    in_ch, out_ch = 32, 64          # out_ch must be a multiple of 16 (GN groups)
    stride = (2, 1)                 # typical ResNet down-block stride
    x = jax.random.normal(k_in, (2, in_ch, 16, 16), jnp.float32)   # NCHW
    params = init_down_block(k_par, in_ch, out_ch)

    fwd = jax.jit(functools.partial(down_block_fwd, stride=stride))
    out = jax.block_until_ready(fwd(params, x))

    assert out.shape == (2, out_ch, 8, 8) and out.dtype == jnp.float32
    assert bool(jnp.all(jnp.isfinite(out)))

    ref = jax.block_until_ready(_reference_down_block(params, x, stride))
    # bf16 MXU operands with f32 accumulation -> small numerical delta vs f32 ref.
    assert bool(jnp.allclose(out, ref, atol=5e-2, rtol=5e-2)), \
        float(jnp.max(jnp.abs(out - ref)))

    print("KERNEL_OK")
</pallas_src>

<mosaic_0001>
module attributes {stable_mosaic.version = 11 : i64} {
  func.func @_down_block_kernel(%arg0: i32, %arg1: memref<4x2x9x9x32xbf16, #tpu.memory_space<vmem>>, %arg2: memref<288x64xbf16, #tpu.memory_space<vmem>>, %arg3: memref<576x64xbf16, #tpu.memory_space<vmem>>, %arg4: memref<32x64xbf16, #tpu.memory_space<vmem>>, %arg5: memref<9x64xf32, #tpu.memory_space<vmem>>, %arg6: memref<64x64xf32, #tpu.memory_space<vmem>>, %arg7: memref<2x64x64xf32, #tpu.memory_space<vmem>>, %arg8: memref<2x10x10x64xbf16, #tpu.memory_space<vmem>>) attributes {dimension_semantics = [#tpu.dimension_semantics<arbitrary>], iteration_bounds = array<i64: 1>, scalar_prefetch = 0 : i64, scratch_operands = 1 : i64, tpu.core_type = #tpu.core_type<tc>, window_params = [{pipeline_mode = #tpu.pipeline_mode<synchronous>, transform_indices = @transform_0, window_bounds = array<i64: 4, 2, 9, 9, 32>}, {pipeline_mode = #tpu.pipeline_mode<synchronous>, transform_indices = @transform_1, window_bounds = array<i64: 288, 64>}, {pipeline_mode = #tpu.pipeline_mode<synchronous>, transform_indices = @transform_2, window_bounds = array<i64: 576, 64>}, {pipeline_mode = #tpu.pipeline_mode<synchronous>, transform_indices = @transform_3, window_bounds = array<i64: 32, 64>}, {pipeline_mode = #tpu.pipeline_mode<synchronous>, transform_indices = @transform_4, window_bounds = array<i64: 9, 64>}, {pipeline_mode = #tpu.pipeline_mode<synchronous>, transform_indices = @transform_5, window_bounds = array<i64: 64, 64>}, {pipeline_mode = #tpu.pipeline_mode<synchronous>, transform_indices = @transform_6, window_bounds = array<i64: 2, 64, 64>}]} {
    %c0 = arith.constant 0 : index
    %c0_0 = arith.constant 0 : index
    %0 = vector.load %arg6[%c0, %c0_0] : memref<64x64xf32, #tpu.memory_space<vmem>>, vector<64x64xf32>
    %c0_1 = arith.constant 0 : index
    %c0_2 = arith.constant 0 : index
    %c0_3 = arith.constant 0 : index
    %c0_4 = arith.constant 0 : index
    %c0_5 = arith.constant 0 : index
    %1 = vector.load %arg1[%c0_1, %c0_2, %c0_3, %c0_4, %c0_5] : memref<4x2x9x9x32xbf16, #tpu.memory_space<vmem>>, vector<1x2x8x8x32xbf16>
    %2 = vector.shape_cast %1 : vector<1x2x8x8x32xbf16> to vector<2x8x8x32xbf16>
    %3 = vector.shape_cast %2 : vector<2x8x8x32xbf16> to vector<128x32xbf16>
    %c1 = arith.constant 1 : index
    %c0_6 = arith.constant 0 : index
    %c0_7 = arith.constant 0 : index
    %c0_8 = arith.constant 0 : index
    %c0_9 = arith.constant 0 : index
    %4 = vector.load %arg1[%c1, %c0_6, %c0_7, %c0_8, %c0_9] : memref<4x2x9x9x32xbf16, #tpu.memory_space<vmem>>, vector<1x2x8x8x32xbf16>
    %5 = vector.shape_cast %4 : vector<1x2x8x8x32xbf16> to vector<2x8x8x32xbf16>
    %6 = vector.shape_cast %5 : vector<2x8x8x32xbf16> to vector<128x32xbf16>
    %c0_10 = arith.constant 0 : index
    %c0_11 = arith.constant 0 : index
    %c0_12 = arith.constant 0 : index
    %c1_13 = arith.constant 1 : index
    %c0_14 = arith.constant 0 : index
    %7 = vector.load %arg1[%c0_10, %c0_11, %c0_12, %c1_13, %c0_14] : memref<4x2x9x9x32xbf16, #tpu.memory_space<vmem>>, vector<1x2x8x8x32xbf16>
    %8 = vector.shape_cast %7 : vector<1x2x8x8x32xbf16> to vector<2x8x8x32xbf16>
    %9 = vector.shape_cast %8 : vector<2x8x8x32xbf16> to vector<128x32xbf16>
    %c2 = arith.constant 2 : index
    %c0_15 = arith.constant 0 : index
    %c0_16 = arith.constant 0 : index
    %c0_17 = arith.constant 0 : index
    %c0_18 = arith.constant 0 : index
    %10 = vector.load %arg1[%c2, %c0_15, %c0_16, %c0_17, %c0_18] : memref<4x2x9x9x32xbf16, #tpu.memory_space<vmem>>, vector<1x2x8x8x32xbf16>
    %11 = vector.shape_cast %10 : vector<1x2x8x8x32xbf16> to vector<2x8x8x32xbf16>
    %12 = vector.shape_cast %11 : vector<2x8x8x32xbf16> to vector<128x32xbf16>
    %c3 = arith.constant 3 : index
    %c0_19 = arith.constant 0 : index
    %c0_20 = arith.constant 0 : index
    %c0_21 = arith.constant 0 : index
    %c0_22 = arith.constant 0 : index
    %13 = vector.load %arg1[%c3, %c0_19, %c0_20, %c0_21, %c0_22] : memref<4x2x9x9x32xbf16, #tpu.memory_space<vmem>>, vector<1x2x8x8x32xbf16>
    %14 = vector.shape_cast %13 : vector<1x2x8x8x32xbf16> to vector<2x8x8x32xbf16>
    %15 = vector.shape_cast %14 : vector<2x8x8x32xbf16> to vector<128x32xbf16>
    %c2_23 = arith.constant 2 : index
    %c0_24 = arith.constant 0 : index
    %c0_25 = arith.constant 0 : index
    %c1_26 = arith.constant 1 : index
    %c0_27 = arith.constant 0 : index
    %16 = vector.load %arg1[%c2_23, %c0_24, %c0_25, %c1_26, %c0_27] : memref<4x2x9x9x32xbf16, #tpu.memory_space<vmem>>, vector<1x2x8x8x32xbf16>
    %17 = vector.shape_cast %16 : vector<1x2x8x8x32xbf16> to vector<2x8x8x32xbf16>
    %18 = vector.shape_cast %17 : vector<2x8x8x32xbf16> to vector<128x32xbf16>
    %c0_28 = arith.constant 0 : index
    %c0_29 = arith.constant 0 : index
    %c1_30 = arith.constant 1 : index
    %c0_31 = arith.constant 0 : index
    %c0_32 = arith.constant 0 : index
    %19 = vector.load %arg1[%c0_28, %c0_29, %c1_30, %c0_31, %c0_32] : memref<4x2x9x9x32xbf16, #tpu.memory_space<vmem>>, vector<1x2x8x8x32xbf16>
    %20 = vector.shape_cast %19 : vector<1x2x8x8x32xbf16> to vector<2x8x8x32xbf16>
    %21 = vector.shape_cast %20 : vector<2x8x8x32xbf16> to vector<128x32xbf16>
    %c1_33 = arith.constant 1 : index
    %c0_34 = arith.constant 0 : index
    %c1_35 = arith.constant 1 : index
    %c0_36 = arith.constant 0 : index
    %c0_37 = arith.constant 0 : index
    %22 = vector.load %arg1[%c1_33, %c0_34, %c1_35, %c0_36, %c0_37] : memref<4x2x9x9x32xbf16, #tpu.memory_space<vmem>>, vector<1x2x8x8x32xbf16>
    %23 = vector.shape_cast %22 : vector<1x2x8x8x32xbf16> to vector<2x8x8x32xbf16>
    %24 = vector.shape_cast %23 : vector<2x8x8x32xbf16> to vector<128x32xbf16>
    %c0_38 = arith.constant 0 : index
    %c0_39 = arith.constant 0 : index
    %c1_40 = arith.constant 1 : index
    %c1_41 = arith.constant 1 : index
    %c0_42 = arith.constant 0 : index
    %25 = vector.load %arg1[%c0_38, %c0_39, %c1_40, %c1_41, %c0_42] : memref<4x2x9x9x32xbf16, #tpu.memory_space<vmem>>, vector<1x2x8x8x32xbf16>
    %26 = vector.shape_cast %25 : vector<1x2x8x8x32xbf16> to vector<2x8x8x32xbf16>
    %27 = vector.shape_cast %26 : vector<2x8x8x32xbf16> to vector<128x32xbf16>
    %28 = tpu.concatenate %3, %6, %9, %12, %15, %18, %21, %24, %27 in 1 : vector<128x32xbf16>, vector<128x32xbf16>, vector<128x32xbf16>, vector<128x32xbf16>, vector<128x32xbf16>, vector<128x32xbf16>, vector<128x32xbf16>, vector<128x32xbf16>, vector<128x32xbf16> -> vector<128x288xbf16>
    %c0_43 = arith.constant 0 : index
    %c0_44 = arith.constant 0 : index
    %29 = vector.load %arg2[%c0_43, %c0_44] : memref<288x64xbf16, #tpu.memory_space<vmem>>, vector<288x64xbf16>
    %cst = arith.constant dense<0.000000e+00> : vector<128x64xf32>
    %30 = tpu.matmul %28, %29, %cst {dimension_numbers = #tpu.dot_dimension_numbers<[1], [0], [0], [1], [0, 0, 1, 1], [], []>} : vector<128x288xbf16>, vector<288x64xbf16>, vector<128x64xf32> -> vector<128x64xf32>
    %c0_45 = arith.constant 0 : index
    %c0_46 = arith.constant 0 : index
    %31 = vector.load %arg5[%c0_45, %c0_46] : memref<9x64xf32, #tpu.memory_space<vmem>>, vector<1x64xf32>
    %c1_47 = arith.constant 1 : index
    %c0_48 = arith.constant 0 : index
    %32 = vector.load %arg5[%c1_47, %c0_48] : memref<9x64xf32, #tpu.memory_space<vmem>>, vector<1x64xf32>
    %c2_49 = arith.constant 2 : index
    %c0_50 = arith.constant 0 : index
    %33 = vector.load %arg5[%c2_49, %c0_50] : memref<9x64xf32, #tpu.memory_space<vmem>>, vector<1x64xf32>
    %34 = vector.shape_cast %30 : vector<128x64xf32> to vector<2x64x64xf32>
    %cst_51 = arith.constant dense<0.000000e+00> : vector<2x64xf32>
    %35 = vector.multi_reduction <add>, %34, %cst_51 [1] : vector<2x64x64xf32> to vector<2x64xf32>
    %36 = arith.mulf %34, %34 : vector<2x64x64xf32>
    %cst_52 = arith.constant dense<0.000000e+00> : vector<2x64xf32>
    %37 = vector.multi_reduction <add>, %36, %cst_52 [1] : vector<2x64x64xf32> to vector<2x64xf32>
    %cst_53 = arith.constant 6.400000e+01 : f32
    %38 = vector.broadcast %cst_53 : f32 to vector<1x64xf32>
    %39 = arith.mulf %38, %31 : vector<1x64xf32>
    %40 = vector.broadcast %39 : vector<1x64xf32> to vector<2x64xf32>
    %41 = arith.addf %35, %40 : vector<2x64xf32>
    %cst_54 = arith.constant 2.000000e+00 : f32
    %42 = vector.broadcast %cst_54 : f32 to vector<1x64xf32>
    %43 = arith.mulf %42, %31 : vector<1x64xf32>
    %44 = vector.broadcast %43 : vector<1x64xf32> to vector<2x64xf32>
    %45 = arith.mulf %44, %35 : vector<2x64xf32>
    %46 = arith.addf %37, %45 : vector<2x64xf32>
    %47 = arith.mulf %31, %31 : vector<1x64xf32>
    %cst_55 = arith.constant 6.400000e+01 : f32
    %48 = vector.broadcast %cst_55 : f32 to vector<1x64xf32>
    %49 = arith.mulf %48, %47 : vector<1x64xf32>
    %50 = vector.broadcast %49 : vector<1x64xf32> to vector<2x64xf32>
    %51 = arith.addf %46, %50 : vector<2x64xf32>
    %cst_56 = arith.constant dense<0.000000e+00> : vector<2x64xf32>
    %52 = tpu.matmul %41, %0, %cst_56 {dimension_numbers = #tpu.dot_dimension_numbers<[1], [0], [0], [1], [0, 0, 1, 1], [], []>} : vector<2x64xf32>, vector<64x64xf32>, vector<2x64xf32> -> vector<2x64xf32>
    %cst_57 = arith.constant 9.765625E-4 : f32
    %53 = vector.broadcast %cst_57 : f32 to vector<2x64xf32>
    %54 = arith.mulf %52, %53 : vector<2x64xf32>
    %cst_58 = arith.constant dense<0.000000e+00> : vector<2x64xf32>
    %55 = tpu.matmul %51, %0, %cst_58 {dimension_numbers = #tpu.dot_dimension_numbers<[1], [0], [0], [1], [0, 0, 1, 1], [], []>} : vector<2x64xf32>, vector<64x64xf32>, vector<2x64xf32> -> vector<2x64xf32>
    %cst_59 = arith.constant 9.765625E-4 : f32
    %56 = vector.broadcast %cst_59 : f32 to vector<2x64xf32>
    %57 = arith.mulf %55, %56 : vector<2x64xf32>
    %58 = arith.mulf %54, %54 : vector<2x64xf32>
    %59 = arith.subf %57, %58 : vector<2x64xf32>
    %cst_60 = arith.constant 9.99999974E-6 : f32
    %60 = vector.broadcast %cst_60 : f32 to vector<2x64xf32>
    %61 = arith.addf %59, %60 : vector<2x64xf32>
    %62 = math.rsqrt %61 : vector<2x64xf32>
    %63 = vector.broadcast %32 : vector<1x64xf32> to vector<2x64xf32>
    %64 = arith.mulf %63, %62 : vector<2x64xf32>
    %65 = vector.broadcast %31 : vector<1x64xf32> to vector<2x64xf32>
    %66 = arith.subf %65, %54 : vector<2x64xf32>
    %67 = arith.mulf %66, %64 : vector<2x64xf32>
    %68 = vector.broadcast %33 : vector<1x64xf32> to vector<2x64xf32>
    %69 = arith.addf %67, %68 : vector<2x64xf32>
    %70 = vector.shape_cast %64 : vector<2x64xf32> to vector<2x1x64xf32>
    %71 = vector.broadcast %70 : vector<2x1x64xf32> to vector<2x64x64xf32>
    %72 = arith.mulf %34, %71 : vector<2x64x64xf32>
    %73 = vector.shape_cast %69 : vector<2x64xf32> to vector<2x1x64xf32>
    %74 = vector.broadcast %73 : vector<2x1x64xf32> to vector<2x64x64xf32>
    %75 = arith.addf %72, %74 : vector<2x64x64xf32>
    %cst_61 = arith.constant 0.000000e+00 : f32
    %76 = vector.broadcast %cst_61 : f32 to vector<2x64x64xf32>
    %77 = arith.maximumf %75, %76 : vector<2x64x64xf32>
    %cst_62 = arith.constant 0.000000e+00 : bf16
    %78 = vector.broadcast %cst_62 : bf16 to vector<2x10x10x64xbf16>
    %c0_63 = arith.constant 0 : index
    %c0_64 = arith.constant 0 : index
    %c0_65 = arith.constant 0 : index
    %c0_66 = arith.constant 0 : index
    %79 = vector.load %arg8[%c0_63, %c0_64, %c0_65, %c0_66] : memref<2x10x10x64xbf16, #tpu.memory_space<vmem>>, vector<2x10x10x64xbf16>
    tpu.vector_store %arg8[%c0_63, %c0_64, %c0_65, %c0_66], %78 {strides = array<i32>} : memref<2x10x10x64xbf16, #tpu.memory_space<vmem>>, vector<2x10x10x64xbf16>,
    %80 = vector.shape_cast %77 : vector<2x64x64xf32> to vector<2x8x8x64xf32>
    %81 = arith.truncf %80 : vector<2x8x8x64xf32> to vector<2x8x8x64xbf16>
    %c0_67 = arith.constant 0 : index
    %c1_68 = arith.constant 1 : index
    %c1_69 = arith.constant 1 : index
    %c0_70 = arith.constant 0 : index
    %82 = vector.load %arg8[%c0_67, %c1_68, %c1_69, %c0_70] : memref<2x10x10x64xbf16, #tpu.memory_space<vmem>>, vector<2x8x8x64xbf16>
    tpu.vector_store %arg8[%c0_67, %c1_68, %c1_69, %c0_70], %81 {strides = array<i32>} : memref<2x10x10x64xbf16, #tpu.memory_space<vmem>>, vector<2x8x8x64xbf16>,
    %c0_71 = arith.constant 0 : index
    %c0_72 = arith.constant 0 : index
    %c0_73 = arith.constant 0 : index
    %c0_74 = arith.constant 0 : index
    %83 = vector.load %arg8[%c0_71, %c0_72, %c0_73, %c0_74] : memref<2x10x10x64xbf16, #tpu.memory_space<vmem>>, vector<2x8x8x64xbf16>
    %84 = vector.shape_cast %83 : vector<2x8x8x64xbf16> to vector<128x64xbf16>
    %c0_75 = arith.constant 0 : index
    %c0_76 = arith.constant 0 : index
    %c1_77 = arith.constant 1 : index
    %c0_78 = arith.constant 0 : index
    %85 = vector.load %arg8[%c0_75, %c0_76, %c1_77, %c0_78] : memref<2x10x10x64xbf16, #tpu.memory_space<vmem>>, vector<2x8x8x64xbf16>
    %86 = vector.shape_cast %85 : vector<2x8x8x64xbf16> to vector<128x64xbf16>
    %c0_79 = arith.constant 0 : index
    %c0_80 = arith.constant 0 : index
    %c2_81 = arith.constant 2 : index
    %c0_82 = arith.constant 0 : index
    %87 = vector.load %arg8[%c0_79, %c0_80, %c2_81, %c0_82] : memref<2x10x10x64xbf16, #tpu.memory_space<vmem>>, vector<2x8x8x64xbf16>
    %88 = vector.shape_cast %87 : vector<2x8x8x64xbf16> to vector<128x64xbf16>
    %c0_83 = arith.constant 0 : index
    %c1_84 = arith.constant 1 : index
    %c0_85 = arith.constant 0 : index
    %c0_86 = arith.constant 0 : index
    %89 = vector.load %arg8[%c0_83, %c1_84, %c0_85, %c0_86] : memref<2x10x10x64xbf16, #tpu.memory_space<vmem>>, vector<2x8x8x64xbf16>
    %90 = vector.shape_cast %89 : vector<2x8x8x64xbf16> to vector<128x64xbf16>
    %c0_87 = arith.constant 0 : index
    %c1_88 = arith.constant 1 : index
    %c1_89 = arith.constant 1 : index
    %c0_90 = arith.constant 0 : index
    %91 = vector.load %arg8[%c0_87, %c1_88, %c1_89, %c0_90] : memref<2x10x10x64xbf16, #tpu.memory_space<vmem>>, vector<2x8x8x64xbf16>
    %92 = vector.shape_cast %91 : vector<2x8x8x64xbf16> to vector<128x64xbf16>
    %c0_91 = arith.constant 0 : index
    %c1_92 = arith.constant 1 : index
    %c2_93 = arith.constant 2 : index
    %c0_94 = arith.constant 0 : index
    %93 = vector.load %arg8[%c0_91, %c1_92, %c2_93, %c0_94] : memref<2x10x10x64xbf16, #tpu.memory_space<vmem>>, vector<2x8x8x64xbf16>
    %94 = vector.shape_cast %93 : vector<2x8x8x64xbf16> to vector<128x64xbf16>
    %c0_95 = arith.constant 0 : index
    %c2_96 = arith.constant 2 : index
    %c0_97 = arith.constant 0 : index
    %c0_98 = arith.constant 0 : index
    %95 = vector.load %arg8[%c0_95, %c2_96, %c0_97, %c0_98] : memref<2x10x10x64xbf16, #tpu.memory_space<vmem>>, vector<2x8x8x64xbf16>
    %96 = vector.shape_cast %95 : vector<2x8x8x64xbf16> to vector<128x64xbf16>
    %c0_99 = arith.constant 0 : index
    %c2_100 = arith.constant 2 : index
    %c1_101 = arith.constant 1 : index
    %c0_102 = arith.constant 0 : index
    %97 = vector.load %arg8[%c0_99, %c2_100, %c1_101, %c0_102] : memref<2x10x10x64xbf16, #tpu.memory_space<vmem>>, vector<2x8x8x64xbf16>
    %98 = vector.shape_cast %97 : vector<2x8x8x64xbf16> to vector<128x64xbf16>
    %c0_103 = arith.constant 0 : index
    %c2_104 = arith.constant 2 : index
    %c2_105 = arith.constant 2 : index
    %c0_106 = arith.constant 0 : index
    %99 = vector.load %arg8[%c0_103, %c2_104, %c2_105, %c0_106] : memref<2x10x10x64xbf16, #tpu.memory_space<vmem>>, vector<2x8x8x64xbf16>
    %100 = vector.shape_cast %99 : vector<2x8x8x64xbf16> to vector<128x64xbf16>
    %101 = tpu.concatenate %84, %86, %88, %90, %92, %94, %96, %98, %100 in 1 : vector<128x64xbf16>, vector<128x64xbf16>, vector<128x64xbf16>, vector<128x64xbf16>, vector<128x64xbf16>, vector<128x64xbf16>, vector<128x64xbf16>, vector<128x64xbf16>, vector<128x64xbf16> -> vector<128x576xbf16>
    %c0_107 = arith.constant 0 : index
    %c0_108 = arith.constant 0 : index
    %102 = vector.load %arg3[%c0_107, %c0_108] : memref<576x64xbf16, #tpu.memory_space<vmem>>, vector<576x64xbf16>
    %cst_109 = arith.constant dense<0.000000e+00> : vector<128x64xf32>
    %103 = tpu.matmul %101, %102, %cst_109 {dimension_numbers = #tpu.dot_dimension_numbers<[1], [0], [0], [1], [0, 0, 1, 1], [], []>} : vector<128x576xbf16>, vector<576x64xbf16>, vector<128x64xf32> -> vector<128x64xf32>
    %c3_110 = arith.constant 3 : index
    %c0_111 = arith.constant 0 : index
    %104 = vector.load %arg5[%c3_110, %c0_111] : memref<9x64xf32, #tpu.memory_space<vmem>>, vector<1x64xf32>
    %c4 = arith.constant 4 : index
    %c0_112 = arith.constant 0 : index
    %105 = vector.load %arg5[%c4, %c0_112] : memref<9x64xf32, #tpu.memory_space<vmem>>, vector<1x64xf32>
    %c5 = arith.constant 5 : index
    %c0_113 = arith.constant 0 : index
    %106 = vector.load %arg5[%c5, %c0_113] : memref<9x64xf32, #tpu.memory_space<vmem>>, vector<1x64xf32>
    %107 = vector.shape_cast %103 : vector<128x64xf32> to vector<2x64x64xf32>
    %cst_114 = arith.constant dense<0.000000e+00> : vector<2x64xf32>
    %108 = vector.multi_reduction <add>, %107, %cst_114 [1] : vector<2x64x64xf32> to vector<2x64xf32>
    %109 = arith.mulf %107, %107 : vector<2x64x64xf32>
    %cst_115 = arith.constant dense<0.000000e+00> : vector<2x64xf32>
    %110 = vector.multi_reduction <add>, %109, %cst_115 [1] : vector<2x64x64xf32> to vector<2x64xf32>
    %cst_116 = arith.constant 6.400000e+01 : f32
    %111 = vector.broadcast %cst_116 : f32 to vector<1x64xf32>
    %112 = arith.mulf %111, %104 : vector<1x64xf32>
    %113 = vector.broadcast %112 : vector<1x64xf32> to vector<2x64xf32>
    %114 = arith.addf %108, %113 : vector<2x64xf32>
    %cst_117 = arith.constant 2.000000e+00 : f32
    %115 = vector.broadcast %cst_117 : f32 to vector<1x64xf32>
    %116 = arith.mulf %115, %104 : vector<1x64xf32>
    %117 = vector.broadcast %116 : vector<1x64xf32> to vector<2x64xf32>
    %118 = arith.mulf %117, %108 : vector<2x64xf32>
    %119 = arith.addf %110, %118 : vector<2x64xf32>
    %120 = arith.mulf %104, %104 : vector<1x64xf32>
    %cst_118 = arith.constant 6.400000e+01 : f32
    %121 = vector.broadcast %cst_118 : f32 to vector<1x64xf32>
    %122 = arith.mulf %121, %120 : vector<1x64xf32>
    %123 = vector.broadcast %122 : vector<1x64xf32> to vector<2x64xf32>
    %124 = arith.addf %119, %123 : vector<2x64xf32>
    %cst_119 = arith.constant dense<0.000000e+00> : vector<2x64xf32>
    %125 = tpu.matmul %114, %0, %cst_119 {dimension_numbers = #tpu.dot_dimension_numbers<[1], [0], [0], [1], [0, 0, 1, 1], [], []>} : vector<2x64xf32>, vector<64x64xf32>, vector<2x64xf32> -> vector<2x64xf32>
    %cst_120 = arith.constant 9.765625E-4 : f32
    %126 = vector.broadcast %cst_120 : f32 to vector<2x64xf32>
    %127 = arith.mulf %125, %126 : vector<2x64xf32>
    %cst_121 = arith.constant dense<0.000000e+00> : vector<2x64xf32>
    %128 = tpu.matmul %124, %0, %cst_121 {dimension_numbers = #tpu.dot_dimension_numbers<[1], [0], [0], [1], [0, 0, 1, 1], [], []>} : vector<2x64xf32>, vector<64x64xf32>, vector<2x64xf32> -> vector<2x64xf32>
    %cst_122 = arith.constant 9.765625E-4 : f32
    %129 = vector.broadcast %cst_122 : f32 to vector<2x64xf32>
    %130 = arith.mulf %128, %129 : vector<2x64xf32>
    %131 = arith.mulf %127, %127 : vector<2x64xf32>
    %132 = arith.subf %130, %131 : vector<2x64xf32>
    %cst_123 = arith.constant 9.99999974E-6 : f32
    %133 = vector.broadcast %cst_123 : f32 to vector<2x64xf32>
    %134 = arith.addf %132, %133 : vector<2x64xf32>
    %135 = math.rsqrt %134 : vector<2x64xf32>
    %136 = vector.broadcast %105 : vector<1x64xf32> to vector<2x64xf32>
    %137 = arith.mulf %136, %135 : vector<2x64xf32>
    %138 = vector.broadcast %104 : vector<1x64xf32> to vector<2x64xf32>
    %139 = arith.subf %138, %127 : vector<2x64xf32>
    %140 = arith.mulf %139, %137 : vector<2x64xf32>
    %141 = vector.broadcast %106 : vector<1x64xf32> to vector<2x64xf32>
    %142 = arith.addf %140, %141 : vector<2x64xf32>
    %143 = vector.shape_cast %137 : vector<2x64xf32> to vector<2x1x64xf32>
    %144 = vector.broadcast %143 : vector<2x1x64xf32> to vector<2x64x64xf32>
    %145 = arith.mulf %107, %144 : vector<2x64x64xf32>
    %146 = vector.shape_cast %142 : vector<2x64xf32> to vector<2x1x64xf32>
    %147 = vector.broadcast %146 : vector<2x1x64xf32> to vector<2x64x64xf32>
    %148 = arith.addf %145, %147 : vector<2x64x64xf32>
    %c3_124 = arith.constant 3 : index
    %c0_125 = arith.constant 0 : index
    %c0_126 = arith.constant 0 : index
    %c0_127 = arith.constant 0 : index
    %c0_128 = arith.constant 0 : index
    %149 = vector.load %arg1[%c3_124, %c0_125, %c0_126, %c0_127, %c0_128] : memref<4x2x9x9x32xbf16, #tpu.memory_space<vmem>>, vector<1x2x8x8x32xbf16>
    %150 = vector.shape_cast %149 : vector<1x2x8x8x32xbf16> to vector<2x8x8x32xbf16>
    %151 = vector.shape_cast %150 : vector<2x8x8x32xbf16> to vector<128x32xbf16>
    %c0_129 = arith.constant 0 : index
    %c0_130 = arith.constant 0 : index
    %152 = vector.load %arg4[%c0_129, %c0_130] : memref<32x64xbf16, #tpu.memory_space<vmem>>, vector<32x64xbf16>
    %cst_131 = arith.constant dense<0.000000e+00> : vector<128x64xf32>
    %153 = tpu.matmul %151, %152, %cst_131 {dimension_numbers = #tpu.dot_dimension_numbers<[1], [0], [0], [1], [0, 0, 1, 1], [], []>} : vector<128x32xbf16>, vector<32x64xbf16>, vector<128x64xf32> -> vector<128x64xf32>
    %c6 = arith.constant 6 : index
    %c0_132 = arith.constant 0 : index
    %154 = vector.load %arg5[%c6, %c0_132] : memref<9x64xf32, #tpu.memory_space<vmem>>, vector<1x64xf32>
    %c7 = arith.constant 7 : index
    %c0_133 = arith.constant 0 : index
    %155 = vector.load %arg5[%c7, %c0_133] : memref<9x64xf32, #tpu.memory_space<vmem>>, vector<1x64xf32>
    %c8 = arith.constant 8 : index
    %c0_134 = arith.constant 0 : index
    %156 = vector.load %arg5[%c8, %c0_134] : memref<9x64xf32, #tpu.memory_space<vmem>>, vector<1x64xf32>
    %157 = vector.shape_cast %153 : vector<128x64xf32> to vector<2x64x64xf32>
    %cst_135 = arith.constant dense<0.000000e+00> : vector<2x64xf32>
    %158 = vector.multi_reduction <add>, %157, %cst_135 [1] : vector<2x64x64xf32> to vector<2x64xf32>
    %159 = arith.mulf %157, %157 : vector<2x64x64xf32>
    %cst_136 = arith.constant dense<0.000000e+00> : vector<2x64xf32>
    %160 = vector.multi_reduction <add>, %159, %cst_136 [1] : vector<2x64x64xf32> to vector<2x64xf32>
    %cst_137 = arith.constant 6.400000e+01 : f32
    %161 = vector.broadcast %cst_137 : f32 to vector<1x64xf32>
    %162 = arith.mulf %161, %154 : vector<1x64xf32>
    %163 = vector.broadcast %162 : vector<1x64xf32> to vector<2x64xf32>
    %164 = arith.addf %158, %163 : vector<2x64xf32>
    %cst_138 = arith.constant 2.000000e+00 : f32
    %165 = vector.broadcast %cst_138 : f32 to vector<1x64xf32>
    %166 = arith.mulf %165, %154 : vector<1x64xf32>
    %167 = vector.broadcast %166 : vector<1x64xf32> to vector<2x64xf32>
    %168 = arith.mulf %167, %158 : vector<2x64xf32>
    %169 = arith.addf %160, %168 : vector<2x64xf32>
    %170 = arith.mulf %154, %154 : vector<1x64xf32>
    %cst_139 = arith.constant 6.400000e+01 : f32
    %171 = vector.broadcast %cst_139 : f32 to vector<1x64xf32>
    %172 = arith.mulf %171, %170 : vector<1x64xf32>
    %173 = vector.broadcast %172 : vector<1x64xf32> to vector<2x64xf32>
    %174 = arith.addf %169, %173 : vector<2x64xf32>
    %cst_140 = arith.constant dense<0.000000e+00> : vector<2x64xf32>
    %175 = tpu.matmul %164, %0, %cst_140 {dimension_numbers = #tpu.dot_dimension_numbers<[1], [0], [0], [1], [0, 0, 1, 1], [], []>} : vector<2x64xf32>, vector<64x64xf32>, vector<2x64xf32> -> vector<2x64xf32>
    %cst_141 = arith.constant 9.765625E-4 : f32
    %176 = vector.broadcast %cst_141 : f32 to vector<2x64xf32>
    %177 = arith.mulf %175, %176 : vector<2x64xf32>
    %cst_142 = arith.constant dense<0.000000e+00> : vector<2x64xf32>
    %178 = tpu.matmul %174, %0, %cst_142 {dimension_numbers = #tpu.dot_dimension_numbers<[1], [0], [0], [1], [0, 0, 1, 1], [], []>} : vector<2x64xf32>, vector<64x64xf32>, vector<2x64xf32> -> vector<2x64xf32>
    %cst_143 = arith.constant 9.765625E-4 : f32
    %179 = vector.broadcast %cst_143 : f32 to vector<2x64xf32>
    %180 = arith.mulf %178, %179 : vector<2x64xf32>
    %181 = arith.mulf %177, %177 : vector<2x64xf32>
    %182 = arith.subf %180, %181 : vector<2x64xf32>
    %cst_144 = arith.constant 9.99999974E-6 : f32
    %183 = vector.broadcast %cst_144 : f32 to vector<2x64xf32>
    %184 = arith.addf %182, %183 : vector<2x64xf32>
    %185 = math.rsqrt %184 : vector<2x64xf32>
    %186 = vector.broadcast %155 : vector<1x64xf32> to vector<2x64xf32>
    %187 = arith.mulf %186, %185 : vector<2x64xf32>
    %188 = vector.broadcast %154 : vector<1x64xf32> to vector<2x64xf32>
    %189 = arith.subf %188, %177 : vector<2x64xf32>
    %190 = arith.mulf %189, %187 : vector<2x64xf32>
    %191 = vector.broadcast %156 : vector<1x64xf32> to vector<2x64xf32>
    %192 = arith.addf %190, %191 : vector<2x64xf32>
    %193 = vector.shape_cast %187 : vector<2x64xf32> to vector<2x1x64xf32>
    %194 = vector.broadcast %193 : vector<2x1x64xf32> to vector<2x64x64xf32>
    %195 = arith.mulf %157, %194 : vector<2x64x64xf32>
    %196 = vector.shape_cast %192 : vector<2x64xf32> to vector<2x1x64xf32>
    %197 = vector.broadcast %196 : vector<2x1x64xf32> to vector<2x64x64xf32>
    %198 = arith.addf %195, %197 : vector<2x64x64xf32>
    %199 = arith.addf %198, %148 : vector<2x64x64xf32>
    %cst_145 = arith.constant 0.000000e+00 : f32
    %200 = vector.broadcast %cst_145 : f32 to vector<2x64x64xf32>
    %201 = arith.maximumf %199, %200 : vector<2x64x64xf32>
    %c0_146 = arith.constant 0 : index
    %c0_147 = arith.constant 0 : index
    %c0_148 = arith.constant 0 : index
    %202 = vector.load %arg7[%c0_146, %c0_147, %c0_148] : memref<2x64x64xf32, #tpu.memory_space<vmem>>, vector<2x64x64xf32>
    tpu.vector_store %arg7[%c0_146, %c0_147, %c0_148], %201 {strides = array<i32>} : memref<2x64x64xf32, #tpu.memory_space<vmem>>, vector<2x64x64xf32>,
    return
  }
  func.func @transform_0(%arg0: i32) -> (i32, i32, i32, i32, i32) {
    %c0_i32 = arith.constant 0 : i32
    %c0_i32_0 = arith.constant 0 : i32
    %c0_i32_1 = arith.constant 0 : i32
    %c0_i32_2 = arith.constant 0 : i32
    %c0_i32_3 = arith.constant 0 : i32
    %c0_i32_4 = arith.constant 0 : i32
    return %c0_i32, %c0_i32_0, %c0_i32_1, %c0_i32_2, %c0_i32_3 : i32, i32, i32, i32, i32
  }
  func.func @transform_1(%arg0: i32) -> (i32, i32) {
    %c0_i32 = arith.constant 0 : i32
    %c0_i32_0 = arith.constant 0 : i32
    %c0_i32_1 = arith.constant 0 : i32
    return %c0_i32, %c0_i32_0 : i32, i32
  }
  func.func @transform_2(%arg0: i32) -> (i32, i32) {
    %c0_i32 = arith.constant 0 : i32
    %c0_i32_0 = arith.constant 0 : i32
    %c0_i32_1 = arith.constant 0 : i32
    return %c0_i32, %c0_i32_0 : i32, i32
  }
  func.func @transform_3(%arg0: i32) -> (i32, i32) {
    %c0_i32 = arith.constant 0 : i32
    %c0_i32_0 = arith.constant 0 : i32
    %c0_i32_1 = arith.constant 0 : i32
    return %c0_i32, %c0_i32_0 : i32, i32
  }
  func.func @transform_4(%arg0: i32) -> (i32, i32) {
    %c0_i32 = arith.constant 0 : i32
    %c0_i32_0 = arith.constant 0 : i32
    %c0_i32_1 = arith.constant 0 : i32
    return %c0_i32, %c0_i32_0 : i32, i32
  }
  func.func @transform_5(%arg0: i32) -> (i32, i32) {
    %c0_i32 = arith.constant 0 : i32
    %c0_i32_0 = arith.constant 0 : i32
    %c0_i32_1 = arith.constant 0 : i32
    return %c0_i32, %c0_i32_0 : i32, i32
  }
  func.func @transform_6(%arg0: i32) -> (i32, i32, i32) {
    %c0_i32 = arith.constant 0 : i32
    %c0_i32_0 = arith.constant 0 : i32
    %c0_i32_1 = arith.constant 0 : i32
    %c0_i32_2 = arith.constant 0 : i32
    return %c0_i32, %c0_i32_0, %c0_i32_1 : i32, i32, i32
  }
}

</mosaic_0001>

<bundles_post_ra>
// kernel: down_block_fwd.1
= control target key start
LH: loop header
LB: loop body
LE: loop exit
PB: predicated region body
PF: predicated region fallthrough
CT: control target
= control target key end

     0   :  { %s6926_s29 = smov 64   ;;  %s6927_s10 = smov 32   ;;  %vm82_vm0 = vsmask.f32 3328  ;;  %vm83_vm1 = vsmask.f32 7440  ;;  %s9972_s0 = inlined_call_operand.vmem [shape: bf16[4,2,9,9,32], index: 0, kind: input, shape index: {}]   ;;  %s9973_s1 = inlined_call_operand.vmem [shape: bf16[288,64], index: 1, kind: input, shape index: {}]   ;;  %s9974_s2 = inlined_call_operand.vmem [shape: bf16[576,64], index: 2, kind: input, shape index: {}]   ;;  %s9975_s3 = inlined_call_operand.vmem [shape: bf16[32,64], index: 3, kind: input, shape index: {}]   ;;  %s9976_s4 = inlined_call_operand.vmem [shape: f32[9,64], index: 4, kind: input, shape index: {}]   ;;  %s9977_s5 = inlined_call_operand.vmem [shape: f32[64,64], index: 5, kind: input, shape index: {}]   ;;  %s9978_s6 = inlined_call_operand.hbm [shape: f32[2,64,64], index: 6, kind: output, shape index: {}]  }
   0x1   :  { %v6974_v0 = vld [vmem:[%s9972_s0 + $0x8] sm:$0xf]  ;;  %v6979_v1 = vld [vmem:[%s9972_s0 + $0x10] sm:$0xf]  ;;  %v6736_v4 = vld [vmem:[%s9973_s1 + $0x78] sm:$0xff]   ;;  %s6928_s17 = smov 96  }
   0x2   :  { %v5946_v2 = vcombine.low %v6974_v0, %v6979_v1  ;;  %v6705_v3 = vld [vmem:[%s9972_s0 + $0x90] ss:$8 sps:$4 sm:$0xff]   ;;  %v648_v5 = vshrl.u32 %v6979_v1, 16  ;;  %v651_v6 = vshll.u32 %v6979_v1, 16  ;;  %v5802_v7 = vld [vmem:[%s9972_s0 + $0x120] sm:$0xf]  ;;  %6238 = vmatprep.subr.bf16.mxu0 %v6736_v4  ;;  %vm7023_vm2 = vmor %vm82_vm0, %vm83_vm1 }
   0x3   :  { %v6737_v8 = vld [vmem:[%s9973_s1 + $0x38] sm:$0xff]   ;;  %937 = vrot.lane.b32.xlu0 %v6705_v3, %s6927_s10  ;;  %v5803_v9 = vld [vmem:[%s9972_s0 + $0x128] sm:$0xf]  ;;  %v360_v10 = vshrl.u32 %v5802_v7, 16  ;;  %v363_v11 = vshll.u32 %v5802_v7, 16  ;;  %v6738_v12 = vld [vmem:[%s9973_s1 + $0x70] sm:$0xff]  }
   0x4   :  { %1169 = vrot.lane.b32.xlu1 %v5946_v2, %s6926_s29  ;;  %v374_v13 = vshrl.u32 %v5803_v9, 16  ;;  %v377_v14 = vshll.u32 %v5803_v9, 16  ;;  %v5922_v15 = vcombine.low %v5802_v7, %v5803_v9  ;;  %6239 = vmatpush3.bf16.msra.mxu0 %v6737_v8  ;;  %v6707_v18 = vld [vmem:[%s9972_s0 + $0x98] ss:$8 sps:$4 sm:$0xff]   ;;  %v5834_v22 = vld [vmem:[%s9972_s0 + $0x124] sm:$0x1] }
   0x5   :  { %v362_v16 = vrot.slane %v360_v10, 4  ;;  %v365_v17 = vrot.slane %v363_v11, 5  ;;  %6240 = vmatprep.subr.bf16.mxu0 %v6738_v12  ;;  %v6708_v21 = vld [vmem:[%s9972_s0 + $0xa0] ss:$8 sps:$4 sm:$0xff]   ;;  %v634_v24 = vshrl.u32 %v6974_v0, 16  ;;  %v369_v26 = vshll.u32 %v5834_v22, 16 }
   0x6   :  { %v376_v19 = vrot.slane %v374_v13, 4  ;;  %v379_v20 = vrot.slane %v377_v14, 5  ;;  %v5835_v25 = vld [vmem:[%s9972_s0 + $0x12c] sm:$0x1]  ;;  %v33_v28 = vld [vmem:[%s9972_s0] sm:$0xf] }
   0x7   :  { %1225 = vrot.lane.b32.xlu0 %v6707_v18, %s6928_s17  ;;  %v366_v23 = vor.u32 %v365_v17, %v362_v16  ;;  %v383_v31 = vshll.u32 %v5835_v25, 16  ;;  %v34_v32 = vld [vmem:[%s9972_s0 + $0x8] sm:$0xf]  ;;  %v66_v33 = vld [vmem:[%s9972_s0 + $0x4] sm:$0x1]  ;;  %v371_v34 = vrot.slane %v369_v26, 5 }
   0x8   :  { %1033 = vrot.lane.b32.xlu1 %v5922_v15, %s6928_s17  ;;  %v380_v27 = vor.u32 %v379_v20, %v376_v19  ;;  %v67_v36 = vld [vmem:[%s9972_s0 + $0xc] sm:$0x1]  ;;  %v86_v37 = vshrl.u32 %v33_v28, 16  ;;  %v89_v38 = vshll.u32 %v33_v28, 16  ;;  %v95_v40 = vshll.u32 %v66_v33, 16  ;;  %v6739_v49 = vld [vmem:[%s9973_s1 + $0x30] sm:$0xff]  }
   0x9   :  { %v367_v30 = vrot.slane %v366_v23, 4  ;;  %v385_v39 = vrot.slane %v383_v31, 5  ;;  %v100_v41 = vshrl.u32 %v34_v32, 16  ;;  %v103_v42 = vshll.u32 %v34_v32, 16  ;;  %v7040_v43 = vld [vmem:[%s9972_s0 + $0x130] sm:$0xf]  ;;  %6241 = vmatpush3.bf16.msra.mxu0 %v6739_v49 }
   0xa   :  { %v381_v35 = vrot.slane %v380_v27, 4  ;;  %v88_v45 = vrot.slane %v86_v37, 4  ;;  %v91_v46 = vrot.slane %v89_v38, 5  ;;  %v109_v47 = vshll.u32 %v67_v36, 16  ;;  %v7047_v48 = vld [vmem:[%s9972_s0 + $0x138] sm:$0xf] }
   0xb   :  { %v372_v44 = vsel %vm7023_vm2, %v367_v30, %v371_v34  ;;  %v97_v51 = vrot.slane %v95_v40, 5  ;;  %v102_v52 = vrot.slane %v100_v41, 4  ;;  %v105_v53 = vrot.slane %v103_v42, 5  ;;  %v5836_v54 = vld [vmem:[%s9972_s0 + $0x134] sm:$0x1]  ;;  %v6740_v55 = vld [vmem:[%s9973_s1 + $0x68] sm:$0xff]  }
   0xc   :  { %939 = vrot.lane.b32.xlu1 %v6708_v21, %s6927_s10  ;;  %v386_v50 = vsel %vm7023_vm2, %v381_v35, %v385_v39  ;;  %v92_v57 = vor.u32 %v91_v46, %v88_v45  ;;  %v111_v58 = vrot.slane %v109_v47, 5  ;;  %v5837_v59 = vld [vmem:[%s9972_s0 + $0x13c] sm:$0x1]  ;;  %v388_v60 = vshrl.u32 %v7040_v43, 16  ;;  %v35_v3 = vld [vmem:[%s9972_s0 + $0x10] sm:$0xf]  ;;  %6242 = vmatprep.subr.bf16.mxu0 %v6740_v55 }
   0xd   :  { %v5938_v56 = vcombine.low %v372_v44, %v386_v50  ;;  %v106_v61 = vor.u32 %v105_v53, %v102_v52  ;;  %v391_v62 = vshll.u32 %v7040_v43, 16  ;;  %v397_v63 = vshll.u32 %v5836_v54, 16  ;;  %v6741_v4 = vld [vmem:[%s9973_s1 + $0x28] sm:$0xff]   ;;  %v68_v11 = vld [vmem:[%s9972_s0 + $0x14] sm:$0x1]  ;;  %v6742_v21 = vld [vmem:[%s9973_s1 + $0x60] sm:$0xff]  }
   0xe   :  { %v402_v2 = vshrl.u32 %v7047_v48, 16  ;;  %v93_v7 = vrot.slane %v92_v57, 4  ;;  %v390_v8 = vrot.slane %v388_v60, 4  ;;  %v405_v9 = vshll.u32 %v7047_v48, 16  ;;  %v36_v16 = vld [vmem:[%s9972_s0 + $0x18] sm:$0xf]  ;;  %6243 = vmatpush3.bf16.msra.mxu0 %v6741_v4 }
   0xf   :  { %1113 = vrot.lane.b32.xlu0 %v5938_v56, %s6927_s10  ;;  %v411_v10 = vshll.u32 %v5837_v59, 16  ;;  %v107_v12 = vrot.slane %v106_v61, 4  ;;  %v393_v13 = vrot.slane %v391_v62, 5  ;;  %v399_v14 = vrot.slane %v397_v63, 5  ;;  %v69_v25 = vld [vmem:[%s9972_s0 + $0x1c] sm:$0x1]  ;;  %6244 = vmatprep.subr.bf16.mxu0 %v6742_v21 }
  0x10   :  { %v404_v15 = vrot.slane %v402_v2, 4  ;;  %v98_v17 = vsel %vm7023_vm2, %v93_v7, %v97_v51  ;;  %v407_v18 = vrot.slane %v405_v9, 5  ;;  %v114_v20 = vshrl.u32 %v35_v3, 16  ;;  %v5852_v33 = vld [vmem:[%s9972_s0 + $0x18] sm:$0xf]  ;;  %v6743_v54 = vld [vmem:[%s9973_s1 + $0x20] sm:$0xff]  }
  0x11   :  { %v413_v19 = vrot.slane %v411_v10, 5  ;;  %v112_v22 = vsel %vm7023_vm2, %v107_v12, %v111_v58  ;;  %v394_v23 = vor.u32 %v393_v13, %v390_v8  ;;  %v117_v26 = vshll.u32 %v35_v3, 16  ;;  %v5853_v47 = vld [vmem:[%s9972_s0 + $0x20] sm:$0xf]  ;;  %v5838_v59 = vld [vmem:[%s9972_s0 + $0x144] sm:$0x1] }
  0x12   :  { %v123_v27 = vshll.u32 %v68_v11, 16  ;;  %v5914_v28 = vcombine.low %v98_v17, %v112_v22  ;;  %v408_v30 = vor.u32 %v407_v18, %v404_v15  ;;  %v116_v31 = vrot.slane %v114_v20, 4  ;;  %v7109_v53 = vld [vmem:[%s9972_s0 + $0x140] sm:$0xf]  ;;  %6245 = vmatpush3.bf16.msra.mxu0 %v6743_v54  ;;  %v5839_v1 = vld [vmem:[%s9972_s0 + $0x14c] sm:$0x1] }
  0x13   :  { %v128_v32 = vshrl.u32 %v36_v16, 16  ;;  %v637_v34 = vshll.u32 %v6974_v0, 16  ;;  %v395_v35 = vrot.slane %v394_v23, 4  ;;  %v119_v36 = vrot.slane %v117_v26, 5  ;;  %v38_v11 = vld [vmem:[%s9972_s0 + $0x28] sm:$0xf] }
  0x14   :  { %v131_v37 = vshll.u32 %v36_v16, 16  ;;  %977 = vrot.lane.b32.xlu1 %v5914_v28, %s6926_s29  ;;  %v409_v38 = vrot.slane %v408_v30, 4  ;;  %v137_v40 = vshll.u32 %v69_v25, 16  ;;  %v662_v41 = vshrl.u32 %v5852_v33, 16  ;;  %v70_v17 = vld [vmem:[%s9972_s0 + $0x24] sm:$0x1] }
  0x15   :  { %v130_v39 = vrot.slane %v128_v32, 4  ;;  %v400_v42 = vsel %vm7023_vm2, %v395_v35, %v399_v14  ;;  %v120_v44 = vor.u32 %v119_v36, %v116_v31  ;;  %v125_v45 = vrot.slane %v123_v27, 5  ;;  %v6711_v14 = vld [vmem:[%s9972_s0 + $0xa8] ss:$8 sps:$4 sm:$0xff]   ;;  %v6744_v18 = vld [vmem:[%s9973_s1 + $0x58] sm:$0xff]  }
  0x16   :  { %v133_v46 = vrot.slane %v131_v37, 5  ;;  %v7102_v49 = vrot.slane %v648_v5, 4  ;;  %v414_v50 = vsel %vm7023_vm2, %v409_v38, %v413_v19  ;;  %v139_v51 = vrot.slane %v137_v40, 5  ;;  %v7117_v5 = vld [vmem:[%s9972_s0 + $0x148] sm:$0xf]  ;;  %6246 = vmatprep.subr.bf16.mxu0 %v6744_v18  ;;  %v6747_v38 = vld [vmem:[%s9973_s1 + $0x50] sm:$0xff]  }
  0x17   :  { %v665_v52 = vshll.u32 %v5852_v33, 16  ;;  %v5939_v55 = vcombine.low %v400_v42, %v414_v50  ;;  %v121_v56 = vrot.slane %v120_v44, 4  ;;  %v676_v58 = vshrl.u32 %v5853_v47, 16  ;;  %v71_v27 = vld [vmem:[%s9972_s0 + $0x2c] sm:$0x1] }
  0x18   :  { %v134_v57 = vor.u32 %v133_v46, %v130_v39  ;;  %v7124_v60 = vrot.slane %v651_v6, 5  ;;  %v7128_v61 = vrot.slane %v634_v24, 4  ;;  %v7130_v62 = vrot.slane %v662_v41, 4  ;;  %v37_v24 = vld [vmem:[%s9972_s0 + $0x20] sm:$0xf] }
  0x19   :  { %v679_v63 = vshll.u32 %v5853_v47, 16  ;;  %1115 = vrot.lane.b32.xlu0 %v5939_v55, %s6927_s10  ;;  %v126_v2 = vsel %vm7023_vm2, %v121_v56, %v125_v45  ;;  %v5947_v4 = vcombine.low %v5852_v33, %v5853_v47  ;;  %v416_v6 = vshrl.u32 %v7109_v53, 16  ;;  %v6712_v50 = vld [vmem:[%s9972_s0 + $0xb0] ss:$8 sps:$4 sm:$0xff]   ;;  %v5854_v56 = vld [vmem:[%s9972_s0 + $0x28] sm:$0xf] }
  0x1a   :  { %v135_v3 = vrot.slane %v134_v57, 4  ;;  %v7142_v7 = vrot.slane %v665_v52, 5  ;;  %v419_v8 = vshll.u32 %v7109_v53, 16  ;;  %v425_v9 = vshll.u32 %v5838_v59, 16 }
  0x1b   :  { %v430_v10 = vshrl.u32 %v7117_v5, 16  ;;  %v678_v13 = vrot.slane %v676_v58, 4  ;;  %v418_v15 = vrot.slane %v416_v6, 4  ;;  %v433_v16 = vshll.u32 %v7117_v5, 16  ;;  %v7191_v58 = vld [vmem:[%s9972_s0 + $0x30] sm:$0xf] }
  0x1c   :  { %v140_v12 = vsel %vm7023_vm2, %v135_v3, %v139_v51  ;;  %v681_v20 = vrot.slane %v679_v63, 5  ;;  %v5923_v21 = vcombine.low %v7040_v43, %v7047_v48  ;;  %v421_v22 = vrot.slane %v419_v8, 5  ;;  %v6745_v43 = vld [vmem:[%s9973_s1 + $0x18] sm:$0xff]   ;;  %v6748_v63 = vld [vmem:[%s9973_s1 + $0x10] sm:$0xff]  }
  0x1d   :  { %v5915_v19 = vcombine.low %v126_v2, %v140_v12  ;;  %1171 = vrot.lane.b32.xlu0 %v5947_v4, %s6926_s29  ;;  %v432_v23 = vrot.slane %v430_v10, 4  ;;  %v435_v25 = vrot.slane %v433_v16, 5  ;;  %v439_v26 = vshll.u32 %v5839_v1, 16  ;;  %6247 = vmatpush3.bf16.msra.mxu0 %v6745_v43  ;;  %v7204_v6 = vld [vmem:[%s9972_s0 + $0x158] sm:$0xf] }
  0x1e   :  { %v142_v28 = vshrl.u32 %v37_v24, 16  ;;  %v422_v30 = vor.u32 %v421_v22, %v418_v15  ;;  %v427_v31 = vrot.slane %v425_v9, 5  ;;  %v145_v32 = vshll.u32 %v37_v24, 16  ;;  %6248 = vmatprep.subr.bf16.mxu0 %v6747_v38  ;;  %v5840_v24 = vld [vmem:[%s9972_s0 + $0x154] sm:$0x1] }
  0x1f   :  { %979 = vrot.lane.b32.xlu1 %v5915_v19, %s6926_s29  ;;  %v151_v33 = vshll.u32 %v70_v17, 16  ;;  %v436_v48 = vor.u32 %v435_v25, %v432_v23  ;;  %v441_v35 = vrot.slane %v439_v26, 5  ;;  %v156_v37 = vshrl.u32 %v38_v11, 16  ;;  %v72_v15 = vld [vmem:[%s9972_s0 + $0x34] sm:$0x1]  ;;  %v6749_v26 = vld [vmem:[%s9973_s1 + $0x48] sm:$0xff]  }
  0x20   :  { %v144_v36 = vrot.slane %v142_v28, 4  ;;  %v668_v39 = vor.u32 %v7142_v7, %v7130_v62  ;;  %v423_v40 = vrot.slane %v422_v30, 4  ;;  %v147_v41 = vrot.slane %v145_v32, 5  ;;  %v7196_v62 = vld [vmem:[%s9972_s0 + $0x150] sm:$0xf] }
  0x21   :  { %v159_v42 = vshll.u32 %v38_v11, 16  ;;  %v682_v44 = vor.u32 %v681_v20, %v678_v13  ;;  %1227 = vrot.lane.b32.xlu0 %v6711_v14, %s6928_s17  ;;  %v437_v45 = vrot.slane %v436_v48, 4  ;;  %v158_v46 = vrot.slane %v156_v37, 4  ;;  %v5841_v11 = vld [vmem:[%s9972_s0 + $0x15c] sm:$0x1]  ;;  %6249 = vmatpush3.bf16.msra.mxu0 %v6748_v63 }
  0x22   :  { %v165_v47 = vshll.u32 %v71_v27, 16  ;;  %v428_v51 = vsel %vm7023_vm2, %v423_v40, %v427_v31  ;;  %v148_v52 = vor.u32 %v147_v41, %v144_v36  ;;  %v153_v54 = vrot.slane %v151_v33, 5  ;;  %v7229_v14 = vld [vmem:[%s9972_s0 + $0x30] sm:$0xf]  ;;  %v6715_v22 = vld [vmem:[%s9972_s0 + $0xb8] ss:$8 sps:$4 sm:$0xff]   ;;  %6250 = vmatprep.subr.bf16.mxu0 %v6749_v26 }
  0x23   :  { %1035 = vrot.lane.b32.xlu1 %v5923_v21, %s6928_s17  ;;  %v161_v55 = vrot.slane %v159_v42, 5  ;;  %v442_v57 = vsel %vm7023_vm2, %v437_v45, %v441_v35  ;;  %v690_v59 = vshrl.u32 %v5854_v56, 16  ;;  %v7211_v7 = vrot.slane %v637_v34, 5  ;;  %v7255_v32 = vld [vmem:[%s9972_s0 + $0x38] sm:$0xf]  ;;  %v6752_v45 = vld [vmem:[%s9973_s1 + $0x88] sm:$0xff]  }
  0x24   :  { %v5940_v2 = vcombine.low %v428_v51, %v442_v57  ;;  %v149_v3 = vrot.slane %v148_v52, 4  ;;  %v167_v1 = vrot.slane %v165_v47, 5  ;;  %v7213_v8 = vrot.slane %v668_v39, 4  ;;  %v6750_v39 = vld [vmem:[%s9973_s1 + $0x8] sm:$0xff]   ;;  %6516 = vmatprep.subr.bf16.mxu1 %v6752_v45 }
  0x25   :  { %v162_v4 = vor.u32 %v161_v55, %v158_v46  ;;  %v7215_v9 = vrot.slane %v682_v44, 4  ;;  %v693_v10 = vshll.u32 %v5854_v56, 16  ;;  %v5948_v34 = vcombine.low %v5854_v56, %v7191_v58  ;;  %6251 = vmatpush3.bf16.msra.mxu0 %v6750_v39  ;;  %v6716_v57 = vld [vmem:[%s9972_s0 + $0xc0] ss:$8 sps:$4 sm:$0xff]   ;;  %6517 = vmatpush3.bf16.msra.mxu1 %v6752_v45 }
  0x26   :  { %1117 = vrot.lane.b32.xlu0 %v5940_v2, %s6927_s10  ;;  %v154_v12 = vsel %vm7023_vm2, %v149_v3, %v153_v54  ;;  %v444_v13 = vshrl.u32 %v7196_v62, 16  ;;  %v7234_v16 = vrot.slane %v690_v59, 4  ;;  %v447_v17 = vshll.u32 %v7196_v62, 16 }
  0x27   :  { %941 = vrot.lane.b32.xlu1 %v6712_v50, %s6927_s10  ;;  %v163_v0 = vrot.slane %v162_v4, 4  ;;  %v453_v18 = vshll.u32 %v5840_v24, 16  ;;  %v458_v19 = vshrl.u32 %v7204_v6, 16  ;;  %v704_v21 = vshrl.u32 %v7191_v58, 16 }
  0x28   :  { %v446_v23 = vrot.slane %v444_v13, 4  ;;  %v461_v25 = vshll.u32 %v7204_v6, 16  ;;  %v7248_v28 = vrot.slane %v693_v10, 5  ;;  %v5924_v30 = vcombine.low %v7109_v53, %v7117_v5  ;;  %v73_v53 = vld [vmem:[%s9972_s0 + $0x3c] sm:$0x1] }
  0x29   :  { %v168_v20 = vsel %vm7023_vm2, %v163_v0, %v167_v1  ;;  %v449_v31 = vrot.slane %v447_v17, 5  ;;  %v460_v33 = vrot.slane %v458_v19, 4  ;;  %v467_v48 = vshll.u32 %v5841_v11, 16  ;;  %v7290_v1 = vld [vmem:[%s9972_s0 + $0x40] sm:$0xf] }
  0x2a   :  { %v5916_v27 = vcombine.low %v154_v12, %v168_v20  ;;  %1173 = vrot.lane.b32.xlu0 %v5948_v34, %s6926_s29  ;;  %v463_v43 = vrot.slane %v461_v25, 5  ;;  %v170_v35 = vshrl.u32 %v7229_v14, 16  ;;  %v455_v37 = vrot.slane %v453_v18, 5  ;;  %v7295_v10 = vld [vmem:[%s9972_s0 + $0x168] sm:$0xf]  ;;  %v6754_v11 = vld [vmem:[%s9973_s1 + $0x40] sm:$0xff]  }
  0x2b   :  { %v450_v36 = vor.u32 %v449_v31, %v446_v23  ;;  %v173_v5 = vshll.u32 %v7229_v14, 16  ;;  %v179_v38 = vshll.u32 %v72_v15, 16  ;;  %v469_v41 = vrot.slane %v467_v48, 5  ;;  %v7303_v15 = vld [vmem:[%s9972_s0 + $0x170] sm:$0xf]  ;;  %6252 = vmatprep.subr.bf16.mxu0 %v6754_v11 }
  0x2c   :  { %981 = vrot.lane.b32.xlu1 %v5916_v27, %s6926_s29  ;;  %v464_v40 = vor.u32 %v463_v43, %v460_v33  ;;  %v172_v42 = vrot.slane %v170_v35, 4  ;;  %v184_v44 = vshrl.u32 %v7255_v32, 16  ;;  %v7271_v46 = vrot.slane %v704_v21, 4  ;;  %v5842_v17 = vld [vmem:[%s9972_s0 + $0x16c] sm:$0x1] }
  0x2d   :  { %v451_v47 = vrot.slane %v450_v36, 4  ;;  %v175_v50 = vrot.slane %v173_v5, 5  ;;  %v187_v51 = vshll.u32 %v7255_v32, 16  ;;  %v707_v52 = vshll.u32 %v7191_v58, 16  ;;  %v5856_v58 = vld [vmem:[%s9972_s0 + $0x38] sm:$0xf] }
  0x2e   :  { %1229 = vrot.lane.b32.xlu0 %v6715_v22, %s6928_s17  ;;  %v465_v54 = vrot.slane %v464_v40, 4  ;;  %v186_v55 = vrot.slane %v184_v44, 4  ;;  %v193_v56 = vshll.u32 %v73_v53, 16  ;;  %v181_v2 = vrot.slane %v179_v38, 5  ;;  %v5843_v20 = vld [vmem:[%s9972_s0 + $0x174] sm:$0x1] }
  0x2f   :  { %v456_v59 = vsel %vm7023_vm2, %v451_v47, %v455_v37  ;;  %v176_v63 = vor.u32 %v175_v50, %v172_v42  ;;  %v189_v3 = vrot.slane %v187_v51, 5  ;;  %v718_v24 = vshrl.u32 %v5856_v58, 16  ;;  %v7316_v21 = vld [vmem:[%s9972_s0 + $0x48] sm:$0xf]  ;;  %v74_v43 = vld [vmem:[%s9972_s0 + $0x4c] sm:$0x1] }
  0x30   :  { %1037 = vrot.lane.b32.xlu1 %v5924_v30, %s6928_s17  ;;  %v470_v4 = vsel %vm7023_vm2, %v465_v54, %v469_v41  ;;  %v195_v13 = vrot.slane %v193_v56, 5  ;;  %v7308_v18 = vrot.slane %v707_v52, 5  ;;  %v721_v19 = vshll.u32 %v5856_v58, 16  ;;  %v6755_v53 = vld [vmem:[%s9973_s1] sm:$0xff]   ;;  %v7345_v41 = vld [vmem:[%s9972_s0 + $0x50] sm:$0xf] }
  0x31   :  { %v5941_v12 = vcombine.low %v456_v59, %v470_v4  ;;  %v177_v0 = vrot.slane %v176_v63, 4  ;;  %v190_v34 = vor.u32 %v189_v3, %v186_v55  ;;  %v5949_v25 = vcombine.low %v5856_v58, %v7290_v1  ;;  %v6719_v42 = vld [vmem:[%s9972_s0 + $0xc8] ss:$8 sps:$4 sm:$0xff]   ;;  %6253 = vmatpush3.bf16.msra.mxu0 %v6755_v53  ;;  %v75_v51 = vld [vmem:[%s9972_s0 + $0x54] sm:$0x1]  ;;  %v6756_v55 = vld [vmem:[%s9973_s1 + $0x80] sm:$0xff]  }
  0x32   :  { %v472_v26 = vshrl.u32 %v7295_v10, 16  ;;  %v7324_v27 = vrot.slane %v718_v24, 4  ;;  %v475_v30 = vshll.u32 %v7295_v10, 16  ;;  %v481_v31 = vshll.u32 %v5842_v17, 16  ;;  %v5858_v24 = vld [vmem:[%s9972_s0 + $0x50] sm:$0xf]  ;;  %6518 = vmatprep.subr.bf16.mxu1 %v6756_v55 }
  0x33   :  { %1119 = vrot.lane.b32.xlu0 %v5941_v12, %s6927_s10  ;;  %v182_v22 = vsel %vm7023_vm2, %v177_v0, %v181_v2  ;;  %v191_v23 = vrot.slane %v190_v34, 4  ;;  %v486_v33 = vshrl.u32 %v7303_v15, 16  ;;  %v732_v35 = vshrl.u32 %v7290_v1, 16  ;;  %6519 = vmatpush3.bf16.msra.mxu1 %v6756_v55 }
  0x34   :  { %943 = vrot.lane.b32.xlu1 %v6716_v57, %s6927_s10  ;;  %v474_v36 = vrot.slane %v472_v26, 4  ;;  %v489_v37 = vshll.u32 %v7303_v15, 16  ;;  %v7338_v38 = vrot.slane %v721_v19, 5  ;;  %v5925_v39 = vcombine.low %v7196_v62, %v7204_v6  ;;  %v5859_v26 = vld [vmem:[%s9972_s0 + $0x58] sm:$0xf] }
  0x35   :  { %v196_v48 = vsel %vm7023_vm2, %v191_v23, %v195_v13  ;;  %v477_v40 = vrot.slane %v475_v30, 5  ;;  %v488_v44 = vrot.slane %v486_v33, 4  ;;  %v495_v47 = vshll.u32 %v5843_v20, 16 }
  0x36   :  { %v5917_v5 = vcombine.low %v182_v22, %v196_v48  ;;  %v491_v45 = vrot.slane %v489_v37, 5  ;;  %v198_v50 = vshrl.u32 %v7316_v21, 16  ;;  %v483_v6 = vrot.slane %v481_v31, 5  ;;  %v7385_v31 = vld [vmem:[%s9972_s0 + $0x178] sm:$0xf] }
  0x37   :  { %1175 = vrot.lane.b32.xlu0 %v5949_v25, %s6926_s29  ;;  %v478_v62 = vor.u32 %v477_v40, %v474_v36  ;;  %v201_v52 = vshll.u32 %v7316_v21, 16  ;;  %v207_v54 = vshll.u32 %v74_v43, 16  ;;  %v497_v57 = vrot.slane %v495_v47, 5  ;;  %v5844_v37 = vld [vmem:[%s9972_s0 + $0x17c] sm:$0x1] }
  0x38   :  { %983 = vrot.lane.b32.xlu1 %v5917_v5, %s6926_s29  ;;  %v492_v56 = vor.u32 %v491_v45, %v488_v44  ;;  %v200_v59 = vrot.slane %v198_v50, 4  ;;  %v212_v63 = vshrl.u32 %v7345_v41, 16  ;;  %v735_v2 = vshll.u32 %v7290_v1, 16  ;;  %v6720_v1 = vld [vmem:[%s9972_s0 + $0xd8] ss:$8 sps:$4 sm:$0xff]  }
  0x39   :  { %v479_v3 = vrot.slane %v478_v62, 4  ;;  %v203_v58 = vrot.slane %v201_v52, 5  ;;  %v215_v4 = vshll.u32 %v7345_v41, 16  ;;  %v221_v0 = vshll.u32 %v75_v51, 16  ;;  %v7414_v62 = vld [vmem:[%s9972_s0 + $0x58] sm:$0xf] }
  0x3a   :  { %v493_v11 = vrot.slane %v492_v56, 4  ;;  %v214_v12 = vrot.slane %v212_v63, 4  ;;  %v746_v34 = vshrl.u32 %v5858_v24, 16  ;;  %v209_v19 = vrot.slane %v207_v54, 5  ;;  %v76_v63 = vld [vmem:[%s9972_s0 + $0x5c] sm:$0x1] }
  0x3b   :  { %1231 = vrot.lane.b32.xlu0 %v6719_v42, %s6928_s17  ;;  %v484_v13 = vsel %vm7023_vm2, %v479_v3, %v483_v6  ;;  %v204_v17 = vor.u32 %v203_v58, %v200_v59  ;;  %v217_v20 = vrot.slane %v215_v4, 5  ;;  %v696_v22 = vor.u32 %v7248_v28, %v7234_v16  ;;  %v5845_v42 = vld [vmem:[%s9972_s0 + $0x184] sm:$0x1] }
  0x3c   :  { %1039 = vrot.lane.b32.xlu1 %v5925_v39, %s6928_s17  ;;  %v7375_v23 = vrot.slane %v732_v35, 4  ;;  %v498_v25 = vsel %vm7023_vm2, %v493_v11, %v497_v57  ;;  %v749_v30 = vshll.u32 %v5858_v24, 16  ;;  %v223_v36 = vrot.slane %v221_v0, 5  ;;  %v7390_v35 = vld [vmem:[%s9972_s0 + $0x180] sm:$0xf] }
  0x3d   :  { %v5942_v33 = vcombine.low %v484_v13, %v498_v25  ;;  %v205_v43 = vrot.slane %v204_v17, 4  ;;  %v218_v48 = vor.u32 %v217_v20, %v214_v12  ;;  %v710_v53 = vor.u32 %v7308_v18, %v7271_v46  ;;  %v6723_v11 = vld [vmem:[%s9972_s0 + $0xe0] ss:$8 sps:$4 sm:$0xff]   ;;  %v77_v13 = vld [vmem:[%s9972_s0 + $0x64] sm:$0x1] }
  0x3e   :  { %v724_v5 = vor.u32 %v7338_v38, %v7324_v27  ;;  %v7399_v39 = vrot.slane %v735_v2, 5  ;;  %v7401_v40 = vrot.slane %v746_v34, 4  ;;  %v5950_v47 = vcombine.low %v5858_v24, %v5859_v26  ;;  %v7431_v24 = vld [vmem:[%s9972_s0 + $0x60] sm:$0xf]  ;;  %v5847_v46 = vld [vmem:[%s9972_s0 + $0x194] sm:$0x1] }
  0x3f   :  { %1121 = vrot.lane.b32.xlu0 %v5942_v33, %s6927_s10  ;;  %v210_v44 = vsel %vm7023_vm2, %v205_v43, %v209_v19  ;;  %v219_v45 = vrot.slane %v218_v48, 4  ;;  %v500_v50 = vshrl.u32 %v7385_v31, 16  ;;  %v760_v6 = vshrl.u32 %v5859_v26, 16 }
  0x40   :  { %945 = vrot.lane.b32.xlu1 %v6720_v1, %s6927_s10  ;;  %v503_v51 = vshll.u32 %v7385_v31, 16  ;;  %v509_v52 = vshll.u32 %v5844_v37, 16  ;;  %v514_v54 = vshrl.u32 %v7390_v35, 16  ;;  %v7420_v56 = vrot.slane %v749_v30, 5 }
  0x41   :  { %v224_v55 = vsel %vm7023_vm2, %v219_v45, %v223_v36  ;;  %v502_v57 = vrot.slane %v500_v50, 4  ;;  %v517_v59 = vshll.u32 %v7390_v35, 16  ;;  %v763_v3 = vshll.u32 %v5859_v26, 16 }
  0x42   :  { %v5918_v2 = vcombine.low %v210_v44, %v224_v55  ;;  %v5926_v58 = vcombine.low %v7295_v10, %v7303_v15  ;;  %v505_v4 = vrot.slane %v503_v51, 5  ;;  %v516_v12 = vrot.slane %v514_v54, 4  ;;  %v7455_v54 = vld [vmem:[%s9972_s0 + $0x60] sm:$0xf]  ;;  %v7460_v55 = vld [vmem:[%s9972_s0 + $0x68] sm:$0xf] }
  0x43   :  { %1177 = vrot.lane.b32.xlu0 %v5950_v47, %s6926_s29  ;;  %v519_v0 = vrot.slane %v517_v59, 5  ;;  %v523_v34 = vshll.u32 %v5845_v42, 16  ;;  %v226_v1 = vshrl.u32 %v7414_v62, 16  ;;  %v511_v15 = vrot.slane %v509_v52, 5  ;;  %v6724_v42 = vld [vmem:[%s9972_s0 + $0xe8] ss:$8 sps:$4 sm:$0xff]  }
  0x44   :  { %985 = vrot.lane.b32.xlu1 %v5918_v2, %s6926_s29  ;;  %v506_v10 = vor.u32 %v505_v4, %v502_v57  ;;  %v229_v17 = vshll.u32 %v7414_v62, 16  ;;  %v235_v19 = vshll.u32 %v76_v63, 16  ;;  %v240_v30 = vshrl.u32 %v7431_v24, 16  ;;  %v7471_v2 = vld [vmem:[%s9972_s0 + $0x188] sm:$0xf] }
  0x45   :  { %v520_v20 = vor.u32 %v519_v0, %v516_v12  ;;  %v525_v25 = vrot.slane %v523_v34, 5  ;;  %v228_v26 = vrot.slane %v226_v1, 4  ;;  %v762_v33 = vrot.slane %v760_v6, 4  ;;  %v7513_v34 = vld [vmem:[%s9972_s0 + $0x68] sm:$0xf] }
  0x46   :  { %v507_v43 = vrot.slane %v506_v10, 4  ;;  %v231_v48 = vrot.slane %v229_v17, 5  ;;  %v243_v36 = vshll.u32 %v7431_v24, 16  ;;  %v765_v37 = vrot.slane %v763_v3, 5  ;;  %v7476_v3 = vld [vmem:[%s9972_s0 + $0x190] sm:$0xf] }
  0x47   :  { %1233 = vrot.lane.b32.xlu0 %v6723_v11, %s6928_s17  ;;  %v521_v44 = vrot.slane %v520_v20, 4  ;;  %v242_v45 = vrot.slane %v240_v30, 4  ;;  %v249_v47 = vshll.u32 %v77_v13, 16  ;;  %v237_v51 = vrot.slane %v235_v19, 5  ;;  %v78_v17 = vld [vmem:[%s9972_s0 + $0x6c] sm:$0x1] }
  0x48   :  { %1041 = vrot.lane.b32.xlu1 %v5926_v58, %s6928_s17  ;;  %v512_v50 = vsel %vm7023_vm2, %v507_v43, %v511_v15  ;;  %v232_v6 = vor.u32 %v231_v48, %v228_v26  ;;  %v245_v52 = vrot.slane %v243_v36, 5  ;;  %v738_v57 = vor.u32 %v7399_v39, %v7375_v23  ;;  %v5846_v23 = vld [vmem:[%s9972_s0 + $0x18c] sm:$0x1]  ;;  %v7530_v30 = vld [vmem:[%s9972_s0 + $0x70] sm:$0xf] }
  0x49   :  { %v752_v59 = vor.u32 %v7420_v56, %v7401_v40  ;;  %v526_v63 = vsel %vm7023_vm2, %v521_v44, %v525_v25  ;;  %v251_v56 = vrot.slane %v249_v47, 5  ;;  %v7484_v4 = vrot.slane %v696_v22, 4 }
  0x4a   :  { %v5943_v39 = vcombine.low %v512_v50, %v526_v63  ;;  %v233_v58 = vrot.slane %v232_v6, 4  ;;  %v246_v40 = vor.u32 %v245_v52, %v242_v45  ;;  %v7489_v11 = vrot.slane %v710_v53, 4 }
  0x4b   :  { %v7494_v12 = vrot.slane %v724_v5, 4  ;;  %v766_v0 = vor.u32 %v765_v37, %v762_v33  ;;  %v5951_v22 = vcombine.low %v7455_v54, %v7460_v55  ;;  %v528_v18 = vshrl.u32 %v7471_v2, 16  ;;  %v6727_v33 = vld [vmem:[%s9972_s0 + $0xf0] ss:$8 sps:$4 sm:$0xff]  }
  0x4c   :  { %947 = vrot.lane.b32.xlu1 %v6724_v42, %s6927_s10  ;;  %1123 = vrot.lane.b32.xlu0 %v5943_v39, %s6927_s10  ;;  %v238_v16 = vsel %vm7023_vm2, %v233_v58, %v237_v51  ;;  %v247_v28 = vrot.slane %v246_v40, 4  ;;  %v7506_v27 = vrot.slane %v738_v57, 4  ;;  %v531_v38 = vshll.u32 %v7471_v2, 16  ;;  %v79_v42 = vld [vmem:[%s9972_s0 + $0x74] sm:$0x1] }
  0x4d   :  { %v537_v53 = vshll.u32 %v5846_v23, 16  ;;  %v542_v5 = vshrl.u32 %v7476_v3, 16  ;;  %v7515_v1 = vrot.slane %v752_v59, 4  ;;  %v530_v15 = vrot.slane %v528_v18, 4  ;;  %v6728_v57 = vld [vmem:[%s9972_s0 + $0xf8] ss:$8 sps:$4 sm:$0xff]  }
  0x4e   :  { %v252_v10 = vsel %vm7023_vm2, %v247_v28, %v251_v56  ;;  %v545_v13 = vshll.u32 %v7476_v3, 16  ;;  %v7523_v19 = vrot.slane %v766_v0, 4  ;;  %v5927_v25 = vcombine.low %v7385_v31, %v7390_v35  ;;  %v7553_v0 = vld [vmem:[%s9972_s0 + $0x70] sm:$0xf]  ;;  %v7561_v18 = vld [vmem:[%s9972_s0 + $0x78] sm:$0xf] }
  0x4f   :  { %v5919_v20 = vcombine.low %v238_v16, %v252_v10  ;;  %v533_v26 = vrot.slane %v531_v38, 5  ;;  %v544_v43 = vrot.slane %v542_v5, 4  ;;  %v551_v36 = vshll.u32 %v5847_v46, 16  ;;  %v7573_v5 = vld [vmem:[%s9972_s0 + $0x1a0] sm:$0xf] }
  0x50   :  { %1179 = vrot.lane.b32.xlu0 %v5951_v22, %s6926_s29  ;;  %v547_v48 = vrot.slane %v545_v13, 5  ;;  %v254_v37 = vshrl.u32 %v7513_v34, 16  ;;  %v539_v35 = vrot.slane %v537_v53, 5  ;;  %v257_v44 = vshll.u32 %v7513_v34, 16  ;;  %v7568_v53 = vld [vmem:[%s9972_s0 + $0x198] sm:$0xf] }
  0x51   :  { %987 = vrot.lane.b32.xlu1 %v5919_v20, %s6926_s29  ;;  %v534_v31 = vor.u32 %v533_v26, %v530_v15  ;;  %v263_v45 = vshll.u32 %v78_v17, 16  ;;  %v553_v50 = vrot.slane %v551_v36, 5  ;;  %v268_v51 = vshrl.u32 %v7530_v30, 16  ;;  %v5848_v20 = vld [vmem:[%s9972_s0 + $0x19c] sm:$0x1] }
  0x52   :  { %v548_v47 = vor.u32 %v547_v48, %v544_v43  ;;  %v256_v6 = vrot.slane %v254_v37, 4  ;;  %v774_v52 = vshrl.u32 %v7455_v54, 16  ;;  %v259_v63 = vrot.slane %v257_v44, 5  ;;  %v7584_v26 = vld [vmem:[%s9972_s0 + $0x78] sm:$0xf] }
  0x53   :  { %v535_v59 = vrot.slane %v534_v31, 4  ;;  %v271_v23 = vshll.u32 %v7530_v30, 16  ;;  %v777_v39 = vshll.u32 %v7455_v54, 16  ;;  %v270_v40 = vrot.slane %v268_v51, 4  ;;  %v7600_v44 = vld [vmem:[%s9972_s0 + $0x80] sm:$0xf] }
  0x54   :  { %1235 = vrot.lane.b32.xlu0 %v6727_v33, %s6928_s17  ;;  %v549_v58 = vrot.slane %v548_v47, 4  ;;  %v277_v56 = vshll.u32 %v79_v42, 16  ;;  %v260_v28 = vor.u32 %v259_v63, %v256_v6  ;;  %v265_v22 = vrot.slane %v263_v45, 5  ;;  %v6731_v47 = vld [vmem:[%s9972_s0 + $0x100] ss:$8 sps:$4 sm:$0xff]  }
  0x55   :  { %1043 = vrot.lane.b32.xlu1 %v5927_v25, %s6928_s17  ;;  %v540_v16 = vsel %vm7023_vm2, %v535_v59, %v539_v35  ;;  %v273_v46 = vrot.slane %v271_v23, 5  ;;  %v5849_v25 = vld [vmem:[%s9972_s0 + $0x1a4] sm:$0x1]  ;;  %v5952_v48 = vcombine.low %v7553_v0, %v7561_v18  ;;  %v556_v36 = vshrl.u32 %v7568_v53, 16  ;;  %v80_v51 = vld [vmem:[%s9972_s0 + $0x7c] sm:$0x1] }
  0x56   :  { %v554_v38 = vsel %vm7023_vm2, %v549_v58, %v553_v50  ;;  %v261_v15 = vrot.slane %v260_v28, 4  ;;  %v279_v17 = vrot.slane %v277_v56, 5  ;;  %v7593_v37 = vrot.slane %v774_v52, 4  ;;  %v81_v23 = vld [vmem:[%s9972_s0 + $0x84] sm:$0x1] }
  0x57   :  { %v5944_v10 = vcombine.low %v540_v16, %v554_v38  ;;  %v274_v13 = vor.u32 %v273_v46, %v270_v40  ;;  %v559_v31 = vshll.u32 %v7568_v53, 16  ;;  %v565_v35 = vshll.u32 %v5848_v20, 16 }
  0x58   :  { %v266_v33 = vsel %vm7023_vm2, %v261_v15, %v265_v22  ;;  %v570_v42 = vshrl.u32 %v7573_v5, 16  ;;  %v558_v50 = vrot.slane %v556_v36, 4  ;;  %v573_v6 = vshll.u32 %v7573_v5, 16 }
  0x59   :  { %949 = vrot.lane.b32.xlu1 %v6728_v57, %s6927_s10  ;;  %1125 = vrot.lane.b32.xlu0 %v5944_v10, %s6927_s10  ;;  %v275_v43 = vrot.slane %v274_v13, 4  ;;  %v788_v52 = vshrl.u32 %v7460_v55, 16  ;;  %v5928_v59 = vcombine.low %v7471_v2, %v7476_v3  ;;  %v561_v63 = vrot.slane %v559_v31, 5 }
  0x5a   :  { %v572_v58 = vrot.slane %v570_v42, 4  ;;  %v575_v40 = vrot.slane %v573_v6, 5  ;;  %v579_v56 = vshll.u32 %v5849_v25, 16  ;;  %v282_v16 = vshrl.u32 %v7584_v26, 16 }
  0x5b   :  { %v280_v45 = vsel %vm7023_vm2, %v275_v43, %v279_v17  ;;  %v562_v28 = vor.u32 %v561_v63, %v558_v50  ;;  %v567_v22 = vrot.slane %v565_v35, 5  ;;  %v285_v46 = vshll.u32 %v7584_v26, 16  ;;  %v6732_v17 = vld [vmem:[%s9972_s0 + $0x108] ss:$8 sps:$4 sm:$0xff]   ;;  %v7632_v35 = vld [vmem:[%s9972_s0 + $0x80] sm:$0xf] }
  0x5c   :  { %v5920_v57 = vcombine.low %v266_v33, %v280_v45  ;;  %v291_v38 = vshll.u32 %v80_v51, 16  ;;  %v576_v2 = vor.u32 %v575_v40, %v572_v58  ;;  %v581_v3 = vrot.slane %v579_v56, 5 }
  0x5d   :  { %1181 = vrot.lane.b32.xlu0 %v5952_v48, %s6926_s29  ;;  %v284_v10 = vrot.slane %v282_v16, 4  ;;  %v296_v15 = vshrl.u32 %v7600_v44, 16  ;;  %v791_v13 = vshll.u32 %v7460_v55, 16  ;;  %v563_v20 = vrot.slane %v562_v28, 4 }
  0x5e   :  { %989 = vrot.lane.b32.xlu1 %v5920_v57, %s6926_s29  ;;  %v287_v25 = vrot.slane %v285_v46, 5  ;;  %v299_v33 = vshll.u32 %v7600_v44, 16  ;;  %v802_v43 = vshrl.u32 %v7553_v0, 16  ;;  %v577_v48 = vrot.slane %v576_v2, 4  ;;  %v7644_v57 = vld [vmem:[%s9972_s0 + $0x88] sm:$0xf] }
  0x5f   :  { %v298_v36 = vrot.slane %v296_v15, 4  ;;  %v305_v31 = vshll.u32 %v81_v23, 16  ;;  %v568_v55 = vsel %vm7023_vm2, %v563_v20, %v567_v22  ;;  %v293_v45 = vrot.slane %v291_v38, 5 }
  0x60   :  { %v288_v42 = vor.u32 %v287_v25, %v284_v10  ;;  %v301_v50 = vrot.slane %v299_v33, 5  ;;  %v805_v6 = vshll.u32 %v7553_v0, 16  ;;  %v582_v51 = vsel %vm7023_vm2, %v577_v48, %v581_v3  ;;  %v6735_v10 = vld [vmem:[%s9972_s0 + $0x110] ss:$8 sps:$4 sm:$0xff]  }
  0x61   :  { %1237 = vrot.lane.b32.xlu0 %v6731_v47, %s6928_s17  ;;  %v816_v47 = vshrl.u32 %v7561_v18, 16  ;;  %v5945_v63 = vcombine.low %v568_v55, %v582_v51  ;;  %v307_v58 = vrot.slane %v305_v31, 5  ;;  %v779_v40 = vrot.slane %v777_v39, 5  ;;  %v5882_v55 = vld [vmem:[%s9972_s0 + $0xc] sm:$0x1] }
  0x62   :  { %1045 = vrot.lane.b32.xlu1 %v5928_v59, %s6928_s17  ;;  %v289_v59 = vrot.slane %v288_v42, 4  ;;  %v302_v23 = vor.u32 %v301_v50, %v298_v36  ;;  %v7648_v56 = vrot.slane %v788_v52, 4  ;;  %v7650_v0 = vrot.slane %v791_v13, 5 }
  0x63   :  { %v5953_v22 = vcombine.low %v7632_v35, %v7644_v57  ;;  %v7658_v46 = vrot.slane %v802_v43, 4  ;;  %v819_v54 = vshll.u32 %v7561_v18, 16  ;;  %v7661_v39 = vrot.slane %v805_v6, 5 }
  0x64   :  { %v294_v16 = vsel %vm7023_vm2, %v289_v59, %v293_v45  ;;  %v303_v28 = vrot.slane %v302_v23, 4  ;;  %v7663_v52 = vrot.slane %v816_v47, 4  ;;  %v5901_v3 = vcombine.low %v7229_v14, %v7255_v32  ;;  %v5885_v45 = vld [vmem:[%s9972_s0 + $0x24] sm:$0x1] }
  0x65   :  { %1127 = vrot.lane.b32.xlu0 %v5945_v63, %s6927_s10  ;;  %v5902_v18 = vcombine.low %v7316_v21, %v7345_v41  ;;  %v5903_v15 = vcombine.low %v7414_v62, %v7431_v24  ;;  %v5904_v13 = vcombine.low %v7513_v34, %v7530_v30  ;;  %v821_v20 = vrot.slane %v819_v54, 5 }
  0x66   :  { %951 = vrot.lane.b32.xlu1 %v6732_v17, %s6927_s10  ;;  %v308_v38 = vsel %vm7023_vm2, %v303_v28, %v307_v58  ;;  %v5905_v17 = vcombine.low %v7584_v26, %v7600_v44  ;;  %v5929_v25 = vcombine.low %v7568_v53, %v7573_v5  ;;  %v640_v33 = vor.u32 %v7211_v7, %v7128_v61  ;;  %v5883_v61 = vld [vmem:[%s9972_s0 + $0x14] sm:$0x1]  ;;  %v5884_v5 = vld [vmem:[%s9972_s0 + $0x1c] sm:$0x1] }
  0x67   :  { %v5921_v2 = vcombine.low %v294_v16, %v308_v38  ;;  %v654_v43 = vor.u32 %v7124_v60, %v7102_v49  ;;  %v780_v48 = vor.u32 %v779_v40, %v7593_v37  ;;  %vm1265_vm3 = vcmask 261120  }
  0x68   :  { %v830_v36 = vshrl.u32 %v7632_v35, 16  ;;  %v833_v31 = vshll.u32 %v7632_v35, 16  ;;  %v641_v49 = vrot.slane %v640_v33, 4  ;;  %v643_v60 = vshll.u32 %v5882_v55, 16 }
  0x69   :  { %1183 = vrot.lane.b32.xlu0 %v5953_v22, %s6926_s29  ;;  %v655_v7 = vrot.slane %v654_v43, 4  ;;  %v657_v53 = vshll.u32 %v5883_v61, 16  ;;  %v7702_v37 = vrot.slane %v780_v48, 4  ;;  %v794_v35 = vor.u32 %v7650_v0, %v7648_v56  ;;  %v5886_v56 = vld [vmem:[%s9972_s0 + $0x2c] sm:$0x1] }
  0x6a   :  { %991 = vrot.lane.b32.xlu1 %v5921_v2, %s6926_s29  ;;  %v808_v42 = vor.u32 %v7661_v39, %v7658_v46  ;;  %v671_v50 = vshll.u32 %v5884_v5, 16  ;;  %v822_v6 = vor.u32 %v821_v20, %v7663_v52  ;;  %v645_v47 = vrot.slane %v643_v60, 5  ;;  %v5887_v39 = vld [vmem:[%s9972_s0 + $0x34] sm:$0x1]  ;;  %v5888_v20 = vld [vmem:[%s9972_s0 + $0x3c] sm:$0x1] }
  0x6b   :  { %v659_v51 = vrot.slane %v657_v53, 5  ;;  %v685_v63 = vshll.u32 %v5885_v45, 16  ;;  %v7712_v59 = vrot.slane %v830_v36, 4  ;;  %v7714_v23 = vrot.slane %v833_v31, 5  ;;  %v5890_v61 = vld [vmem:[%s9972_s0 + $0x54] sm:$0x1] }
  0x6c   :  { %v844_v58 = vshrl.u32 %v7644_v57, 16  ;;  %v673_v40 = vrot.slane %v671_v50, 5  ;;  %v847_v0 = vshll.u32 %v7644_v57, 16  ;;  %v646_v22 = vsel %vm7023_vm2, %v641_v49, %v645_v47  ;;  %v5891_v53 = vld [vmem:[%s9972_s0 + $0x5c] sm:$0x1] }
  0x6d   :  { %1239 = vrot.lane.b32.xlu0 %v6735_v10, %s6928_s17  ;;  %v660_v46 = vsel %vm7023_vm2, %v655_v7, %v659_v51  ;;  %v687_v54 = vrot.slane %v685_v63, 5  ;;  %v699_v38 = vshll.u32 %v5886_v56, 16  ;;  %v713_v2 = vshll.u32 %v5887_v39, 16 }
  0x6e   :  { %1047 = vrot.lane.b32.xlu1 %v5929_v25, %s6928_s17  ;;  %v5962_v52 = vcombine.low %v646_v22, %v660_v46  ;;  %v674_v57 = vsel %vm7023_vm2, %v7213_v8, %v673_v40  ;;  %v5889_v25 = vld [vmem:[%s9972_s0 + $0x44] sm:$0x1]  ;;  %v727_v8 = vshll.u32 %v5888_v20, 16  ;;  %v7745_v36 = vrot.slane %v794_v35, 4 }
  0x6f   :  { %v688_v10 = vsel %vm7023_vm2, %v7215_v9, %v687_v54  ;;  %v701_v43 = vrot.slane %v699_v38, 5  ;;  %v715_v48 = vrot.slane %v713_v2, 5  ;;  %v7747_v31 = vrot.slane %v808_v42, 4  ;;  %v5892_v40 = vld [vmem:[%s9972_s0 + $0x64] sm:$0x1] }
  0x70   :  { %6520 = vmatprep.mubr.msk.bf16.mxu1 %vm1265_vm3, %v5962_v52  ;;  %v5963_v33 = vcombine.low %v674_v57, %v688_v10  ;;  %v7749_v55 = vrot.slane %v822_v6, 4  ;;  %v741_v9 = vshll.u32 %v5889_v25, 16  ;;  %v729_v7 = vrot.slane %v727_v8, 5  ;;  %v5894_v54 = vld [vmem:[%s9972_s0 + $0x74] sm:$0x1] }
  0x71   :  { %v702_v49 = vsel %vm7023_vm2, %v7484_v4, %v701_v43  ;;  %v716_v60 = vsel %vm7023_vm2, %v7489_v11, %v715_v48  ;;  %v755_v5 = vshll.u32 %v5890_v61, 16  ;;  %v846_v35 = vrot.slane %v844_v58, 4  ;;  %v5893_v58 = vld [vmem:[%s9972_s0 + $0x6c] sm:$0x1]  ;;  %v5895_v57 = vld [vmem:[%s9972_s0 + $0x7c] sm:$0x1] }
  0x72   :  { %6521 = vmatmul.mubr.msk.bf16.vlgmr.msra.gmra.mxu1 %vm1265_vm3, %v5963_v33  ;;  %v5964_v50 = vcombine.low %v702_v49, %v716_v60  ;;  %v743_v6 = vrot.slane %v741_v9, 5  ;;  %v769_v47 = vshll.u32 %v5891_v53, 16  ;;  %v836_v51 = vor.u32 %v7714_v23, %v7712_v59  ;;  %v6845_v48 = vld [vmem:[%s9972_s0] sm:$0xf]  ;;  %v6846_v8 = vld [vmem:[%s9972_s0 + $0x8] sm:$0xf] }
  0x73   :  { %v849_v4 = vrot.slane %v847_v0, 5  ;;  %v730_v11 = vsel %vm7023_vm2, %v7494_v12, %v729_v7  ;;  %v757_v63 = vrot.slane %v755_v5, 5  ;;  %v783_v56 = vshll.u32 %v5892_v40, 16  ;;  %v6753_v12 = vld [vmem:[%s9972_s0 + $0x1b0] ss:$8 sps:$4 sm:$0xff]  }
  0x74   :  { %6524 = vmatprep.mubr.msk.bf16.mxu1 %vm1265_vm3, %v5964_v50  ;;  %v744_v59 = vsel %vm7023_vm2, %v7506_v27, %v743_v6  ;;  %v771_v23 = vrot.slane %v769_v47, 5  ;;  %v797_v0 = vshll.u32 %v5893_v58, 16  ;;  %v811_v38 = vshll.u32 %v5894_v54, 16  ;;  %v5897_v60 = vld [vmem:[%s9972_s0 + $0x8c] sm:$0x1] }
  0x75   :  { %v7723_v28 = vpop.permute.xlu0 %937  ;;  %v5965_v22 = vcombine.low %v730_v11, %v744_v59  ;;  %v758_v46 = vsel %vm7023_vm2, %v7515_v1, %v757_v63  ;;  %v785_v39 = vrot.slane %v783_v56, 5  ;;  %v850_v2 = vor.u32 %v849_v4, %v846_v35  ;;  %v6848_v56 = vld [vmem:[%s9972_s0 + $0x18] sm:$0xf] }
  0x76   :  { %v7721_v16 = vpop.permute.xlu1 %1169  ;;  %v772_v27 = vsel %vm7023_vm2, %v7523_v19, %v771_v23  ;;  %v799_v52 = vrot.slane %v797_v0, 5  ;;  %vm1290_vm4 = vcmask 523264   ;;  %v825_v20 = vshll.u32 %v5895_v57, 16  ;;  %v5896_v19 = vld [vmem:[%s9972_s0 + $0x84] sm:$0x1] }
  0x77   :  { %v5966_v10 = vcombine.low %v758_v46, %v772_v27  ;;  %v837_v1 = vrot.slane %v836_v51, 4  ;;  %vm1307_vm5 = vcmask 785408   ;;  %v813_v43 = vrot.slane %v811_v38, 5 }
  0x78   :  { %v5898_v9 = vcombine.low %v6845_v48, %v6846_v8  ;;  %v827_v49 = vrot.slane %v825_v20, 5  ;;  %v839_v7 = vshll.u32 %v5896_v19, 16  ;;  %v786_v5 = vsel %vm7023_vm2, %v7702_v37, %v785_v39 }
  0x79   :  { %v1226_v45 = vpop.permute.xlu0 %1225  ;;  %v800_v35 = vsel %vm7023_vm2, %v7745_v36, %v799_v52  ;;  %v853_v50 = vshll.u32 %v5897_v60, 16  ;;  %v851_v6 = vrot.slane %v850_v2, 4  ;;  %v814_v51 = vsel %vm7023_vm2, %v7747_v31, %v813_v43 }
  0x7a   :  { %v1034_v42 = vpop.permute.xlu1 %1033  ;;  %6525 = vmatmul.mubr.msk.bf16.gmra.mxu1 %vm1265_vm3, %v5965_v22  ;;  %v841_v4 = vrot.slane %v839_v7, 5  ;;  %v5967_v37 = vcombine.low %v786_v5, %v800_v35  ;;  %v1268_v63 = vsel %vm1265_vm3, %v5898_v9, %v7723_v28  ;;  %v6757_v28 = vld [vmem:[%s9972_s0 + $0x1c0] ss:$8 sps:$4 sm:$0xff]  }
  0x7b   :  { %6528 = vmatprep.mubr.msk.bf16.mxu1 %vm1265_vm3, %v5966_v10  ;;  %v855_v11 = vrot.slane %v853_v50, 5 }
  0x7c   :  { %v842_v31 = vsel %vm7023_vm2, %v837_v1, %v841_v4  ;;  %v6759_v1 = vld [vmem:[%s9972_s0 + $0x1d0] ss:$8 sps:$4 sm:$0xff]  }
  0x7e   :  { %v940_v25 = vpop.permute.xlu1 %939 }
  0x81   :  { %v1114_v33 = vpop.permute.xlu0 %1113 }
  0x82   :  { %v1334_v61 = vsel %vm1265_vm3, %v6753_v12, %v1114_v33  ;;  %6529 = vmatmul.mubr.msk.bf16.gmra.mxu1 %vm1265_vm3, %v5967_v37  ;;  %v6850_v33 = vld [vmem:[%s9972_s0 + $0x28] sm:$0xf] }
  0x83   :  { %v1357_v53 = vsel %vm1290_vm4, %v1334_v61, %v7721_v16  ;;  %v828_v16 = vsel %vm7023_vm2, %v7749_v55, %v827_v49  ;;  %v856_v55 = vsel %vm7023_vm2, %v851_v6, %v855_v11 }
  0x84   :  { %v1373_v47 = vsel %vm1307_vm5, %v1357_v53, %v1226_v45  ;;  %v5968_v40 = vcombine.low %v814_v51, %v828_v16  ;;  %v5969_v23 = vcombine.low %v842_v31, %v856_v55 }
  0x85   :  { %1596 = vmatprep.mubr.bf16.mxu0 %v1373_v47 }
  0x86   :  { %v978_v36 = vpop.permute.xlu1 %977  ;;  %6532 = vmatprep.mubr.msk.bf16.mxu1 %vm1265_vm3, %v5968_v40 }
  0x87   :  { %v1292_v58 = vsel %vm1290_vm4, %v1268_v63, %v978_v36 }
  0x88   :  { %v1309_v45 = vsel %vm1307_vm5, %v1292_v58, %v1034_v42  ;;  %v6847_v42 = vld [vmem:[%s9972_s0 + $0x10] sm:$0xf] }
  0x89   :  { %1597 = vmatmul.mubr.bf16.vlgmr.msra.gmra.mxu0 %v1309_v45  ;;  %v5899_v0 = vcombine.low %v6847_v42, %v6848_v56 }
  0x8a   :  { %6533 = vmatmul.mubr.msk.bf16.gmra.mxu1 %vm1265_vm3, %v5969_v23 }
  0x8b   :  { %v1116_v59 = vpop.permute.xlu0 %1115  ;;  %v1271_v54 = vsel %vm1265_vm3, %v5899_v0, %v940_v25  ;;  %v6849_v25 = vld [vmem:[%s9972_s0 + $0x20] sm:$0xf] }
  0x8c   :  { %v1337_v46 = vsel %vm1265_vm3, %v6757_v28, %v1116_v59  ;;  %v5900_v43 = vcombine.low %v6849_v25, %v6850_v33 }
  0x8f   :  { %v1172_v12 = vpop.permute.xlu0 %1171 }
  0x90   :  { %v1359_v27 = vsel %vm1290_vm4, %v1337_v46, %v1172_v12 }
  0x91   :  { %v980_v22 = vpop.permute.xlu1 %979 }
  0x92   :  { %v1294_v52 = vsel %vm1290_vm4, %v1271_v54, %v980_v22 }
  0x93   :  { %v1228_v39 = vpop.permute.xlu0 %1227 }
  0x94   :  { %v1376_v38 = vsel %vm1307_vm5, %v1359_v27, %v1228_v39 }
  0x95   :  { %v1036_v57 = vpop.permute.xlu1 %1035  ;;  %1604 = vmatprep.mubr.bf16.mxu0 %v1376_v38 }
  0x96   :  { %v1312_v2 = vsel %vm1307_vm5, %v1294_v52, %v1036_v57 }
  0x97   :  { %1605 = vmatmul.mubr.bf16.gmra.mxu0 %v1312_v2 }
  0x98   :  { %v1118_v20 = vpop.permute.xlu0 %1117 }
  0x99   :  { %v942_v10 = vpop.permute.xlu1 %941  ;;  %v1340_v9 = vsel %vm1265_vm3, %v6759_v1, %v1118_v20 }
  0x9a   :  { %v1274_v8 = vsel %vm1265_vm3, %v5900_v43, %v942_v10 }
  0x9c   :  { %v1174_v19 = vpop.permute.xlu0 %1173 }
  0x9d   :  { %v1361_v61 = vsel %vm1290_vm4, %v1340_v9, %v1174_v19 }
  0x9e   :  { %v982_v48 = vpop.permute.xlu1 %981 }
  0x9f   :  { %v1296_v60 = vsel %vm1290_vm4, %v1274_v8, %v982_v48 }
  0xa0   :  { %v1230_v49 = vpop.permute.xlu0 %1229 }
  0xa1   :  { %v1379_v53 = vsel %vm1307_vm5, %v1361_v61, %v1230_v49 }
  0xa2   :  { %v1038_v7 = vpop.permute.xlu1 %1037 }
  0xa3   :  { %11 = vsyncpa [#allocation4], 0  ;;  %1612 = vmatprep.mubr.bf16.mxu0 %v1379_v53  ;;  %v1315_v5 = vsel %vm1307_vm5, %v1296_v60, %v1038_v7  ;;  %v6761_v6 = vld [vmem:[%s9972_s0 + $0x1e0] ss:$8 sps:$4 sm:$0xff]   ;;  %v7928_v26 = vld [vmem:[%s9977_s5 + $0x38] sm:$0xff]  ;;  %v9979_v44 = vmov 0.0  }
  0xa4   :  { %1613 = vmatmul.mubr.bf16.gmra.mxu0 %v1315_v5  ;;  %v6763_v14 = vld [vmem:[%s9972_s0 + $0x1f8] ss:$8 sps:$4 sm:$0xff]   ;;  %v6765_v21 = vld [vmem:[%s9972_s0 + $0x208] ss:$8 sps:$4 sm:$0xff]   ;;  %6536 = vmatprep.subr.mxu1 %v9979_v44  ;;  %vm6930_vm6 = vmmov 0   ;;  %vm1875_vm7 = vcmask 1041409  }
  0xa5   :  { %v1120_v50 = vpop.permute.xlu0 %1119  ;;  %v6767_v62 = vld [vmem:[%s9972_s0 + $0x218] ss:$8 sps:$4 sm:$0xff]   ;;  %v6769_v34 = vld [vmem:[%s9972_s0 + $0x228] ss:$8 sps:$4 sm:$0xff]   ;;  %6537 = vmatpush3.msra.mxu1 %v7928_v26  ;;  %6552 = vmatprep.mubr.msk.f32.mxu1 %vm6930_vm6, %v9979_v44  ;;  %vm2181_vm8 = vcmask 519168   ;;  %vm2183_vm9 = vcmask 516096  }
  0xa6   :  { %v944_v35 = vpop.permute.xlu1 %943  ;;  %v1343_v4 = vsel %vm1265_vm3, %v6761_v6, %v1120_v50  ;;  %6538 = vmatprep.subr.mxu1 %v9979_v44  ;;  %vm2449_vm10 = vsmask.f32 7938  ;;  %vm2455_vm11 = vsmask.f32 256  ;;  %vm2854_vm14 = vcmask 1042432  }
  0xa7   :  { %v1277_v16 = vsel %vm1265_vm3, %v5901_v3, %v944_v35  ;;  %vm8229_vm12 = vmand %vm2181_vm8, %vm2449_vm10  ;;  %vm2855_vm15 = vcmask 1046532  }
  0xa8   :  { %vm8235_vm13 = vmand %vm2183_vm9, %vm2455_vm11 }
  0xa9   :  { %v1176_v47 = vpop.permute.xlu0 %1175  ;;  %vm8549_vm0 = vmor %vm2854_vm14, %vm2855_vm15 }
  0xaa   :  { %v984_v51 = vpop.permute.xlu1 %983  ;;  %v1363_v11 = vsel %vm1290_vm4, %v1343_v4, %v1176_v47  ;;  %v7950_v4 = vld [vmem:[%s9977_s5 + $0x20] sm:$0xff] }
  0xab   :  { %v1298_v63 = vsel %vm1290_vm4, %v1277_v16, %v984_v51  ;;  %v7943_v16 = vld [vmem:[%s9977_s5 + $0x28] sm:$0xff] }
  0xad   :  { %v1232_v37 = vpop.permute.xlu0 %1231 }
  0xae   :  { %v1040_v36 = vpop.permute.xlu1 %1039  ;;  %v1382_v40 = vsel %vm1307_vm5, %v1363_v11, %v1232_v37  ;;  %v7957_v11 = vld [vmem:[%s9977_s5 + $0x18] sm:$0xff]  ;;  %v7962_v37 = vld [vmem:[%s9977_s5 + $0x10] sm:$0xff] }
  0xaf   :  { %1620 = vmatprep.mubr.bf16.mxu0 %v1382_v40  ;;  %v1318_v58 = vsel %vm1307_vm5, %v1298_v63, %v1040_v36  ;;  %v7971_v63 = vld [vmem:[%s9977_s5 + $0x8] sm:$0xff]  ;;  %v7978_v36 = vld [vmem:[%s9977_s5] sm:$0xff] }
  0xb0   :  { %1621 = vmatmul.mubr.bf16.gmra.mxu0 %v1318_v58 }
  0xb1   :  { %v1122_v31 = vpop.permute.xlu0 %1121 }
  0xb2   :  { %v946_v45 = vpop.permute.xlu1 %945  ;;  %v1346_v59 = vsel %vm1265_vm3, %v6763_v14, %v1122_v31 }
  0xb3   :  { %v1280_v55 = vsel %vm1265_vm3, %v5902_v18, %v946_v45 }
  0xb5   :  { %v1178_v32 = vpop.permute.xlu0 %1177 }
  0xb6   :  { %v986_v3 = vpop.permute.xlu1 %985  ;;  %v1365_v28 = vsel %vm1290_vm4, %v1346_v59, %v1178_v32 }
  0xb7   :  { %v1300_v42 = vsel %vm1290_vm4, %v1280_v55, %v986_v3 }
  0xb9   :  { %v1234_v23 = vpop.permute.xlu0 %1233 }
  0xba   :  { %v1042_v56 = vpop.permute.xlu1 %1041  ;;  %v1385_v0 = vsel %vm1307_vm5, %v1365_v28, %v1234_v23 }
  0xbb   :  { %1628 = vmatprep.mubr.bf16.mxu0 %v1385_v0  ;;  %v1321_v12 = vsel %vm1307_vm5, %v1300_v42, %v1042_v56 }
  0xbc   :  { %1629 = vmatmul.mubr.bf16.gmra.mxu0 %v1321_v12 }
  0xbe   :  { %v948_v22 = vpop.permute.xlu1 %947  ;;  %v1124_v46 = vpop.permute.xlu0 %1123 }
  0xbf   :  { %v1283_v54 = vsel %vm1265_vm3, %v5903_v15, %v948_v22  ;;  %v1349_v27 = vsel %vm1265_vm3, %v6765_v21, %v1124_v46 }
  0xc2   :  { %v1180_v41 = vpop.permute.xlu0 %1179 }
  0xc3   :  { %v988_v18 = vpop.permute.xlu1 %987  ;;  %v1367_v39 = vsel %vm1290_vm4, %v1349_v27, %v1180_v41 }
  0xc4   :  { %v1302_v57 = vsel %vm1290_vm4, %v1283_v54, %v988_v18 }
  0xc6   :  { %v1236_v52 = vpop.permute.xlu0 %1235 }
  0xc7   :  { %v1044_v38 = vpop.permute.xlu1 %1043  ;;  %v1388_v2 = vsel %vm1307_vm5, %v1367_v39, %v1236_v52 }
  0xc8   :  { %1636 = vmatprep.mubr.bf16.mxu0 %v1388_v2  ;;  %v1324_v10 = vsel %vm1307_vm5, %v1302_v57, %v1044_v38 }
  0xc9   :  { %1637 = vmatmul.mubr.bf16.gmra.mxu0 %v1324_v10 }
  0xcb   :  { %v950_v20 = vpop.permute.xlu1 %949  ;;  %v1126_v1 = vpop.permute.xlu0 %1125 }
  0xcc   :  { %v1286_v25 = vsel %vm1265_vm3, %v5904_v13, %v950_v20  ;;  %v1352_v33 = vsel %vm1265_vm3, %v6767_v62, %v1126_v1 }
  0xcf   :  { %v1182_v24 = vpop.permute.xlu0 %1181 }
  0xd0   :  { %v990_v15 = vpop.permute.xlu1 %989  ;;  %v1369_v43 = vsel %vm1290_vm4, %v1352_v33, %v1182_v24 }
  0xd1   :  { %v1304_v48 = vsel %vm1290_vm4, %v1286_v25, %v990_v15 }
  0xd3   :  { %v1238_v19 = vpop.permute.xlu0 %1237 }
  0xd4   :  { %v1046_v8 = vpop.permute.xlu1 %1045  ;;  %v1391_v9 = vsel %vm1307_vm5, %v1369_v43, %v1238_v19 }
  0xd5   :  { %1644 = vmatprep.mubr.bf16.mxu0 %v1391_v9  ;;  %v1327_v61 = vsel %vm1307_vm5, %v1304_v48, %v1046_v8 }
  0xd6   :  { %1645 = vmatmul.mubr.bf16.gmra.mxu0 %v1327_v61 }
  0xd7   :  { %v1128_v60 = vpop.permute.xlu0 %1127 }
  0xd8   :  { %v952_v49 = vpop.permute.xlu1 %951  ;;  %v1355_v53 = vsel %vm1265_vm3, %v6769_v34, %v1128_v60 }
  0xd9   :  { %v1289_v7 = vsel %vm1265_vm3, %v5905_v17, %v952_v49  ;;  %v7936_v17 = vld [vmem:[%s9977_s5 + $0x30] sm:$0xff] }
  0xda   :  { %6539 = vmatpush3.msra.mxu1 %v7936_v17 }
  0xdb   :  { %v1184_v30 = vpop.permute.xlu0 %1183  ;;  %6540 = vmatprep.subr.mxu1 %v9979_v44 }
  0xdc   :  { %v992_v13 = vpop.permute.xlu1 %991  ;;  %v1371_v5 = vsel %vm1290_vm4, %v1355_v53, %v1184_v30  ;;  %6541 = vmatpush3.msra.mxu1 %v7943_v16 }
  0xdd   :  { %v1306_v50 = vsel %vm1290_vm4, %v1289_v7, %v992_v13  ;;  %6542 = vmatprep.subr.mxu1 %v9979_v44 }
  0xde   :  { %6543 = vmatpush3.msra.mxu1 %v7950_v4 }
  0xdf   :  { %v1240_v35 = vpop.permute.xlu0 %1239  ;;  %6544 = vmatprep.subr.mxu1 %v9979_v44 }
  0xe0   :  { %v1048_v6 = vpop.permute.xlu1 %1047  ;;  %v1394_v47 = vsel %vm1307_vm5, %v1371_v5, %v1240_v35  ;;  %6545 = vmatpush3.msra.mxu1 %v7957_v11 }
  0xe1   :  { %1652 = vmatprep.mubr.bf16.mxu0 %v1394_v47  ;;  %v1330_v51 = vsel %vm1307_vm5, %v1306_v50, %v1048_v6  ;;  %6546 = vmatprep.subr.mxu1 %v9979_v44 }
  0xe2   :  { %1653 = vmatmul.mubr.bf16.gmra.mxu0 %v1330_v51  ;;  %6547 = vmatpush3.msra.mxu1 %v7962_v37 }
  0xe3   :  { %6548 = vmatprep.subr.mxu1 %v9979_v44 }
  0xe4   :  { %6549 = vmatpush3.msra.mxu1 %v7971_v63 }
  0xe5   :  { %6550 = vmatprep.subr.mxu1 %v9979_v44 }
  0xe6   :  { %6551 = vmatpush3.msra.mxu1 %v7978_v36 }
  0xe7   :  { %6555 = vmatprep.subr.mxu1 %v9979_v44 }
 0x132   :  { %v6522_v23 = vpop.f32.mrf.mxu1 }
 0x134   :  { %v1695_v56 = vpop.f32.mrf.mxu1 }
 0x136   :  { %v6523_v22 = vpop.f32.mrf.mxu1 }
 0x138   :  { %v1698_v21 = vpop.f32.mrf.mxu1 }
 0x13a   :  { %v6526_v18 = vpop.f32.mrf.mxu1 }
 0x13c   :  { %v1711_v27 = vpop.f32.mrf.mxu1 }
 0x13e   :  { %v6527_v52 = vpop.f32.mrf.mxu1 }
 0x140   :  { %v1714_v38 = vpop.f32.mrf.mxu1 }
 0x142   :  { %v6530_v10 = vpop.f32.mrf.mxu1 }
 0x144   :  { %v1727_v1 = vpop.f32.mrf.mxu1 }
 0x146   :  { %v6531_v33 = vpop.f32.mrf.mxu1 }
 0x148   :  { %v1730_v61 = vpop.f32.mrf.mxu1 }
 0x149   :  { %v6254_v40 = vpop.f32.mrf.mxu0 }
 0x14a   :  { %v7990_v34 = vpop.f32.mrf.mxu1 }
 0x14b   :  { %v6255_v58 = vpop.f32.mrf.mxu0 }
 0x14c   :  { %v6256_v25 = vadd.f32 %v6255_v58, %v6254_v40 }
 0x14d   :  { %v6257_v45 = vpop.f32.mrf.mxu0 }
 0x14e   :  { %v7986_v9 = vadd.f32 %v6256_v25, %v1695_v56 }
 0x14f   :  { %v6258_v31 = vpop.f32.mrf.mxu0 }
 0x150   :  { %v6259_v24 = vadd.f32 %v6258_v31, %v6257_v45  ;;  %v1761_v5 = vsel %vm1290_vm4, %v7986_v9, 0.0  ;;  %v1743_v45 = vpop.f32.mrf.mxu1 }
 0x152   :  { %v7984_v19 = vadd.f32 %v6259_v24, %v1698_v21 }
 0x154   :  { %v1762_v30 = vsel %vm1290_vm4, %v7984_v19, 0.0 }
 0x155   :  { %v1763_v40 = vadd.f32 %v1762_v30, %v1761_v5 }
 0x157   :  { %v6260_v14 = vpop.f32.mrf.mxu0 }
 0x159   :  { %v6261_v32 = vpop.f32.mrf.mxu0 }
 0x15a   :  { %v6262_v43 = vadd.f32 %v6261_v32, %v6260_v14 }
 0x15b   :  { %v6263_v3 = vpop.f32.mrf.mxu0 }
 0x15c   :  { %v7988_v49 = vadd.f32 %v6522_v23, %v6262_v43 }
 0x15d   :  { %v6264_v55 = vpop.f32.mrf.mxu0 }
 0x15e   :  { %v6265_v48 = vadd.f32 %v6264_v55, %v6263_v3  ;;  %v1764_v35 = vsel %vm1290_vm4, %v7988_v49, 0.0 }
 0x160   :  { %v7994_v13 = vadd.f32 %v6523_v22, %v6265_v48  ;;  %v1803_v22 = vmul.f32 %v7986_v9, %v7986_v9 }
 0x162   :  { %v1766_v31 = vsel %vm1290_vm4, %v7994_v13, 0.0 }
 0x164   :  { %v6266_v59 = vpop.f32.mrf.mxu0 }
 0x166   :  { %v6267_v28 = vpop.f32.mrf.mxu0 }
 0x167   :  { %v6268_v60 = vadd.f32 %v6267_v28, %v6266_v59  ;;  %v1804_v59 = vmul.f32 %v7984_v19, %v7984_v19  ;;  %v1765_v28 = vadd.f32 %v1764_v35, %v1763_v40 }
 0x168   :  { %v6269_v42 = vpop.f32.mrf.mxu0 }
 0x169   :  { %v8000_v50 = vadd.f32 %v6268_v60, %v1711_v27  ;;  %v1767_v21 = vadd.f32 %v1766_v31, %v1765_v28 }
 0x16a   :  { %v6270_v0 = vpop.f32.mrf.mxu0 }
 0x16b   :  { %v6271_v7 = vadd.f32 %v6270_v0, %v6269_v42  ;;  %v1768_v23 = vsel %vm1290_vm4, %v8000_v50, 0.0 }
 0x16d   :  { %v8004_v14 = vadd.f32 %v6271_v7, %v1714_v38 }
 0x16f   :  { %v1770_v27 = vsel %vm1290_vm4, %v8004_v14, 0.0 }
 0x170   :  { %v6272_v12 = vpop.f32.mrf.mxu0 }
 0x172   :  { %v6273_v46 = vpop.f32.mrf.mxu0 }
 0x173   :  { %v6274_v6 = vadd.f32 %v6273_v46, %v6272_v12  ;;  %v1805_v46 = vmul.f32 %v7988_v49, %v7988_v49 }
 0x174   :  { %v6275_v41 = vpop.f32.mrf.mxu0 }
 0x175   :  { %v8010_v42 = vadd.f32 %v6526_v18, %v6274_v6  ;;  %v1822_v25 = vsel %vm1290_vm4, %v1805_v46, 0.0 }
 0x176   :  { %v6276_v54 = vpop.f32.mrf.mxu0 }
 0x177   :  { %v6277_v58 = vadd.f32 %v6276_v54, %v6275_v41  ;;  %v8020_v54 = vpop.f32.mrf.mxu1 }
 0x179   :  { %v8018_v41 = vadd.f32 %v6527_v52, %v6277_v58  ;;  %v1772_v52 = vsel %vm1290_vm4, %v8010_v42, 0.0 }
 0x17b   :  { %v1774_v48 = vsel %vm1290_vm4, %v8018_v41, 0.0 }
 0x17c   :  { %v6278_v39 = vpop.f32.mrf.mxu0 }
 0x17e   :  { %v6279_v57 = vpop.f32.mrf.mxu0 }
 0x17f   :  { %v6280_v32 = vadd.f32 %v6279_v57, %v6278_v39 }
 0x180   :  { %v6281_v2 = vpop.f32.mrf.mxu0 }
 0x181   :  { %v8024_v18 = vadd.f32 %v6280_v32, %v1727_v1 }
 0x182   :  { %v6282_v20 = vpop.f32.mrf.mxu0 }
 0x183   :  { %v6283_v47 = vadd.f32 %v6282_v20, %v6281_v2  ;;  %v1820_v2 = vsel %vm1290_vm4, %v1804_v59, 0.0  ;;  %v1806_v20 = vmul.f32 %v7994_v13, %v7994_v13  ;;  %v1782_v35 = vsel %vm1290_vm4, %v8024_v18, 0.0 }
 0x185   :  { %v8012_v56 = vadd.f32 %v6283_v47, %v1730_v61  ;;  %v1811_v61 = vmul.f32 %v8024_v18, %v8024_v18 }
 0x187   :  { %v1812_v24 = vmul.f32 %v8012_v56, %v8012_v56  ;;  %v1783_v60 = vsel %vm1290_vm4, %v8012_v56, 0.0 }
 0x188   :  { %v1784_v32 = vadd.f32 %v1783_v60, %v1782_v35 }
 0x189   :  { %v6284_v62 = vpop.f32.mrf.mxu0  ;;  %v1841_v6 = vsel %vm1290_vm4, %v1812_v24, 0.0 }
 0x18b   :  { %v6285_v15 = vpop.f32.mrf.mxu0 }
 0x18c   :  { %v6286_v3 = vadd.f32 %v6285_v15, %v6284_v62  ;;  %v1769_v62 = vadd.f32 %v1768_v23, %v1767_v21 }
 0x18d   :  { %v6287_v8 = vpop.f32.mrf.mxu0 }
 0x18e   :  { %v8026_v39 = vadd.f32 %v6530_v10, %v6286_v3  ;;  %v1819_v10 = vsel %vm1290_vm4, %v1803_v22, 0.0  ;;  %v1771_v43 = vadd.f32 %v1770_v27, %v1769_v62 }
 0x18f   :  { %v6288_v53 = vpop.f32.mrf.mxu0  ;;  %v1821_v7 = vadd.f32 %v1820_v2, %v1819_v10  ;;  %v1809_v10 = vmul.f32 %v8010_v42, %v8010_v42 }
 0x190   :  { %v6289_v0 = vadd.f32 %v6288_v53, %v6287_v8  ;;  %v1746_v8 = vpop.f32.mrf.mxu1  ;;  %v1824_v53 = vsel %vm1290_vm4, %v1806_v20, 0.0  ;;  %v1773_v5 = vadd.f32 %v1772_v52, %v1771_v43  ;;  %v1785_v47 = vsel %vm1290_vm4, %v8026_v39, 0.0 }
 0x191   :  { %v1823_v58 = vadd.f32 %v1822_v25, %v1821_v7  ;;  %v1786_v46 = vadd.f32 %v1785_v47, %v1784_v32 }
 0x192   :  { %v8035_v15 = vadd.f32 %v6531_v33, %v6289_v0  ;;  %v1813_v33 = vmul.f32 %v8026_v39, %v8026_v39  ;;  %v1775_v31 = vadd.f32 %v1774_v48, %v1773_v5 }
 0x193   :  { %v1825_v0 = vadd.f32 %v1824_v53, %v1823_v58 }
 0x194   :  { %v1843_v59 = vsel %vm1290_vm4, %v1813_v33, 0.0  ;;  %v1787_v28 = vsel %vm1290_vm4, %v8035_v15, 0.0  ;;  %v1776_v62 = vrot.slane %v1775_v31, 4 }
 0x195   :  { %v1788_v24 = vadd.f32 %v1787_v28, %v1786_v46 }
 0x196   :  { %v6290_v51 = vpop.f32.mrf.mxu0 }
 0x198   :  { %v6291_v55 = vpop.f32.mrf.mxu0 }
 0x199   :  { %v6292_v57 = vadd.f32 %v6291_v55, %v6290_v51  ;;  %v1814_v51 = vmul.f32 %v8035_v15, %v8035_v15  ;;  %v1840_v55 = vsel %vm1290_vm4, %v1811_v61, 0.0  ;;  %v1810_v61 = vmul.f32 %v8018_v41, %v8018_v41 }
 0x19a   :  { %v6293_v12 = vpop.f32.mrf.mxu0  ;;  %v1842_v22 = vadd.f32 %v1841_v6, %v1840_v55 }
 0x19b   :  { %v8047_v30 = vadd.f32 %v6292_v57, %v1743_v45  ;;  %v1807_v45 = vmul.f32 %v8000_v50, %v8000_v50  ;;  %v1845_v27 = vsel %vm1290_vm4, %v1814_v51, 0.0 }
 0x19c   :  { %v6294_v38 = vpop.f32.mrf.mxu0  ;;  %v1844_v52 = vadd.f32 %v1843_v59, %v1842_v22 }
 0x19d   :  { %v6295_v1 = vadd.f32 %v6294_v38, %v6293_v12  ;;  %v1815_v23 = vmul.f32 %v8047_v30, %v8047_v30  ;;  %v1808_v12 = vmul.f32 %v8004_v14, %v8004_v14  ;;  %v1789_v57 = vsel %vm1290_vm4, %v8047_v30, 0.0 }
 0x19e   :  { %v1826_v20 = vsel %vm1290_vm4, %v1807_v45, 0.0  ;;  %v1790_v60 = vadd.f32 %v1789_v57, %v1788_v24  ;;  %v1846_v33 = vadd.f32 %v1845_v27, %v1844_v52  ;;  %v1830_v45 = vsel %vm1290_vm4, %v1809_v10, 0.0  ;;  %v8105_v24 = vld [vmem:[%s9976_s4] sm:$0x1] }
 0x19f   :  { %v8057_v40 = vadd.f32 %v6295_v1, %v1746_v8  ;;  %v1847_v25 = vsel %vm1290_vm4, %v1815_v23, 0.0  ;;  %v1828_v8 = vsel %vm1290_vm4, %v1808_v12, 0.0  ;;  %v1827_v47 = vadd.f32 %v1826_v20, %v1825_v0 }
 0x1a0   :  { %v1848_v51 = vadd.f32 %v1847_v25, %v1846_v33  ;;  %v1832_v23 = vsel %vm1290_vm4, %v1810_v61, 0.0  ;;  %v1862_v0 = vlaneseq  ;;  %v1868_v61 = vmul.f32 2.0, %v8105_v24 }
 0x1a1   :  { %v1816_v38 = vmul.f32 %v8057_v40, %v8057_v40  ;;  %v1791_v43 = vsel %vm1290_vm4, %v8057_v40, 0.0  ;;  %v1829_v55 = vadd.f32 %v1828_v8, %v1827_v47  ;;  %v1861_v8 = vmul.f32 64.0, %v8105_v24 }
 0x1a2   :  { %v6296_v3 = vpop.f32.mrf.mxu0  ;;  %v1792_v58 = vadd.f32 %v1791_v43, %v1790_v60 }
 0x1a3   :  { %v1849_v53 = vsel %vm1290_vm4, %v1816_v38, 0.0  ;;  %v1831_v22 = vadd.f32 %v1830_v45, %v1829_v55 }
 0x1a4   :  { %v6297_v21 = vpop.f32.mrf.mxu0  ;;  %v1850_v59 = vadd.f32 %v1849_v53, %v1848_v51 }
 0x1a5   :  { %v6298_v2 = vadd.f32 %v6297_v21, %v6296_v3 }
 0x1a6   :  { %v6299_v1 = vpop.f32.mrf.mxu0 }
 0x1a7   :  { %v8081_v48 = vadd.f32 %v7990_v34, %v6298_v2  ;;  %v1777_v34 = vadd.f32 %v1776_v62, %v1775_v31 }
 0x1a8   :  { %v6300_v7 = vpop.f32.mrf.mxu0 }
 0x1a9   :  { %v1793_v5 = vsel %vm1290_vm4, %v8081_v48, 0.0  ;;  %v1817_v35 = vmul.f32 %v8081_v48, %v8081_v48  ;;  %v6301_v6 = vadd.f32 %v6300_v7, %v6299_v1  ;;  %v1778_v46 = vrot.slane %v1777_v34, 2 }
 0x1aa   :  { %v1794_v28 = vadd.f32 %v1793_v5, %v1792_v58  ;;  %v8107_v1 = vshrl.u32 %v1862_v0, 7 }
 0x1ab   :  { %v1851_v32 = vsel %vm1290_vm4, %v1817_v35, 0.0  ;;  %v8094_v3 = vadd.f32 %v8020_v54, %v6301_v6  ;;  %v1833_v54 = vadd.f32 %v1832_v23, %v1831_v22  ;;  %v1779_v20 = vadd.f32 %v1778_v46, %v1777_v34 }
 0x1ac   :  { %v1852_v21 = vadd.f32 %v1851_v32, %v1850_v59  ;;  %v8112_v53 = vsub.s32 0, %v8107_v1 }
 0x1ad   :  { %v1795_v12 = vsel %vm1290_vm4, %v8094_v3, 0.0  ;;  %v1818_v31 = vmul.f32 %v8094_v3, %v8094_v3  ;;  %v1834_v10 = vrot.slane %v1833_v54, 4  ;;  %v1780_v60 = vrot.slane %v1779_v20, 1 }
 0x1ae   :  { %v1796_v27 = vadd.f32 %v1795_v12, %v1794_v28  ;;  %10010 = vst [vmem:[#allocation6_spill] sm:$0xff] %v8112_v53  ;;  %v1872_v6 = vrot.slane %v1868_v61, %v8112_v53  ;;  %v1865_v58 = vrot.slane %v1861_v8, %v8112_v53  ;;  %v6932_v61 = vmov 1966171168  }
 0x1af   :  { %v1853_v57 = vsel %vm1290_vm4, %v1818_v31, 0.0  ;;  %v1835_v5 = vadd.f32 %v1834_v10, %v1833_v54  ;;  %v1781_v47 = vadd.f32 %v1780_v60, %v1779_v20  ;;  %v1885_v31 = vmul.f32 %v8105_v24, %v8105_v24 }
 0x1b0   :  { %v1797_v38 = vrot.slane %v1796_v27, 4  ;;  %v1854_v2 = vadd.f32 %v1853_v57, %v1852_v21  ;;  %v2069_v60 = vunpack.c.l.s4 %v6932_v61 }
 0x1b1   :  { %v1836_v45 = vrot.slane %v1835_v5, 2  ;;  %v1866_v23 = vadd.f32 %v1865_v58, %v1781_v47 }
 0x1b2   :  { %v1798_v62 = vadd.f32 %v1797_v38, %v1796_v27  ;;  %v1855_v52 = vrot.slane %v1854_v2, 4  ;;  %v1886_v27 = vmul.f32 64.0, %v1885_v31 }
 0x1b3   :  { %v1837_v0 = vadd.f32 %v1836_v45, %v1835_v5 }
 0x1b4   :  { %v1799_v25 = vrot.slane %v1798_v62, 2  ;;  %v1856_v43 = vadd.f32 %v1855_v52, %v1854_v2  ;;  %v1890_v38 = vrot.slane %v1886_v27, %v8112_v53 }
 0x1b5   :  { %v1838_v57 = vrot.slane %v1837_v0, 1 }
 0x1b6   :  { %v1800_v33 = vadd.f32 %v1799_v25, %v1798_v62  ;;  %v1857_v7 = vrot.slane %v1856_v43, 2 }
 0x1b8   :  { %v1801_v35 = vrot.slane %v1800_v33, 1  ;;  %v1858_v51 = vadd.f32 %v1857_v7, %v1856_v43  ;;  %v2070_v7 = vunpack.c.0.s8 %v2069_v60 }
 0x1ba   :  { %v1802_v34 = vadd.f32 %v1801_v35, %v1800_v33  ;;  %v1859_v28 = vrot.slane %v1858_v51, 1  ;;  %v2059_v35 = vrot.slane %v8105_v24, %v8112_v53  ;;  %v8187_v45 = vsub.s32 %v2070_v7, %v8107_v1  ;;  %v5999_v24 = vld [vmem:[%s9976_s4 + $0x2] ss:$0 sm:$0xff] }
 0x1bc   :  { %v1867_v32 = vadd.f32 %v1865_v58, %v1802_v34  ;;  %v1876_v55 = vsel %vm1875_vm7, %v1802_v34, %v1781_v47  ;;  %v1860_v21 = vadd.f32 %v1859_v28, %v1858_v51  ;;  %v5998_v34 = vld [vmem:[%s9976_s4 + $0x1] ss:$0 sm:$0xff]  ;;  %10011 = vst [vmem:[#allocation7_spill] sm:$0xff] %v8187_v45 }
 0x1bd   :  { %v1878_v59 = vmul.f32 %v1876_v55, %v1872_v6 }
 0x1be   :  { %v1895_v12 = vrot.slane %v1867_v32, 7 }
 0x1bf   :  { %v1880_v46 = vrot.slane %v1878_v59, 1 }
 0x1c0   :  { %v1896_v22 = vsel %vm1875_vm7, %v1895_v12, %v1866_v23 }
 0x1c1   :  { %6553 = vmatmul.mubr.msk.f32.vlgmr.msra.gmra.mxu1 %vm1290_vm4, %v1896_v22  ;;  %v1884_v54 = vadd.f32 %v1880_v46, %v1860_v21 }
 0x1c2   :  { %6556 = vmatpush3.msra.mxu1 %v7928_v26  ;;  %6571 = vmatprep.mubr.msk.f32.mxu1 %vm6930_vm6, %v9979_v44  ;;  %v1839_v26 = vadd.f32 %v1838_v57, %v1837_v0 }
 0x1c3   :  { %6557 = vmatprep.subr.mxu1 %v9979_v44  ;;  %v1892_v2 = vadd.f32 %v1890_v38, %v1884_v54 }
 0x1c4   :  { %6558 = vmatpush3.msra.mxu1 %v7936_v17  ;;  %v1883_v20 = vadd.f32 %v1878_v59, %v1839_v26 }
 0x1c5   :  { %6559 = vmatprep.subr.mxu1 %v9979_v44  ;;  %v1972_v17 = vrot.slane %v1892_v2, 7 }
 0x1c6   :  { %6560 = vmatpush3.msra.mxu1 %v7943_v16  ;;  %v1891_v16 = vadd.f32 %v1890_v38, %v1883_v20 }
 0x1c7   :  { %6561 = vmatprep.subr.mxu1 %v9979_v44 }
 0x1c8   :  { %6562 = vmatpush3.msra.mxu1 %v7950_v4  ;;  %v1973_v4 = vsel %vm1875_vm7, %v1972_v17, %v1891_v16 }
 0x1c9   :  { %6563 = vmatprep.subr.mxu1 %v9979_v44 }
 0x1ca   :  { %6564 = vmatpush3.msra.mxu1 %v7957_v11  ;;  %v6931_v11 = vmov 0  }
 0x1cb   :  { %6565 = vmatprep.subr.mxu1 %v9979_v44  ;;  %2185 = vst.msk [vmem:[#allocation2 + $0x8] sm:$0xf] %vm2181_vm8, %v6931_v11  ;;  %2187 = vst.msk [vmem:[#allocation2 + $0x10] sm:$0xf] %vm2181_vm8, %v6931_v11 }
 0x1cc   :  { %6566 = vmatpush3.msra.mxu1 %v7962_v37  ;;  %2182 = vst.msk [vmem:[#allocation2] sm:$0xf] %vm2181_vm8, %v6931_v11  ;;  %2189 = vst.msk [vmem:[#allocation2 + $0x18] sm:$0xf] %vm2181_vm8, %v6931_v11 }
 0x1cd   :  { %6567 = vmatprep.subr.mxu1 %v9979_v44  ;;  %2191 = vst.msk [vmem:[#allocation2 + $0x20] sm:$0xf] %vm2181_vm8, %v6931_v11  ;;  %2193 = vst.msk [vmem:[#allocation2 + $0x28] sm:$0xf] %vm2181_vm8, %v6931_v11 }
 0x1ce   :  { %6568 = vmatpush3.msra.mxu1 %v7971_v63  ;;  %2195 = vst.msk [vmem:[#allocation2 + $0x30] sm:$0xf] %vm2181_vm8, %v6931_v11  ;;  %2197 = vst.msk [vmem:[#allocation2 + $0x38] sm:$0xf] %vm2181_vm8, %v6931_v11 }
 0x1cf   :  { %6569 = vmatprep.subr.mxu1 %v9979_v44  ;;  %2199 = vst.msk [vmem:[#allocation2 + $0x40] sm:$0xf] %vm2181_vm8, %v6931_v11  ;;  %2201 = vst.msk [vmem:[#allocation2 + $0x48] sm:$0xf] %vm2181_vm8, %v6931_v11 }
 0x1d0   :  { %6570 = vmatpush3.msra.mxu1 %v7978_v36  ;;  %2203 = vst.msk [vmem:[#allocation2 + $0x50] sm:$0xf] %vm2181_vm8, %v6931_v11  ;;  %2205 = vst.msk [vmem:[#allocation2 + $0x58] sm:$0xf] %vm2181_vm8, %v6931_v11 }
 0x1d1   :  { %6572 = vmatmul.mubr.msk.f32.vlgmr.msra.gmra.mxu1 %vm1290_vm4, %v1973_v4  ;;  %2207 = vst.msk [vmem:[#allocation2 + $0x60] sm:$0xf] %vm2181_vm8, %v6931_v11  ;;  %2209 = vst.msk [vmem:[#allocation2 + $0x68] sm:$0xf] %vm2181_vm8, %v6931_v11 }
 0x1d2   :  { %2211 = vst.msk [vmem:[#allocation2 + $0x70] sm:$0xf] %vm2181_vm8, %v6931_v11  ;;  %2213 = vst.msk [vmem:[#allocation2 + $0x78] sm:$0xf] %vm2181_vm8, %v6931_v11 }
 0x1d3   :  { %2215 = vst.msk [vmem:[#allocation2 + $0x80] sm:$0xf] %vm2181_vm8, %v6931_v11  ;;  %2217 = vst.msk [vmem:[#allocation2 + $0x88] sm:$0xf] %vm2181_vm8, %v6931_v11  ;;  %v2550_v33 = vld [vmem:[#allocation2] sm:$0xf] }
 0x1d4   :  { %2219 = vst.msk [vmem:[#allocation2 + $0x90] sm:$0xf] %vm2181_vm8, %v6931_v11  ;;  %2221 = vst.msk [vmem:[#allocation2 + $0x98] sm:$0xf] %vm2181_vm8, %v6931_v11  ;;  %v2583_v6 = vshrl.u32 %v2550_v33, 16  ;;  %v2586_v47 = vshll.u32 %v2550_v33, 16 }
 0x1d5   :  { %2184 = vst.msk [vmem:[#allocation2 + $0x4] sm:$0x1] %vm2183_vm9, %v6931_v11  ;;  %2186 = vst.msk [vmem:[#allocation2 + $0xc] sm:$0x1] %vm2183_vm9, %v6931_v11 }
 0x1d6   :  { %2188 = vst.msk [vmem:[#allocation2 + $0x14] sm:$0x1] %vm2183_vm9, %v6931_v11  ;;  %2190 = vst.msk [vmem:[#allocation2 + $0x1c] sm:$0x1] %vm2183_vm9, %v6931_v11  ;;  %v2585_v28 = vrot.slane %v2583_v6, 4  ;;  %v2588_v23 = vrot.slane %v2586_v47, 5 }
 0x1d7   :  { %2192 = vst.msk [vmem:[#allocation2 + $0x24] sm:$0x1] %vm2183_vm9, %v6931_v11  ;;  %2194 = vst.msk [vmem:[#allocation2 + $0x2c] sm:$0x1] %vm2183_vm9, %v6931_v11  ;;  %v2558_v5 = vld [vmem:[#allocation2 + $0x50] sm:$0xf] }
 0x1d8   :  { %2196 = vst.msk [vmem:[#allocation2 + $0x34] sm:$0x1] %vm2183_vm9, %v6931_v11  ;;  %2198 = vst.msk [vmem:[#allocation2 + $0x3c] sm:$0x1] %vm2183_vm9, %v6931_v11  ;;  %v2695_v51 = vshrl.u32 %v2558_v5, 16  ;;  %v2698_v58 = vshll.u32 %v2558_v5, 16  ;;  %v2589_v1 = vor.u32 %v2588_v23, %v2585_v28 }
 0x1d9   :  { %2200 = vst.msk [vmem:[#allocation2 + $0x44] sm:$0x1] %vm2183_vm9, %v6931_v11  ;;  %2202 = vst.msk [vmem:[#allocation2 + $0x4c] sm:$0x1] %vm2183_vm9, %v6931_v11 }
 0x1da   :  { %2204 = vst.msk [vmem:[#allocation2 + $0x54] sm:$0x1] %vm2183_vm9, %v6931_v11  ;;  %2206 = vst.msk [vmem:[#allocation2 + $0x5c] sm:$0x1] %vm2183_vm9, %v6931_v11  ;;  %v2697_v12 = vrot.slane %v2695_v51, 4  ;;  %v2700_v31 = vrot.slane %v2698_v58, 5 }
 0x1db   :  { %2208 = vst.msk [vmem:[#allocation2 + $0x64] sm:$0x1] %vm2183_vm9, %v6931_v11  ;;  %2210 = vst.msk [vmem:[#allocation2 + $0x6c] sm:$0x1] %vm2183_vm9, %v6931_v11  ;;  %v8200_v4 = vrot.slane %v2589_v1, 4 }
 0x1dc   :  { %2212 = vst.msk [vmem:[#allocation2 + $0x74] sm:$0x1] %vm2183_vm9, %v6931_v11  ;;  %2214 = vst.msk [vmem:[#allocation2 + $0x7c] sm:$0x1] %vm2183_vm9, %v6931_v11  ;;  %v2566_v27 = vld [vmem:[#allocation2 + $0x4] sm:$0x1]  ;;  %v2701_v26 = vor.u32 %v2700_v31, %v2697_v12 }
 0x1dd   :  { %2216 = vst.msk [vmem:[#allocation2 + $0x84] sm:$0x1] %vm2183_vm9, %v6931_v11  ;;  %2218 = vst.msk [vmem:[#allocation2 + $0x8c] sm:$0x1] %vm2183_vm9, %v6931_v11  ;;  %v2592_v38 = vshll.u32 %v2566_v27, 16 }
 0x1de   :  { %2220 = vst.msk [vmem:[#allocation2 + $0x94] sm:$0x1] %vm2183_vm9, %v6931_v11  ;;  %2222 = vst.msk [vmem:[#allocation2 + $0x9c] sm:$0x1] %vm2183_vm9, %v6931_v11  ;;  %v2451_v27 = vld [vmem:[#allocation2 + $0x8] sm:$0xf] }
 0x1e1   :  { %v2574_v57 = vld [vmem:[#allocation2 + $0x54] sm:$0x1] }
 0x1e2   :  { %v2704_v2 = vshll.u32 %v2574_v57, 16 }
 0x281   :  { %v1965_v37 = vpop.f32.mrf.mxu1 }
 0x282   :  { %v1969_v36 = vmul.f32 0.0009765625, %v1965_v37  ;;  %v8205_v37 = vrot.slane %v2592_v38, 5 }
 0x283   :  { %v6554_v63 = vpop.f32.mrf.mxu1 }
 0x284   :  { %v2047_v52 = vmul.f32 %v1969_v36, %v1969_v36  ;;  %v2060_v55 = vsub.f32 %v2059_v35, %v1969_v36  ;;  %v8207_v63 = vrot.slane %v2701_v26, 4  ;;  %v8209_v36 = vrot.slane %v2704_v2, 5  ;;  %v2460_v2 = vld [vmem:[#allocation2 + $0x10] sm:$0xf] }
 0x291   :  { %v2042_v62 = vpop.f32.mrf.mxu1 }
 0x292   :  { %v2046_v10 = vmul.f32 0.0009765625, %v2042_v62 }
 0x293   :  { %v6573_v25 = vpop.f32.mrf.mxu1 }
 0x294   :  { %v2048_v43 = vsub.f32 %v2046_v10, %v2047_v52 }
 0x296   :  { %v2049_v8 = vadd.f32 1e-05, %v2048_v43 }
 0x298   :  { %6839 = vrsqrt.f32 %v2049_v8 }
 0x2a5   :  { %v6840_v32 = vpop.eup %6839 }
 0x2a6   :  { %v2055_v59 = vmul.f32 %v6840_v32, %v5998_v34 }
 0x2a8   :  { %v2061_v0 = vmul.f32 %v2060_v55, %v2055_v59  ;;  %v2074_v22 = vrot.slane %v2055_v59, %v8187_v45 }
 0x2aa   :  { %v2066_v46 = vadd.f32 %v5999_v24, %v2061_v0  ;;  %v2082_v21 = vrot.slane %v2074_v22, %v8187_v45  ;;  %v2075_v54 = vcombine.high %v2074_v22, %v2074_v22 }
 0x2ac   :  { %v2093_v20 = vrot.slane %v2082_v21, %v8112_v53  ;;  %v8196_v17 = vrot.slane %v2066_v46, %v8187_v45  ;;  %v8203_v11 = vrot.slane %v2075_v54, %v8187_v45 }
 0x2ae   :  { %v2131_v16 = vrot.slane %v8196_v17, %v8187_v45  ;;  %v2100_v52 = vmul.f32 %v2093_v20, %v7986_v9  ;;  %v2101_v10 = vmul.f32 %v2093_v20, %v7984_v19  ;;  %v2102_v25 = vmul.f32 %v2093_v20, %v7988_v49 }
 0x2af   :  { %v2103_v43 = vmul.f32 %v2093_v20, %v7994_v13  ;;  %v2104_v8 = vmul.f32 %v2093_v20, %v8000_v50  ;;  %v2105_v61 = vmul.f32 %v2093_v20, %v8004_v14  ;;  %v2106_v60 = vmul.f32 %v2093_v20, %v8010_v42 }
 0x2b0   :  { %v2142_v62 = vrot.slane %v2131_v16, %v8112_v53  ;;  %v2107_v35 = vmul.f32 %v2093_v20, %v8018_v41  ;;  %v2124_v42 = vcombine.high %v8196_v17, %v8196_v17 }
 0x2b2   :  { %v2149_v33 = vadd.f32 %v2142_v62, %v2100_v52  ;;  %v2150_v7 = vadd.f32 %v2142_v62, %v2101_v10  ;;  %v2151_v5 = vadd.f32 %v2142_v62, %v2102_v25  ;;  %v2152_v9 = vadd.f32 %v2142_v62, %v2103_v43  ;;  %v2466_v10 = vld [vmem:[#allocation2 + $0x18] sm:$0xf] }
 0x2b3   :  { %v2153_v6 = vadd.f32 %v2142_v62, %v2104_v8  ;;  %v2154_v19 = vadd.f32 %v2142_v62, %v2105_v61  ;;  %v2155_v47 = vadd.f32 %v2142_v62, %v2106_v60  ;;  %v8220_v13 = vadd.f32 %v2142_v62, %v2107_v35  ;;  %v2457_v35 = vld [vmem:[#allocation2 + $0xc] sm:$0x1] }
 0x2b4   :  { %v2165_v34 = vmax.f32 %v2149_v33, 0.0  ;;  %v2166_v49 = vmax.f32 %v2150_v7, 0.0  ;;  %v2167_v51 = vmax.f32 %v2151_v5, 0.0  ;;  %v2168_v50 = vmax.f32 %v2152_v9, 0.0  ;;  %v2472_v33 = vld [vmem:[#allocation2 + $0x20] sm:$0xf] }
 0x2b5   :  { %v2169_v58 = vmax.f32 %v2153_v6, 0.0  ;;  %v2170_v14 = vmax.f32 %v2154_v19, 0.0  ;;  %v2171_v32 = vmax.f32 %v2155_v47, 0.0  ;;  %v2172_v12 = vmax.f32 %v8220_v13, 0.0 }
 0x2b6   :  { %v6222_v55 = vpack.c.bf16 %v2165_v34, %v2165_v34  ;;  %v6223_v59 = vpack.c.bf16 %v2166_v49, %v2166_v49  ;;  %v6224_v28 = vpack.c.bf16 %v2167_v51, %v2167_v51  ;;  %v6225_v41 = vpack.c.bf16 %v2168_v50, %v2168_v50  ;;  %v2478_v50 = vld [vmem:[#allocation2 + $0x28] sm:$0xf] }
 0x2b7   :  { %v6226_v23 = vpack.c.bf16 %v2169_v58, %v2169_v58  ;;  %v6227_v24 = vpack.c.bf16 %v2170_v14, %v2170_v14  ;;  %v8225_v46 = vpack.c.bf16 %v2171_v32, %v2171_v32  ;;  %v2484_v58 = vld [vmem:[#allocation2 + $0x30] sm:$0xf] }
 0x2b8   :  { %v2288_v31 = vshrl.u32 %v6222_v55, 16  ;;  %v2291_v0 = vshll.u32 %v6222_v55, 16  ;;  %v2296_v22 = vshrl.u32 %v6223_v59, 16  ;;  %v2299_v21 = vshll.u32 %v6223_v59, 16 }
 0x2b9   :  { %v2304_v1 = vshrl.u32 %v6224_v28, 16  ;;  %v2307_v57 = vshll.u32 %v6224_v28, 16  ;;  %v2312_v54 = vshrl.u32 %v6225_v41, 16  ;;  %v2315_v20 = vshll.u32 %v6225_v41, 16  ;;  %v2463_v28 = vld [vmem:[#allocation2 + $0x14] sm:$0x1] }
 0x2ba   :  { %v2290_v38 = vrot.slane %v2288_v31, 7  ;;  %v2298_v26 = vrot.slane %v2296_v22, 7  ;;  %v2320_v17 = vshrl.u32 %v6226_v23, 16  ;;  %v2323_v25 = vshll.u32 %v6226_v23, 16  ;;  %v2469_v41 = vld [vmem:[#allocation2 + $0x1c] sm:$0x1] }
 0x2bb   :  { %v2306_v62 = vrot.slane %v2304_v1, 7  ;;  %v2314_v52 = vrot.slane %v2312_v54, 7  ;;  %v2328_v43 = vshrl.u32 %v6227_v24, 16  ;;  %v2331_v7 = vshll.u32 %v6227_v24, 16  ;;  %v2475_v22 = vld [vmem:[#allocation2 + $0x24] sm:$0x1] }
 0x2bc   :  { %v2293_v8 = vor.u32 %v2291_v0, %v2290_v38  ;;  %v2294_v61 = vrot.slane %v2290_v38, 4  ;;  %v2301_v60 = vor.u32 %v2299_v21, %v2298_v26  ;;  %v2302_v9 = vrot.slane %v2298_v26, 4  ;;  %v2481_v54 = vld [vmem:[#allocation2 + $0x2c] sm:$0x1]  ;;  %v2487_v38 = vld [vmem:[#allocation2 + $0x34] sm:$0x1] }
 0x2bd   :  { %v2309_v6 = vor.u32 %v2307_v57, %v2306_v62  ;;  %v2310_v19 = vrot.slane %v2306_v62, 4  ;;  %v2317_v47 = vor.u32 %v2315_v20, %v2314_v52  ;;  %v2322_v51 = vrot.slane %v2320_v17, 7 }
 0x2be   :  { %v2452_v34 = vsel %vm8229_vm12, %v2293_v8, %v2451_v27  ;;  %v2461_v49 = vsel %vm8229_vm12, %v2301_v60, %v2460_v2  ;;  %v2330_v13 = vrot.slane %v2328_v43, 7  ;;  %v2318_v14 = vrot.slane %v2314_v52, 4 }
 0x2bf   :  { %2453 = vst [vmem:[#allocation2 + $0x8] sm:$0xf] %v2452_v34  ;;  %2462 = vst [vmem:[#allocation2 + $0x10] sm:$0xf] %v2461_v49  ;;  %v2467_v32 = vsel %vm8229_vm12, %v2309_v6, %v2466_v10  ;;  %v2473_v55 = vsel %vm8229_vm12, %v2317_v47, %v2472_v33  ;;  %v2458_v59 = vsel %vm8235_vm13, %v2294_v61, %v2457_v35  ;;  %v2326_v24 = vrot.slane %v2322_v51, 4 }
 0x2c0   :  { %2468 = vst [vmem:[#allocation2 + $0x18] sm:$0xf] %v2467_v32  ;;  %2474 = vst [vmem:[#allocation2 + $0x20] sm:$0xf] %v2473_v55  ;;  %v2325_v23 = vor.u32 %v2323_v25, %v2322_v51  ;;  %v2333_v31 = vor.u32 %v2331_v7, %v2330_v13  ;;  %v2334_v0 = vrot.slane %v2330_v13, 4  ;;  %v8251_v21 = vrot.slane %v8203_v11, %v8112_v53 }
 0x2c1   :  { %2459 = vst [vmem:[#allocation2 + $0xc] sm:$0x1] %v2458_v59  ;;  %v2138_v27 = vrot.slane %v2124_v42, %v8187_v45  ;;  %v6229_v1 = vpack.c.bf16 %v2172_v12, %v2172_v12  ;;  %v2336_v57 = vshrl.u32 %v8225_v46, 16  ;;  %v2464_v20 = vsel %vm8235_vm13, %v2302_v9, %v2463_v28 }
 0x2c2   :  { %v2479_v26 = vsel %vm8229_vm12, %v2325_v23, %v2478_v50  ;;  %v2485_v2 = vsel %vm8229_vm12, %v2333_v31, %v2484_v58  ;;  %v2470_v11 = vsel %vm8235_vm13, %v2310_v19, %v2469_v41  ;;  %2465 = vst [vmem:[#allocation2 + $0x14] sm:$0x1] %v2464_v20  ;;  %v2476_v42 = vsel %vm8235_vm13, %v2318_v14, %v2475_v22 }
 0x2c3   :  { %2480 = vst [vmem:[#allocation2 + $0x28] sm:$0xf] %v2479_v26  ;;  %2486 = vst [vmem:[#allocation2 + $0x30] sm:$0xf] %v2485_v2  ;;  %v2482_v12 = vsel %vm8235_vm13, %v2326_v24, %v2481_v54  ;;  %v2488_v17 = vsel %vm8235_vm13, %v2334_v0, %v2487_v38  ;;  %v8270_v62 = vrot.slane %v2138_v27, %v8112_v53  ;;  %v2344_v52 = vshrl.u32 %v6229_v1, 16 }
 0x2c4   :  { %2471 = vst [vmem:[#allocation2 + $0x1c] sm:$0x1] %v2470_v11  ;;  %2477 = vst [vmem:[#allocation2 + $0x24] sm:$0x1] %v2476_v42  ;;  %v2595_v43 = vsel %vm7023_vm2, %v8200_v4, %v8205_v37  ;;  %v8276_v8 = vrot.slane %v2336_v57, 7  ;;  %v2108_v61 = vmul.f32 %v8251_v21, %v8024_v18  ;;  %v2707_v60 = vsel %vm7023_vm2, %v8207_v63, %v8209_v36 }
 0x2c5   :  { %2483 = vst [vmem:[#allocation2 + $0x2c] sm:$0x1] %v2482_v12  ;;  %2489 = vst [vmem:[#allocation2 + $0x34] sm:$0x1] %v2488_v17  ;;  %v2109_v19 = vmul.f32 %v8251_v21, %v8012_v56  ;;  %v2339_v51 = vshll.u32 %v8225_v46, 16  ;;  %v2110_v18 = vmul.f32 %v8251_v21, %v8026_v39  ;;  %v8290_v13 = vrot.slane %v2344_v52, 7 }
 0x2c6   :  { %v2921_v10 = vld [vmem:[#allocation2 + $0x8] sm:$0xf]  ;;  %v2922_v25 = vld [vmem:[#allocation2 + $0x10] sm:$0xf]  ;;  %v2347_v50 = vshll.u32 %v6229_v1, 16  ;;  %v8293_v58 = vadd.f32 %v8270_v62, %v2108_v61  ;;  %v2111_v14 = vmul.f32 %v8251_v21, %v8035_v15  ;;  %v2342_v59 = vrot.slane %v8276_v8, 4 }
 0x2c7   :  { %v2968_v33 = vshrl.u32 %v2922_v25, 16  ;;  %v2971_v7 = vshll.u32 %v2922_v25, 16  ;;  %v6088_v35 = vcombine.low %v2921_v10, %v2922_v25  ;;  %v2923_v9 = vld [vmem:[#allocation2 + $0x18] sm:$0xf]  ;;  %v2551_v6 = vld [vmem:[#allocation2 + $0x8] sm:$0xf]  ;;  %v2341_v22 = vor.u32 %v2339_v51, %v8276_v8 }
 0x2c8   :  { %v2954_v47 = vshrl.u32 %v2921_v10, 16  ;;  %v2957_v34 = vshll.u32 %v2921_v10, 16  ;;  %v2924_v49 = vld [vmem:[#allocation2 + $0x20] sm:$0xf]  ;;  %v2982_v56 = vshrl.u32 %v2923_v9, 16  ;;  %v2985_v32 = vshll.u32 %v2923_v9, 16 }
 0x2c9   :  { %3802 = vrot.lane.b32.xlu0 %v6088_v35, %s6926_s29  ;;  %v2597_v55 = vshrl.u32 %v2551_v6, 16  ;;  %v2970_v46 = vrot.slane %v2968_v33, 4  ;;  %v2973_v28 = vrot.slane %v2971_v7, 5  ;;  %v2996_v41 = vshrl.u32 %v2924_v49, 16  ;;  %v2490_v15 = vld [vmem:[#allocation2 + $0x38] sm:$0xf] }
 0x2ca   :  { %v6089_v39 = vcombine.low %v2923_v9, %v2924_v49  ;;  %v8298_v23 = vrot.slane %v2954_v47, 4  ;;  %v8300_v24 = vrot.slane %v2957_v34, 5  ;;  %v8302_v31 = vld [vmem:[#allocation2 + $0x28] sm:$0xf]  ;;  %v8304_v0 = vld [vmem:[#allocation2 + $0x30] sm:$0xf]  ;;  %v8308_v27 = vadd.f32 %v8270_v62, %v2109_v19 }
 0x2cb   :  { %v2567_v1 = vld [vmem:[#allocation2 + $0xc] sm:$0x1]  ;;  %v2349_v57 = vor.u32 %v2347_v50, %v8290_v13  ;;  %v2496_v38 = vld [vmem:[#allocation2 + $0x40] sm:$0xf]  ;;  %v8314_v26 = vadd.f32 %v8270_v62, %v2110_v18  ;;  %v8317_v2 = vadd.f32 %v8270_v62, %v2111_v14  ;;  %v8319_v20 = vrot.slane %v2982_v56, 4 }
 0x2cc   :  { %v8321_v11 = vrot.slane %v2985_v32, 5  ;;  %v2999_v42 = vshll.u32 %v2924_v49, 16  ;;  %v2552_v12 = vld [vmem:[#allocation2 + $0x10] sm:$0xf]  ;;  %v8325_v17 = vmul.f32 %v8251_v21, %v8047_v30  ;;  %v2974_v52 = vor.u32 %v2973_v28, %v2970_v46  ;;  %v2553_v19 = vld [vmem:[#allocation2 + $0x18] sm:$0xf] }
 0x2cd   :  { %3804 = vrot.lane.b32.xlu0 %v6089_v39, %s6926_s29  ;;  %v8327_v10 = vrot.slane %v2996_v41, 4  ;;  %v6090_v25 = vcombine.low %v8302_v31, %v8304_v0  ;;  %v8333_v61 = vmul.f32 %v8251_v21, %v8057_v40  ;;  %v2960_v33 = vor.u32 %v8300_v24, %v8298_v23  ;;  %v2568_v49 = vld [vmem:[#allocation2 + $0x14] sm:$0x1]  ;;  %v2569_v32 = vld [vmem:[#allocation2 + $0x1c] sm:$0x1] }
 0x2ce   :  { %v3010_v7 = vshrl.u32 %v8302_v31, 16  ;;  %v2599_v35 = vrot.slane %v2597_v55, 4  ;;  %v2600_v9 = vshll.u32 %v2551_v6, 16  ;;  %v2606_v30 = vshll.u32 %v2567_v1, 16 }
 0x2cf   :  { %v2491_v47 = vsel %vm8229_vm12, %v2341_v22, %v2490_v15  ;;  %v2497_v34 = vsel %vm8229_vm12, %v2349_v57, %v2496_v38  ;;  %v2611_v40 = vshrl.u32 %v2552_v12, 16  ;;  %v2988_v51 = vor.u32 %v8321_v11, %v8319_v20 }
 0x2d0   :  { %v8345_v18 = vrot.slane %v2999_v42, 5  ;;  %v2602_v50 = vrot.slane %v2600_v9, 5  ;;  %2492 = vst [vmem:[#allocation2 + $0x38] sm:$0xf] %v2491_v47  ;;  %2498 = vst [vmem:[#allocation2 + $0x40] sm:$0xf] %v2497_v34 }
 0x2d1   :  { %3806 = vrot.lane.b32.xlu0 %v6090_v25, %s6926_s29  ;;  %v2614_v6 = vshll.u32 %v2552_v12, 16  ;;  %v8347_v14 = vrot.slane %v2974_v52, 4  ;;  %v3013_v56 = vshll.u32 %v8302_v31, 16  ;;  %v2613_v55 = vrot.slane %v2611_v40, 4  ;;  %v2493_v42 = vld [vmem:[#allocation2 + $0x3c] sm:$0x1] }
 0x2d2   :  { %v2625_v46 = vshrl.u32 %v2553_v19, 16  ;;  %v2603_v28 = vor.u32 %v2602_v50, %v2599_v35  ;;  %v2620_v39 = vshll.u32 %v2568_v49, 16  ;;  %v2628_v23 = vshll.u32 %v2553_v19, 16  ;;  %v2554_v35 = vld [vmem:[#allocation2 + $0x20] sm:$0xf] }
 0x2d3   :  { %v2616_v41 = vrot.slane %v2614_v6, 5  ;;  %v2608_v24 = vrot.slane %v2606_v30, 5  ;;  %v2173_v15 = vmax.f32 %v8293_v58, 0.0  ;;  %v2174_v1 = vmax.f32 %v8308_v27, 0.0 }
 0x2d4   :  { %v2627_v22 = vrot.slane %v2625_v46, 4  ;;  %v2604_v57 = vrot.slane %v2603_v28, 4  ;;  %v2630_v20 = vrot.slane %v2628_v23, 5  ;;  %v2634_v11 = vshll.u32 %v2569_v32, 16 }
 0x2d5   :  { %v2617_v38 = vor.u32 %v2616_v41, %v2613_v55  ;;  %v8352_v12 = vrot.slane %v3010_v7, 4  ;;  %v3024_v31 = vshrl.u32 %v8304_v0, 16  ;;  %v3027_v52 = vshll.u32 %v8304_v0, 16  ;;  %v2502_v41 = vld [vmem:[#allocation2 + $0x58] sm:$0xf] }
 0x2d6   :  { %v6230_v25 = vpack.c.bf16 %v2173_v15, %v2173_v15  ;;  %v2609_v9 = vsel %vm7023_vm2, %v2604_v57, %v2608_v24  ;;  %v2622_v58 = vrot.slane %v2620_v39, 5  ;;  %v2631_v30 = vor.u32 %v2630_v20, %v2627_v22  ;;  %v2555_v15 = vld [vmem:[#allocation2 + $0x28] sm:$0xf] }
 0x2d7   :  { %v2618_v19 = vrot.slane %v2617_v38, 4  ;;  %v6072_v27 = vcombine.low %v2595_v43, %v2609_v9  ;;  %v8363_v7 = vld [vmem:[#allocation2 + $0x38] sm:$0xf]  ;;  %v8365_v47 = vld [vmem:[#allocation2 + $0x40] sm:$0xf]  ;;  %v6231_v34 = vpack.c.bf16 %v2174_v1, %v2174_v1  ;;  %v2494_v49 = vsel %vm8235_vm13, %v2342_v59, %v2493_v42 }
 0x2d8   :  { %v2352_v0 = vshrl.u32 %v6230_v25, 16  ;;  %v2636_v40 = vrot.slane %v2634_v11, 5  ;;  %v2355_v50 = vshll.u32 %v6230_v25, 16  ;;  %v2639_v6 = vshrl.u32 %v2554_v35, 16  ;;  %2495 = vst [vmem:[#allocation2 + $0x3c] sm:$0x1] %v2494_v49 }
 0x2d9   :  { %v2642_v32 = vshll.u32 %v2554_v35, 16  ;;  %3722 = vrot.lane.b32.xlu1 %v6072_v27, %s6926_s29  ;;  %v6091_v4 = vcombine.low %v8363_v7, %v8365_v47  ;;  %v2623_v37 = vsel %vm7023_vm2, %v2618_v19, %v2622_v58  ;;  %v2632_v43 = vrot.slane %v2631_v30, 4  ;;  %v2505_v1 = vld [vmem:[#allocation2 + $0x5c] sm:$0x1]  ;;  %v2556_v9 = vld [vmem:[#allocation2 + $0x30] sm:$0xf] }
 0x2da   :  { %v2354_v55 = vrot.slane %v2352_v0, 7  ;;  %v8376_v46 = vrot.slane %v2960_v33, 4  ;;  %v8378_v8 = vrot.slane %v2988_v51, 4  ;;  %v3002_v59 = vor.u32 %v8345_v18, %v8327_v10  ;;  %v2570_v33 = vld [vmem:[#allocation2 + $0x24] sm:$0x1]  ;;  %v6778_v11 = vld [vmem:[%s9974_s2 + $0x78] sm:$0xff]  }
 0x2db   :  { %v8382_v28 = vrot.slane %v3013_v56, 5  ;;  %v8384_v39 = vrot.slane %v3024_v31, 4  ;;  %3808 = vrot.lane.b32.xlu0 %v6091_v4, %s6926_s29  ;;  %v2637_v23 = vsel %vm7023_vm2, %v2632_v43, %v2636_v40  ;;  %v2360_v22 = vshrl.u32 %v6231_v34, 16  ;;  %v2571_v56 = vld [vmem:[#allocation2 + $0x2c] sm:$0x1]  ;;  %6330 = vmatprep.subr.bf16.mxu1 %v6778_v11 }
 0x2dc   :  { %v2357_v24 = vor.u32 %v2355_v50, %v2354_v55  ;;  %v8389_v51 = vrot.slane %v3027_v52, 5  ;;  %v6073_v57 = vcombine.low %v2623_v37, %v2637_v23  ;;  %v2358_v38 = vrot.slane %v2354_v55, 4  ;;  %v6779_v52 = vld [vmem:[%s9974_s2 + $0xf8] sm:$0xff]   ;;  %v2508_v30 = vld [vmem:[#allocation2 + $0x60] sm:$0xf] }
 0x2dd   :  { %v2363_v20 = vshll.u32 %v6231_v34, 16  ;;  %v2362_v42 = vrot.slane %v2360_v22, 7  ;;  %v2641_v25 = vrot.slane %v2639_v6, 4  ;;  %v2644_v35 = vrot.slane %v2642_v32, 5  ;;  %v2557_v6 = vld [vmem:[#allocation2 + $0x38] sm:$0xf]  ;;  %6394 = vmatprep.subr.bf16.mxu0 %v6779_v52 }
 0x2de   :  { %v2503_v31 = vsel %vm8229_vm12, %v2357_v24, %v2502_v41  ;;  %v3016_v19 = vor.u32 %v8382_v28, %v8352_v12  ;;  %v3038_v58 = vshrl.u32 %v8363_v7, 16  ;;  %3724 = vrot.lane.b32.xlu1 %v6073_v57, %s6926_s29  ;;  %v2648_v27 = vshll.u32 %v2570_v33, 16  ;;  %v2572_v43 = vld [vmem:[#allocation2 + $0x34] sm:$0x1]  ;;  %v6780_v41 = vld [vmem:[%s9974_s2 + $0x38] sm:$0xff]  }
 0x2df   :  { %2504 = vst [vmem:[#allocation2 + $0x58] sm:$0xf] %v2503_v31  ;;  %v2653_v34 = vshrl.u32 %v2555_v15, 16  ;;  %v2365_v0 = vor.u32 %v2363_v20, %v2362_v42  ;;  %v2366_v49 = vrot.slane %v2362_v42, 4  ;;  %v2645_v40 = vor.u32 %v2644_v35, %v2641_v25  ;;  %v6781_v57 = vld [vmem:[%s9974_s2 + $0xb8] sm:$0xff]   ;;  %6331 = vmatpush3.bf16.msra.mxu1 %v6780_v41 }
 0x2e0   :  { %v2656_v50 = vshll.u32 %v2555_v15, 16  ;;  %v2662_v4 = vshll.u32 %v2571_v56, 16  ;;  %v2506_v37 = vsel %vm8235_vm13, %v2358_v38, %v2505_v1  ;;  %v2667_v55 = vshrl.u32 %v2556_v9, 16  ;;  %v2573_v15 = vld [vmem:[#allocation2 + $0x3c] sm:$0x1]  ;;  %6395 = vmatpush3.bf16.msra.mxu0 %v6781_v57 }
 0x2e1   :  { %v2655_v32 = vrot.slane %v2653_v34, 4  ;;  %v2509_v23 = vsel %vm8229_vm12, %v2365_v0, %v2508_v30  ;;  %v2646_v24 = vrot.slane %v2645_v40, 4  ;;  %2507 = vst [vmem:[#allocation2 + $0x5c] sm:$0x1] %v2506_v37  ;;  %v2670_v33 = vshll.u32 %v2556_v9, 16 }
 0x2e2   :  { %v2658_v22 = vrot.slane %v2656_v50, 5  ;;  %v3041_v1 = vshll.u32 %v8363_v7, 16  ;;  %2510 = vst [vmem:[#allocation2 + $0x60] sm:$0xf] %v2509_v23  ;;  %v2650_v38 = vrot.slane %v2648_v27, 5  ;;  %v2669_v20 = vrot.slane %v2667_v55, 4 }
 0x2e3   :  { %v2681_v56 = vshrl.u32 %v2557_v6, 16  ;;  %v2511_v11 = vld [vmem:[#allocation2 + $0x64] sm:$0x1]  ;;  %v2672_v31 = vrot.slane %v2670_v33, 5  ;;  %v2676_v25 = vshll.u32 %v2572_v43, 16  ;;  %v2684_v35 = vshll.u32 %v2557_v6, 16 }
 0x2e4   :  { %v2659_v42 = vor.u32 %v2658_v22, %v2655_v32  ;;  %v2651_v9 = vsel %vm7023_vm2, %v2646_v24, %v2650_v38  ;;  %v2664_v52 = vrot.slane %v2662_v4, 5  ;;  %v2690_v34 = vshll.u32 %v2573_v15, 16 }
 0x2e5   :  { %v2683_v30 = vrot.slane %v2681_v56, 4  ;;  %v2673_v50 = vor.u32 %v2672_v31, %v2669_v20  ;;  %v2686_v37 = vrot.slane %v2684_v35, 5  ;;  %v2512_v27 = vsel %vm8235_vm13, %v2366_v49, %v2511_v11 }
 0x2e6   :  { %v2660_v0 = vrot.slane %v2659_v42, 4  ;;  %v2559_v40 = vld [vmem:[#allocation2 + $0x58] sm:$0xf]  ;;  %v3052_v55 = vshrl.u32 %v8365_v47, 16  ;;  %v3055_v32 = vshll.u32 %v8365_v47, 16  ;;  %v2678_v24 = vrot.slane %v2676_v25, 5 }
 0x2e7   :  { %v2709_v43 = vshrl.u32 %v2559_v40, 16  ;;  %v2712_v6 = vshll.u32 %v2559_v40, 16  ;;  %2513 = vst [vmem:[#allocation2 + $0x64] sm:$0x1] %v2512_v27  ;;  %v8420_v41 = vld [vmem:[#allocation2 + $0x58] sm:$0xf]  ;;  %v2687_v22 = vor.u32 %v2686_v37, %v2683_v30 }
 0x2e8   :  { %v2665_v4 = vsel %vm7023_vm2, %v2660_v0, %v2664_v52  ;;  %v2674_v23 = vrot.slane %v2673_v50, 4  ;;  %v2575_v33 = vld [vmem:[#allocation2 + $0x5c] sm:$0x1]  ;;  %v2692_v38 = vrot.slane %v2690_v34, 5  ;;  %v2175_v49 = vmax.f32 %v8314_v26, 0.0  ;;  %v6782_v47 = vld [vmem:[%s9974_s2 + $0x70] sm:$0xff]  }
 0x2e9   :  { %v6074_v15 = vcombine.low %v2651_v9, %v2665_v4  ;;  %v2711_v57 = vrot.slane %v2709_v43, 4  ;;  %v8428_v20 = vld [vmem:[#allocation2 + $0x60] sm:$0xf]  ;;  %v2714_v56 = vrot.slane %v2712_v6, 5  ;;  %v2718_v11 = vshll.u32 %v2575_v33, 16  ;;  %v6783_v25 = vld [vmem:[%s9974_s2 + $0x30] sm:$0xff]   ;;  %6332 = vmatprep.subr.bf16.mxu1 %v6782_v47 }
 0x2ea   :  { %v2679_v42 = vsel %vm7023_vm2, %v2674_v23, %v2678_v24  ;;  %v2688_v31 = vrot.slane %v2687_v22, 4  ;;  %v8437_v35 = vrot.slane %v3038_v58, 4  ;;  %v8439_v26 = vrot.slane %v3041_v1, 5  ;;  %v3290_v30 = vld [vmem:[#allocation2 + $0x10] sm:$0xf]  ;;  %6333 = vmatpush3.bf16.msra.mxu1 %v6783_v25 }
 0x2eb   :  { %v8441_v9 = vrot.slane %v3052_v55, 4  ;;  %v6092_v52 = vcombine.low %v8420_v41, %v8428_v20  ;;  %3726 = vrot.lane.b32.xlu1 %v6074_v15, %s6926_s29  ;;  %v8446_v34 = vrot.slane %v3055_v32, 5  ;;  %v2715_v0 = vor.u32 %v2714_v56, %v2711_v57  ;;  %v3291_v58 = vld [vmem:[#allocation2 + $0x18] sm:$0xf]  ;;  %v6784_v55 = vld [vmem:[%s9974_s2 + $0x68] sm:$0xff]   ;;  %v6785_v23 = vld [vmem:[%s9974_s2 + $0xf0] sm:$0xff]  }
 0x2ec   :  { %v2693_v40 = vsel %vm7023_vm2, %v2688_v31, %v2692_v38  ;;  %v2176_v7 = vmax.f32 %v8317_v2, 0.0  ;;  %v8454_v1 = vrot.slane %v3002_v59, 4  ;;  %v3030_v50 = vor.u32 %v8389_v51, %v8384_v39  ;;  %6334 = vmatprep.subr.bf16.mxu1 %v6784_v55  ;;  %v8477_v22 = vld [vmem:[#allocation2 + $0x14] sm:$0x1]  ;;  %v6786_v15 = vld [vmem:[%s9974_s2 + $0x28] sm:$0xff]   ;;  %6396 = vmatprep.subr.bf16.mxu0 %v6785_v23 }
 0x2ed   :  { %3810 = vrot.lane.b32.xlu0 %v6092_v52, %s6926_s29  ;;  %v2720_v37 = vrot.slane %v2718_v11, 5  ;;  %v6075_v27 = vcombine.low %v2679_v42, %v2693_v40  ;;  %v2716_v32 = vrot.slane %v2715_v0, 4  ;;  %v6232_v2 = vpack.c.bf16 %v2175_v49, %v2175_v49  ;;  %10016 = vst [vmem:[#allocation8_spill] sm:$0xff] %v8477_v22  ;;  %v2514_v49 = vld [vmem:[#allocation2 + $0x68] sm:$0xf]  ;;  %v6787_v31 = vld [vmem:[%s9974_s2 + $0xb0] sm:$0xff]  }
 0x2ee   :  { %v6233_v43 = vpack.c.bf16 %v2176_v7, %v2176_v7  ;;  %v3323_v6 = vshrl.u32 %v3290_v30, 16  ;;  %v8465_v10 = vrot.slane %v3016_v19, 4  ;;  %v3044_v18 = vor.u32 %v8439_v26, %v8437_v35  ;;  %v2520_v47 = vld [vmem:[#allocation2 + $0x70] sm:$0xf]  ;;  %v8488_v56 = vld [vmem:[#allocation2 + $0x1c] sm:$0x1]  ;;  %6335 = vmatpush3.bf16.msra.mxu1 %v6786_v15  ;;  %6397 = vmatpush3.bf16.msra.mxu0 %v6787_v31 }
 0x2ef   :  { %3728 = vrot.lane.b32.xlu1 %v6075_v27, %s6926_s29  ;;  %v3326_v59 = vshll.u32 %v3290_v30, 16  ;;  %v3337_v4 = vshrl.u32 %v3291_v58, 16  ;;  %v3058_v24 = vor.u32 %v8446_v34, %v8441_v9  ;;  %v2721_v12 = vsel %vm7023_vm2, %v2716_v32, %v2720_v37  ;;  %10017 = vst [vmem:[#allocation9_spill] sm:$0xff] %v8488_v56  ;;  %v2517_v42 = vld [vmem:[#allocation2 + $0x6c] sm:$0x1]  ;;  %v6788_v37 = vld [vmem:[%s9974_s2 + $0x60] sm:$0xff]  }
 0x2f0   :  { %v2368_v28 = vshrl.u32 %v6232_v2, 16  ;;  %v2376_v19 = vshrl.u32 %v6233_v43, 16  ;;  %v3066_v33 = vshrl.u32 %v8420_v41, 16  ;;  %v6076_v57 = vcombine.low %v2707_v60, %v2721_v12  ;;  %v2560_v40 = vld [vmem:[#allocation2 + $0x60] sm:$0xf]  ;;  %6336 = vmatprep.subr.bf16.mxu1 %v6788_v37 }
 0x2f1   :  { %v2371_v38 = vshll.u32 %v6232_v2, 16  ;;  %v3325_v11 = vrot.slane %v3323_v6, 4  ;;  %v2379_v30 = vshll.u32 %v6233_v43, 16  ;;  %v3328_v0 = vrot.slane %v3326_v59, 5  ;;  %v6789_v27 = vld [vmem:[%s9974_s2 + $0x20] sm:$0xff]   ;;  %v6790_v43 = vld [vmem:[%s9974_s2 + $0x58] sm:$0xff]  }
 0x2f2   :  { %v2370_v25 = vrot.slane %v2368_v28, 7  ;;  %v8493_v52 = vrot.slane %v2376_v19, 7  ;;  %v3069_v63 = vshll.u32 %v8420_v41, 16  ;;  %3730 = vrot.lane.b32.xlu0 %v6076_v57, %s6926_s29  ;;  %v3332_v36 = vshll.u32 %v8477_v22, 16  ;;  %v8515_v12 = vld [vmem:[#allocation2 + $0xc] sm:$0x1]  ;;  %6337 = vmatpush3.bf16.msra.mxu1 %v6789_v27 }
 0x2f3   :  { %v3339_v60 = vrot.slane %v3337_v4, 4  ;;  %v3340_v7 = vshll.u32 %v3291_v58, 16  ;;  %v3346_v41 = vshll.u32 %v8488_v56, 16  ;;  %v6791_v58 = vld [vmem:[%s9974_s2 + $0xe8] sm:$0xff]   ;;  %v3080_v6 = vshrl.u32 %v8428_v20, 16  ;;  %6338 = vmatprep.subr.bf16.mxu1 %v6790_v43  ;;  %v6799_v37 = vld [vmem:[%s9974_s2 + $0xa0] sm:$0xff]  }
 0x2f4   :  { %v2373_v55 = vor.u32 %v2371_v38, %v2370_v25  ;;  %v2374_v32 = vrot.slane %v2370_v25, 4  ;;  %v2381_v2 = vor.u32 %v2379_v30, %v8493_v52  ;;  %v8513_v59 = vrot.slane %v3066_v33, 4  ;;  %v8517_v28 = vld [vmem:[#allocation2 + $0x14] sm:$0x1]  ;;  %v6793_v19 = vld [vmem:[%s9974_s2 + $0xa8] sm:$0xff]   ;;  %6398 = vmatprep.subr.bf16.mxu0 %v6791_v58  ;;  %v6792_v25 = vld [vmem:[%s9974_s2 + $0x18] sm:$0xff]  }
 0x2f5   :  { %v3329_v4 = vor.u32 %v3328_v0, %v3325_v11  ;;  %v3342_v23 = vrot.slane %v3340_v7, 5  ;;  %v2723_v38 = vshrl.u32 %v2560_v40, 16  ;;  %v3177_v11 = vld [vmem:[#allocation2 + $0x8] sm:$0xe]  ;;  %v3178_v31 = vld [vmem:[#allocation2 + $0x10] sm:$0xe]  ;;  %6399 = vmatpush3.bf16.msra.mxu0 %v6793_v19 }
 0x2f6   :  { %v2515_v15 = vsel %vm8229_vm12, %v2373_v55, %v2514_v49  ;;  %v2521_v57 = vsel %vm8229_vm12, %v2381_v2, %v2520_v47  ;;  %v2518_v33 = vsel %vm8235_vm13, %v2374_v32, %v2517_v42  ;;  %v3334_v0 = vrot.slane %v3332_v36, 5  ;;  %v6794_v47 = vld [vmem:[%s9974_s2 + $0x50] sm:$0xff]   ;;  %v6797_v42 = vld [vmem:[%s9974_s2 + $0xe0] sm:$0xff]   ;;  %6339 = vmatpush3.bf16.msra.mxu1 %v6792_v25 }
 0x2f7   :  { %2516 = vst [vmem:[#allocation2 + $0x68] sm:$0xf] %v2515_v15  ;;  %2522 = vst [vmem:[#allocation2 + $0x70] sm:$0xf] %v2521_v57  ;;  %v3330_v30 = vrot.slane %v3329_v4, 4  ;;  %v3343_v49 = vor.u32 %v3342_v23, %v3339_v60  ;;  %v2726_v7 = vshll.u32 %v2560_v40, 16  ;;  %6400 = vmatprep.subr.bf16.mxu0 %v6797_v42  ;;  %v2161_v15 = vadd.f32 %v8270_v62, %v8325_v17 }
 0x2f8   :  { %2519 = vst [vmem:[#allocation2 + $0x6c] sm:$0x1] %v2518_v33  ;;  %v3083_v27 = vshll.u32 %v8428_v20, 16  ;;  %v2382_v36 = vrot.slane %v8493_v52, 4  ;;  %v3348_v60 = vrot.slane %v3346_v41, 5  ;;  %v2725_v40 = vrot.slane %v2723_v38, 4  ;;  %6340 = vmatprep.subr.bf16.mxu1 %v6794_v47 }
 0x2f9   :  { %v3335_v55 = vsel %vm7023_vm2, %v3330_v30, %v3334_v0  ;;  %v3344_v32 = vrot.slane %v3343_v49, 4  ;;  %v2728_v2 = vrot.slane %v2726_v7, 5  ;;  %v6032_v43 = vrot.slane %v3177_v11, 9  ;;  %v2523_v58 = vld [vmem:[#allocation2 + $0x74] sm:$0x1]  ;;  %v6802_v4 = vld [vmem:[%s9974_s2 + $0xd8] sm:$0xff]   ;;  %6401 = vmatpush3.bf16.msra.mxu0 %v6799_v37 }
 0x2fa   :  { %v2576_v23 = vld [vmem:[#allocation2 + $0x64] sm:$0x1]  ;;  %v3227_v52 = vrot.slane %v8515_v12, 5  ;;  %v6033_v41 = vrot.slane %v3178_v31, 9  ;;  %v3231_v19 = vrot.slane %v8517_v28, 5  ;;  %v8557_v57 = vrot.slane %v3069_v63, 5  ;;  %6402 = vmatprep.subr.bf16.mxu0 %v6802_v4 }
 0x2fb   :  { %v3349_v33 = vsel %vm7023_vm2, %v3344_v32, %v3348_v60  ;;  %v2729_v38 = vor.u32 %v2728_v2, %v2725_v40  ;;  %v2162_v11 = vadd.f32 %v8270_v62, %v8333_v61  ;;  %v8563_v30 = vld [vmem:[#allocation2 + $0x20] sm:$0xf]  ;;  %v6795_v31 = vld [vmem:[%s9974_s2 + $0x10] sm:$0xff]   ;;  %v6804_v17 = vld [vmem:[%s9974_s2 + $0x98] sm:$0xff]   ;;  %v8571_v63 = vrot.slane %v3080_v6, 4 }
 0x2fc   :  { %v8573_v25 = vrot.slane %v3083_v27, 5  ;;  %v6120_v0 = vcombine.low %v3335_v55, %v3349_v33  ;;  %v2177_v49 = vmax.f32 %v2161_v15, 0.0  ;;  %v6796_v61 = vld [vmem:[%s9974_s2 + $0x48] sm:$0xff]   ;;  %v6805_v7 = vld [vmem:[%s9974_s2 + $0xd0] sm:$0xff]   ;;  %v2732_v47 = vshll.u32 %v2576_v23, 16  ;;  %6341 = vmatpush3.bf16.msra.mxu1 %v6795_v31  ;;  %v6800_v15 = vld [vmem:[%s9974_s2 + $0x40] sm:$0xff]  }
 0x2fd   :  { %v3228_v42 = vsel %vm8549_vm0, %v6032_v43, %v3227_v52  ;;  %v3232_v6 = vsel %vm8549_vm0, %v6033_v41, %v3231_v19  ;;  %v2178_v37 = vmax.f32 %v2162_v11, 0.0  ;;  %v2524_v55 = vsel %vm8235_vm13, %v2382_v36, %v2523_v58  ;;  %v6798_v23 = vld [vmem:[%s9974_s2 + $0x8] sm:$0xff]   ;;  %6403 = vmatpush3.bf16.msra.mxu0 %v6804_v17  ;;  %v6807_v52 = vld [vmem:[%s9974_s2 + $0x90] sm:$0xff]   ;;  %6342 = vmatprep.subr.bf16.mxu1 %v6796_v61  ;;  %v6801_v34 = vld [vmem:[%s9974_s2] sm:$0xff]  }
 0x2fe   :  { %v8585_v27 = vld [vmem:[#allocation2 + $0x68] sm:$0xf]  ;;  %v8587_v60 = vld [vmem:[#allocation2 + $0x70] sm:$0xf]  ;;  %3946 = vrot.lane.b32.xlu1 %v6120_v0, %s6926_s29  ;;  %v8592_v2 = vrot.slane %v2729_v38, 4  ;;  %v6234_v4 = vpack.c.bf16 %v2177_v49, %v2177_v49  ;;  %v3351_v43 = vshrl.u32 %v8563_v30, 16  ;;  %v6104_v19 = vcombine.low %v3228_v42, %v3232_v6  ;;  %6404 = vmatprep.subr.bf16.mxu0 %v6805_v7 }
 0x2ff   :  { %v2561_v40 = vld [vmem:[#allocation2 + $0x68] sm:$0xf]  ;;  %v2577_v32 = vld [vmem:[#allocation2 + $0x6c] sm:$0x1]  ;;  %2525 = vst [vmem:[#allocation2 + $0x74] sm:$0x1] %v2524_v55  ;;  %v6093_v36 = vcombine.low %v8585_v27, %v8587_v60  ;;  %v6235_v39 = vpack.c.bf16 %v2178_v37, %v2178_v37  ;;  %v3086_v51 = vor.u32 %v8573_v25, %v8571_v63  ;;  %v3072_v35 = vor.u32 %v8557_v57, %v8513_v59 }
 0x300   :  { %v2737_v58 = vshrl.u32 %v2561_v40, 16  ;;  %v2740_v41 = vshll.u32 %v2561_v40, 16  ;;  %v6808_v33 = vld [vmem:[%s9974_s2 + $0xc8] sm:$0xff]   ;;  %v8612_v38 = vrot.slane %v3030_v50, 4  ;;  %v8617_v11 = vrot.slane %v3044_v18, 4  ;;  %6343 = vmatpush3.bf16.msra.mxu1 %v6798_v23  ;;  %v8643_v7 = vld [vmem:[%s9974_s2 + $0x118] sm:$0xff]  }
 0x301   :  { %v8622_v31 = vrot.slane %v3058_v24, 4  ;;  %v2734_v17 = vrot.slane %v2732_v47, 5  ;;  %3812 = vrot.lane.b32.xlu0 %v6093_v36, %s6926_s29  ;;  %v2746_v61 = vshll.u32 %v2577_v32, 16  ;;  %v2384_v26 = vshrl.u32 %v6234_v4, 16  ;;  %v3293_v50 = vld [vmem:[#allocation2 + $0x28] sm:$0xf]  ;;  %6405 = vmatpush3.bf16.msra.mxu0 %v6807_v52 }
 0x302   :  { %10020 = vst [vmem:[#allocation10_spill] sm:$0xff] %v8617_v11  ;;  %v2739_v0 = vrot.slane %v2737_v58, 4  ;;  %v2742_v49 = vrot.slane %v2740_v41, 5  ;;  %3866 = vrot.lane.b32.xlu1 %v6104_v19, %s6926_s29  ;;  %v3353_v9 = vrot.slane %v3351_v43, 4  ;;  %v6809_v18 = vld [vmem:[%s9974_s2 + $0x88] sm:$0xff]   ;;  %v3094_v24 = vshrl.u32 %v8585_v27, 16  ;;  %6344 = vmatprep.subr.bf16.mxu1 %v6800_v15 }
 0x303   :  { %10021 = vst [vmem:[#allocation11_spill] sm:$0xff] %v8622_v31  ;;  %v2735_v63 = vsel %vm7023_vm2, %v8592_v2, %v2734_v17  ;;  %v2392_v57 = vshrl.u32 %v6235_v39, 16  ;;  %v2526_v25 = vld [vmem:[#allocation2 + $0x78] sm:$0xf]  ;;  %6406 = vmatprep.subr.bf16.mxu0 %v6808_v33  ;;  %v6812_v47 = vld [vmem:[%s9974_s2 + $0xc0] sm:$0xff]   ;;  %v2748_v42 = vrot.slane %v2746_v61, 5 }
 0x304   :  { %v2743_v59 = vor.u32 %v2742_v49, %v2739_v0  ;;  %v2386_v6 = vrot.slane %v2384_v26, 7  ;;  %v2387_v37 = vshll.u32 %v6234_v4, 16  ;;  %v8648_v40 = vld [vmem:[#allocation2 + $0x24] sm:$0x1]  ;;  %v3354_v55 = vshll.u32 %v8563_v30, 16  ;;  %6345 = vmatpush3.bf16.msra.mxu1 %v6801_v34 }
 0x305   :  { %v8651_v2 = vrot.slane %v2392_v57, 7  ;;  %v2395_v43 = vshll.u32 %v6235_v39, 16  ;;  %v2532_v23 = vld [vmem:[#allocation2 + $0x80] sm:$0xf]  ;;  %v3365_v52 = vshrl.u32 %v3293_v50, 16  ;;  %v3097_v36 = vshll.u32 %v8585_v27, 16  ;;  %6407 = vmatpush3.bf16.msra.mxu0 %v6809_v18  ;;  %6574 = vmatprep.subr.bf16.mxu1 %v8643_v7 }
 0x306   :  { %v2744_v32 = vrot.slane %v2743_v59, 4  ;;  %v2389_v58 = vor.u32 %v2387_v37, %v2386_v6  ;;  %v8654_v41 = vld [vmem:[#allocation2 + $0x2c] sm:$0x1]  ;;  %v3356_v19 = vrot.slane %v3354_v55, 5  ;;  %v3368_v15 = vshll.u32 %v3293_v50, 16  ;;  %v6814_v4 = vld [vmem:[%s9974_s2 + $0x80] sm:$0xff]   ;;  %6408 = vmatprep.subr.bf16.mxu0 %v6812_v47 }
 0x307   :  { %v2390_v33 = vrot.slane %v2386_v6, 4  ;;  %v2397_v17 = vor.u32 %v2395_v43, %v8651_v2  ;;  %v3360_v0 = vshll.u32 %v8648_v40, 16  ;;  %v3367_v39 = vrot.slane %v3365_v52, 4  ;;  %v2529_v26 = vld [vmem:[#allocation2 + $0x7c] sm:$0x1] }
 0x308   :  { %v2749_v30 = vsel %vm7023_vm2, %v2744_v32, %v2748_v42  ;;  %v2527_v49 = vsel %vm8229_vm12, %v2389_v58, %v2526_v25  ;;  %v3357_v61 = vor.u32 %v3356_v19, %v3353_v9  ;;  %v2562_v50 = vld [vmem:[#allocation2 + $0x70] sm:$0xf]  ;;  %v8666_v34 = vrot.slane %v3072_v35, 4  ;;  %v8678_v55 = vld [vmem:[#allocation2 + $0x1c] sm:$0x1] }
 0x309   :  { %v6077_v27 = vcombine.low %v2735_v63, %v2749_v30  ;;  %2528 = vst [vmem:[#allocation2 + $0x78] sm:$0xf] %v2527_v49  ;;  %v2533_v18 = vsel %vm8229_vm12, %v2397_v17, %v2532_v23  ;;  %v3370_v59 = vrot.slane %v3368_v15, 5  ;;  %v3374_v57 = vshll.u32 %v8654_v41, 16  ;;  %6409 = vmatpush3.bf16.msra.mxu0 %v6814_v4  ;;  %v8682_v23 = vld [vmem:[#allocation2 + $0x24] sm:$0x1] }
 0x30a   :  { %10022 = vst [vmem:[#allocation12_spill] sm:$0xff] %v8666_v34  ;;  %v8671_v42 = vrot.slane %v3086_v51, 4  ;;  %v3108_v63 = vshrl.u32 %v8587_v60, 16  ;;  %v3111_v47 = vshll.u32 %v8587_v60, 16  ;;  %2534 = vst [vmem:[#allocation2 + $0x80] sm:$0xf] %v2533_v18  ;;  %v2530_v6 = vsel %vm8235_vm13, %v2390_v33, %v2529_v26  ;;  %6598 = vmatprep.subr.mxu0 %v9979_v44 }
 0x30b   :  { %3732 = vrot.lane.b32.xlu0 %v6077_v27, %s6926_s29  ;;  %v3358_v9 = vrot.slane %v3357_v61, 4  ;;  %v3362_v35 = vrot.slane %v3360_v0, 5  ;;  %v3371_v25 = vor.u32 %v3370_v59, %v3367_v39  ;;  %v2751_v37 = vshrl.u32 %v2562_v50, 16  ;;  %2531 = vst [vmem:[#allocation2 + $0x7c] sm:$0x1] %v2530_v6 }
 0x30c   :  { %10023 = vst [vmem:[#allocation13_spill] sm:$0xff] %v8671_v42  ;;  %v3096_v51 = vrot.slane %v3094_v24, 4  ;;  %v3099_v32 = vrot.slane %v3097_v36, 5  ;;  %v2754_v60 = vshll.u32 %v2562_v50, 16  ;;  %v3179_v52 = vld [vmem:[#allocation2 + $0x18] sm:$0xe]  ;;  %v2114_v39 = vmul.f32 %v8251_v21, %v8081_v48 }
 0x30d   :  { %v3363_v58 = vsel %vm7023_vm2, %v3358_v9, %v3362_v35  ;;  %v3372_v19 = vrot.slane %v3371_v25, 4  ;;  %v3376_v15 = vrot.slane %v3374_v57, 5  ;;  %v2578_v4 = vld [vmem:[#allocation2 + $0x74] sm:$0x1]  ;;  %v2753_v30 = vrot.slane %v2751_v37, 4 }
 0x30e   :  { %v3110_v33 = vrot.slane %v3108_v63, 4  ;;  %v3113_v17 = vrot.slane %v3111_v47, 5  ;;  %v2756_v24 = vrot.slane %v2754_v60, 5  ;;  %v3180_v36 = vld [vmem:[#allocation2 + $0x20] sm:$0xe]  ;;  %v6034_v49 = vrot.slane %v3179_v52, 9 }
 0x30f   :  { %v3377_v27 = vsel %vm7023_vm2, %v3372_v19, %v3376_v15  ;;  %v3235_v61 = vrot.slane %v8678_v55, 5  ;;  %v3100_v26 = vor.u32 %v3099_v32, %v3096_v51  ;;  %v2760_v63 = vshll.u32 %v2578_v4, 16  ;;  %v8737_v44 = vld [vmem:[#allocation2 + $0x2c] sm:$0x1]  ;;  %v8928_v34 = vld [vmem:[#allocation2 + $0x74] sm:$0x1] }
 0x310   :  { %v8692_v50 = vld [vmem:[#allocation2 + $0x78] sm:$0xf]  ;;  %v6121_v18 = vcombine.low %v3363_v58, %v3377_v27  ;;  %v2757_v57 = vor.u32 %v2756_v24, %v2753_v30  ;;  %v6035_v25 = vrot.slane %v3180_v36, 9  ;;  %v3239_v6 = vrot.slane %v8682_v23, 5  ;;  %v3294_v24 = vld [vmem:[#allocation2 + $0x30] sm:$0xf] }
 0x311   :  { %v2563_v59 = vld [vmem:[#allocation2 + $0x78] sm:$0xf]  ;;  %v8694_v47 = vld [vmem:[#allocation2 + $0x80] sm:$0xf]  ;;  %v3114_v37 = vor.u32 %v3113_v17, %v3110_v33  ;;  %v2163_v51 = vadd.f32 %v8270_v62, %v2114_v39  ;;  %v3236_v19 = vsel %vm8549_vm0, %v6034_v49, %v3235_v61  ;;  %v2115_v15 = vmul.f32 %v8251_v21, %v8094_v3  ;;  %v2811_v11 = vld [vmem:[#allocation2 + $0x28] sm:$0xe] }
 0x312   :  { %v2765_v9 = vshrl.u32 %v2563_v59, 16  ;;  %v2768_v35 = vshll.u32 %v2563_v59, 16  ;;  %v6094_v60 = vcombine.low %v8692_v50, %v8694_v47  ;;  %3948 = vrot.lane.b32.xlu1 %v6121_v18, %s6926_s29  ;;  %v2758_v48 = vrot.slane %v2757_v57, 4  ;;  %v2579_v32 = vld [vmem:[#allocation2 + $0x7c] sm:$0x1] }
 0x313   :  { %v2762_v33 = vrot.slane %v2760_v63, 5  ;;  %v2774_v17 = vshll.u32 %v2579_v32, 16  ;;  %v8708_v36 = vrot.slane %v3100_v26, 4  ;;  %v8710_v27 = vld [vmem:[#allocation2 + $0x20] sm:$0xe]  ;;  %v3240_v49 = vsel %vm8549_vm0, %v6035_v25, %v3239_v6 }
 0x314   :  { %v2767_v52 = vrot.slane %v2765_v9, 4  ;;  %v2770_v58 = vrot.slane %v2768_v35, 5  ;;  %3814 = vrot.lane.b32.xlu0 %v6094_v60, %s6926_s29  ;;  %v2164_v61 = vadd.f32 %v8270_v62, %v2115_v15  ;;  %v8715_v3 = vrot.slane %v3114_v37, 4  ;;  %v3295_v57 = vld [vmem:[#allocation2 + $0x38] sm:$0xf] }
 0x315   :  { %10024 = vst [vmem:[#allocation14_spill] sm:$0xff] %v8708_v36  ;;  %v2763_v21 = vsel %vm7023_vm2, %v2758_v48, %v2762_v33  ;;  %v6105_v18 = vcombine.low %v3236_v19, %v3240_v49  ;;  %v2179_v59 = vmax.f32 %v2163_v51, 0.0  ;;  %v2776_v9 = vrot.slane %v2774_v17, 5  ;;  %v8722_v62 = vld [vmem:[#allocation2 + $0x34] sm:$0x1] }
 0x316   :  { %v2771_v39 = vor.u32 %v2770_v58, %v2767_v52  ;;  %10025 = vst [vmem:[#allocation15_spill] sm:$0xff] %v8715_v3  ;;  %v2180_v26 = vmax.f32 %v2164_v61, 0.0  ;;  %v3379_v35 = vshrl.u32 %v3294_v24, 16  ;;  %v2398_v60 = vrot.slane %v8651_v2, 4  ;;  %10026 = vst [vmem:[#allocation16_spill] sm:$0xff] %v8722_v62 }
 0x317   :  { %3868 = vrot.lane.b32.xlu1 %v6105_v18, %s6926_s29  ;;  %v6236_v25 = vpack.c.bf16 %v2179_v59, %v2179_v59  ;;  %v3382_v6 = vshll.u32 %v3294_v24, 16  ;;  %v3393_v52 = vshrl.u32 %v3295_v57, 16  ;;  %v2535_v58 = vld [vmem:[#allocation2 + $0x84] sm:$0x1]  ;;  %v8727_v2 = vld [vmem:[#allocation2 + $0x3c] sm:$0x1] }
 0x318   :  { %v2772_v63 = vrot.slane %v2771_v39, 4  ;;  %v6237_v48 = vpack.c.bf16 %v2180_v26, %v2180_v26  ;;  %v3381_v51 = vrot.slane %v3379_v35, 4  ;;  %10027 = vst [vmem:[#allocation17_spill] sm:$0xff] %v8727_v2  ;;  %v2538_v18 = vld [vmem:[#allocation2 + $0x88] sm:$0xf]  ;;  %v3388_v24 = vshll.u32 %v8722_v62, 16 }
 0x319   :  { %v2400_v33 = vshrl.u32 %v6236_v25, 16  ;;  %v3384_v17 = vrot.slane %v3382_v6, 5  ;;  %v2403_v49 = vshll.u32 %v6236_v25, 16  ;;  %v2541_v59 = vld [vmem:[#allocation2 + $0x8c] sm:$0x1]  ;;  %v3395_v35 = vrot.slane %v3393_v52, 4 }
 0x31a   :  { %v2777_v37 = vsel %vm7023_vm2, %v2772_v63, %v2776_v9  ;;  %v2408_v61 = vshrl.u32 %v6237_v48, 16  ;;  %v2544_v9 = vld [vmem:[#allocation2 + $0x90] sm:$0xf]  ;;  %v3396_v0 = vshll.u32 %v3295_v57, 16  ;;  %v2411_v43 = vshll.u32 %v6237_v48, 16 }
 0x31b   :  { %v6078_v15 = vcombine.low %v2763_v21, %v2777_v37  ;;  %v2402_v63 = vrot.slane %v2400_v33, 7  ;;  %v3385_v26 = vor.u32 %v3384_v17, %v3381_v51  ;;  %v2564_v21 = vld [vmem:[#allocation2 + $0x80] sm:$0xf]  ;;  %v3402_v6 = vshll.u32 %v8727_v2, 16  ;;  %v8739_v33 = vld [vmem:[#allocation2 + $0x34] sm:$0x1] }
 0x31c   :  { %v8732_v37 = vrot.slane %v2408_v61, 7  ;;  %v2536_v25 = vsel %vm8235_vm13, %v2398_v60, %v2535_v58  ;;  %v3125_v57 = vshll.u32 %v8692_v50, 16  ;;  %v3390_v52 = vrot.slane %v3388_v24, 5  ;;  %v3181_v17 = vld [vmem:[#allocation2 + $0x28] sm:$0xe] }
 0x31d   :  { %3734 = vrot.lane.b32.xlu0 %v6078_v15, %s6926_s29  ;;  %v2405_v30 = vor.u32 %v2403_v49, %v2402_v63  ;;  %v2406_v4 = vrot.slane %v2402_v63, 4  ;;  %v3386_v54 = vrot.slane %v3385_v26, 4  ;;  %v3398_v15 = vrot.slane %v3396_v0, 5  ;;  %2537 = vst [vmem:[#allocation2 + $0x84] sm:$0x1] %v2536_v25 }
 0x31e   :  { %v2413_v51 = vor.u32 %v2411_v43, %v8732_v37  ;;  %v2779_v48 = vshrl.u32 %v2564_v21, 16  ;;  %v3136_v61 = vshrl.u32 %v8694_v47, 16  ;;  %v3182_v0 = vld [vmem:[#allocation2 + $0x30] sm:$0xe]  ;;  %v3298_v63 = vld [vmem:[#allocation2 + $0x60] sm:$0xf] }
 0x31f   :  { %v2539_v60 = vsel %vm8229_vm12, %v2405_v30, %v2538_v18  ;;  %v3399_v58 = vor.u32 %v3398_v15, %v3395_v35  ;;  %v2542_v49 = vsel %vm8235_vm13, %v2406_v4, %v2541_v59  ;;  %v3549_v26 = vld [vmem:[#allocation2 + $0x28] sm:$0xe]  ;;  %v3391_v43 = vsel %vm7023_vm2, %v3386_v54, %v3390_v52  ;;  %v2499_v19 = vld [vmem:[#allocation2 + $0x44] sm:$0x1]  ;;  %v8843_v45 = vld [vmem:[#allocation2 + $0x7c] sm:$0x1] }
 0x320   :  { %2540 = vst [vmem:[#allocation2 + $0x88] sm:$0xf] %v2539_v60  ;;  %v2545_v25 = vsel %vm8229_vm12, %v2413_v51, %v2544_v9  ;;  %v3404_v24 = vrot.slane %v3402_v6, 5  ;;  %2543 = vst [vmem:[#allocation2 + $0x8c] sm:$0x1] %v2542_v49  ;;  %v2782_v39 = vshll.u32 %v2564_v21, 16 }
 0x321   :  { %2546 = vst [vmem:[#allocation2 + $0x90] sm:$0xf] %v2545_v25  ;;  %v3400_v32 = vrot.slane %v3399_v58, 4  ;;  %v2781_v30 = vrot.slane %v2779_v48, 4  ;;  %v6036_v18 = vrot.slane %v3181_v17, 9  ;;  %v3243_v35 = vrot.slane %v8737_v44, 5 }
 0x322   :  { %v2784_v4 = vrot.slane %v2782_v39, 5  ;;  %v6037_v59 = vrot.slane %v3182_v0, 9  ;;  %v3247_v15 = vrot.slane %v8739_v33, 5  ;;  %v3435_v60 = vshrl.u32 %v3298_v63, 16  ;;  %v2547_v21 = vld [vmem:[#allocation2 + $0x94] sm:$0x1] }
 0x323   :  { %v6051_v16 = vrot.slane %v3549_v26, 9  ;;  %v2414_v9 = vrot.slane %v8732_v37, 4  ;;  %v3405_v54 = vsel %vm7023_vm2, %v3400_v32, %v3404_v24  ;;  %v3438_v6 = vshll.u32 %v3298_v63, 16  ;;  %v3299_v49 = vld [vmem:[#allocation2 + $0x68] sm:$0xf] }
 0x324   :  { %v10028_v51 = vrot.slane %v8648_v40, 5  ;;  %v10029_v52 = vrot.slane %v8710_v27, 9  ;;  %v3608_v48 = vrot.slane %v8654_v41, 5  ;;  %v6122_v17 = vcombine.low %v3391_v43, %v3405_v54  ;;  %v8766_v58 = vld [vmem:[#allocation2 + $0x84] sm:$0x1] }
 0x325   :  { %10031 = vst [vmem:[#allocation19_spill] sm:$0xff] %v8766_v58  ;;  %v3437_v37 = vrot.slane %v3435_v60, 4  ;;  %v3139_v0 = vshll.u32 %v8694_v47, 16  ;;  %v3244_v32 = vsel %vm8549_vm0, %v6036_v18, %v3243_v35  ;;  %v3248_v40 = vsel %vm8549_vm0, %v6037_v59, %v3247_v15  ;;  %v8773_v27 = vld [vmem:[#allocation2 + $0x64] sm:$0x1] }
 0x326   :  { %v8763_v39 = vsel %vm8549_vm0, %v10029_v52, %v10028_v51  ;;  %10032 = vst [vmem:[#allocation20_spill] sm:$0xff] %v8773_v27  ;;  %v3440_v63 = vrot.slane %v3438_v6, 5  ;;  %v10033_v26 = vshrl.u32 %v8692_v50, 16  ;;  %v3127_v41 = vrot.slane %v3125_v57, 5  ;;  %3950 = vrot.lane.b32.xlu1 %v6122_v17, %s6926_s29  ;;  %v8778_v60 = vld [vmem:[#allocation2 + $0x6c] sm:$0x1] }
 0x327   :  { %10030 = vst [vmem:[#allocation18_spill] sm:$0xff] %v8763_v39  ;;  %v3138_v43 = vrot.slane %v3136_v61, 4  ;;  %v2785_v24 = vor.u32 %v2784_v4, %v2781_v30  ;;  %v8780_v47 = vld [vmem:[#allocation2 + $0x88] sm:$0xf]  ;;  %v2788_v18 = vshll.u32 %v8766_v58, 16  ;;  %v3449_v35 = vshrl.u32 %v3299_v49, 16 }
 0x328   :  { %v3124_v25 = vrot.slane %v10033_v26, 4  ;;  %v8782_v54 = vld [vmem:[#allocation2 + $0x88] sm:$0xf]  ;;  %v10035_v59 = vrot.slane %v8290_v13, 4  ;;  %v2548_v57 = vsel %vm8235_vm13, %v2414_v9, %v2547_v21  ;;  %v8791_v61 = vld [vmem:[#allocation2 + $0x90] sm:$0xf]  ;;  %v6106_v15 = vcombine.low %v3244_v32, %v3248_v40 }
 0x329   :  { %10034 = vst [vmem:[#allocation21_spill] sm:$0xff] %v8782_v54  ;;  %v8793_v30 = vld [vmem:[#allocation2 + $0x8c] sm:$0x1]  ;;  %v2793_v4 = vshrl.u32 %v8782_v54, 16  ;;  %v3441_v6 = vor.u32 %v3440_v63, %v3437_v37  ;;  %v3452_v51 = vshll.u32 %v3299_v49, 16  ;;  %v3141_v52 = vrot.slane %v3139_v0, 5 }
 0x32a   :  { %v2500_v50 = vsel %vm8235_vm13, %v10035_v59, %v2499_v19  ;;  %10036 = vst [vmem:[#allocation22_spill] sm:$0xff] %v8793_v30  ;;  %2549 = vst [vmem:[#allocation2 + $0x94] sm:$0x1] %v2548_v57  ;;  %v6095_v13 = vcombine.low %v8780_v47, %v8791_v61  ;;  %v2796_v19 = vshll.u32 %v8782_v54, 16  ;;  %v3444_v5 = vshll.u32 %v8773_v27, 16  ;;  %3870 = vrot.lane.b32.xlu1 %v6106_v15, %s6926_s29 }
 0x32b   :  { %2501 = vst [vmem:[#allocation2 + $0x44] sm:$0x1] %v2500_v50  ;;  %v3128_v9 = vor.u32 %v3127_v41, %v3124_v25  ;;  %v8802_v21 = vsel %vm8549_vm0, %v6051_v16, %v3608_v48  ;;  %v2786_v17 = vrot.slane %v2785_v24, 4  ;;  %v2795_v26 = vrot.slane %v2793_v4, 4  ;;  %v8809_v59 = vld [vmem:[#allocation2 + $0x40] sm:$0xf] }
 0x32c   :  { %10037 = vst [vmem:[#allocation23_spill] sm:$0xff] %v8802_v21  ;;  %3816 = vrot.lane.b32.xlu0 %v6095_v13, %s6926_s29  ;;  %v2798_v37 = vrot.slane %v2796_v19, 5  ;;  %v2802_v0 = vshll.u32 %v8793_v30, 16  ;;  %v3458_v32 = vshll.u32 %v8778_v60, 16  ;;  %v2790_v40 = vrot.slane %v2788_v18, 5 }
 0x32d   :  { %v3442_v63 = vrot.slane %v3441_v6, 4  ;;  %v3451_v25 = vrot.slane %v3449_v35, 4  ;;  %v3454_v41 = vrot.slane %v3452_v51, 5  ;;  %v3142_v16 = vor.u32 %v3141_v52, %v3138_v43  ;;  %v8812_v57 = vld [vmem:[#allocation2 + $0x48] sm:$0xf] }
 0x32e   :  { %v2799_v24 = vor.u32 %v2798_v37, %v2795_v26  ;;  %v3446_v50 = vrot.slane %v3444_v5, 5  ;;  %v8814_v4 = vrot.slane %v3128_v9, 4  ;;  %v2791_v15 = vsel %vm7023_vm2, %v2786_v17, %v2790_v40  ;;  %v8823_v5 = vld [vmem:[#allocation2 + $0x4c] sm:$0x1]  ;;  %v8840_v48 = vld [vmem:[#allocation2 + $0x74] sm:$0x1] }
 0x32f   :  { %v2804_v13 = vrot.slane %v2802_v0, 5  ;;  %v3455_v19 = vor.u32 %v3454_v41, %v3451_v25  ;;  %v3460_v6 = vrot.slane %v3458_v32, 5  ;;  %v3407_v43 = vshrl.u32 %v8809_v59, 16  ;;  %v8852_v30 = vld [vmem:[#allocation2 + $0x3c] sm:$0x1] }
 0x330   :  { %10038 = vst [vmem:[#allocation24_spill] sm:$0xff] %v8814_v4  ;;  %v2800_v18 = vrot.slane %v2799_v24, 4  ;;  %v3447_v35 = vsel %vm7023_vm2, %v3442_v63, %v3446_v50  ;;  %v3410_v9 = vshll.u32 %v8809_v59, 16  ;;  %v3421_v17 = vshrl.u32 %v8812_v57, 16  ;;  %v8832_v63 = vld [vmem:[#allocation2 + $0x70] sm:$0xf] }
 0x331   :  { %v3456_v52 = vrot.slane %v3455_v19, 4  ;;  %v3409_v0 = vrot.slane %v3407_v43, 4  ;;  %v3424_v40 = vshll.u32 %v8812_v57, 16  ;;  %v3430_v32 = vshll.u32 %v8823_v5, 16  ;;  %10039 = vst [vmem:[#allocation25_spill] sm:$0xff] %v8832_v63 }
 0x332   :  { %v8820_v51 = vld [vmem:[#allocation2 + $0x44] sm:$0x1]  ;;  %v2805_v37 = vsel %vm7023_vm2, %v2800_v18, %v2804_v13  ;;  %v8834_v25 = vrot.slane %v3142_v16, 4  ;;  %v3412_v50 = vrot.slane %v3410_v9, 5  ;;  %v8838_v19 = vld [vmem:[#allocation2 + $0x78] sm:$0xf] }
 0x333   :  { %v3416_v26 = vshll.u32 %v8820_v51, 16  ;;  %v6079_v41 = vcombine.low %v2791_v15, %v2805_v37  ;;  %v3461_v24 = vsel %vm7023_vm2, %v3456_v52, %v3460_v6  ;;  %10041 = vst [vmem:[#allocation27_spill] sm:$0xff] %v8838_v19  ;;  %v3423_v43 = vrot.slane %v3421_v17, 4  ;;  %v8860_v58 = vld [vmem:[#allocation2 + $0x44] sm:$0x1] }
 0x334   :  { %10040 = vst [vmem:[#allocation26_spill] sm:$0xff] %v8834_v25  ;;  %v3426_v49 = vrot.slane %v3424_v40, 5  ;;  %v6124_v16 = vcombine.low %v3447_v35, %v3461_v24  ;;  %v3413_v53 = vor.u32 %v3412_v50, %v3409_v0  ;;  %v3432_v15 = vrot.slane %v3430_v32, 5  ;;  %v3183_v35 = vld [vmem:[#allocation2 + $0x38] sm:$0xe] }
 0x335   :  { %v3418_v18 = vrot.slane %v3416_v26, 5  ;;  %3736 = vrot.lane.b32.xlu0 %v6079_v41, %s6926_s29  ;;  %v3463_v37 = vshrl.u32 %v8832_v63, 16  ;;  %v3466_v52 = vshll.u32 %v8832_v63, 16  ;;  %v3472_v9 = vshll.u32 %v8840_v48, 16  ;;  %v3184_v24 = vld [vmem:[#allocation2 + $0x40] sm:$0xe] }
 0x336   :  { %v3427_v6 = vor.u32 %v3426_v49, %v3423_v43  ;;  %v3477_v54 = vshrl.u32 %v8838_v19, 16  ;;  %v3414_v13 = vrot.slane %v3413_v53, 4  ;;  %v3480_v17 = vshll.u32 %v8838_v19, 16  ;;  %v8865_v0 = vld [vmem:[#allocation2 + $0x80] sm:$0xf] }
 0x337   :  { %v3465_v26 = vrot.slane %v3463_v37, 4  ;;  %v3486_v40 = vshll.u32 %v8843_v45, 16  ;;  %v3468_v41 = vrot.slane %v3466_v52, 5  ;;  %v3150_v50 = vshrl.u32 %v8780_v47, 16  ;;  %10042 = vst [vmem:[#allocation28_spill] sm:$0xff] %v8865_v0 }
 0x338   :  { %v3428_v32 = vrot.slane %v3427_v6, 4  ;;  %v3479_v49 = vrot.slane %v3477_v54, 4  ;;  %v3419_v53 = vsel %vm7023_vm2, %v3414_v13, %v3418_v18  ;;  %v3482_v37 = vrot.slane %v3480_v17, 5  ;;  %v8867_v4 = vld [vmem:[#allocation2 + $0x84] sm:$0x1] }
 0x339   :  { %3954 = vrot.lane.b32.xlu0 %v6124_v16, %s6926_s29  ;;  %v3153_v25 = vshll.u32 %v8780_v47, 16  ;;  %v3469_v52 = vor.u32 %v3468_v41, %v3465_v26  ;;  %v3474_v54 = vrot.slane %v3472_v9, 5  ;;  %v3488_v16 = vrot.slane %v3486_v40, 5  ;;  %v8869_v39 = vld [vmem:[#allocation2 + $0x88] sm:$0xf] }
 0x33a   :  { %v3433_v6 = vsel %vm7023_vm2, %v3428_v32, %v3432_v15  ;;  %v3483_v2 = vor.u32 %v3482_v37, %v3479_v49  ;;  %v6038_v62 = vrot.slane %v3183_v35, 9  ;;  %10043 = vst [vmem:[#allocation29_spill] sm:$0xff] %v8869_v39  ;;  %v3251_v18 = vrot.slane %v8852_v30, 5  ;;  %v8883_v49 = vld [vmem:[#allocation2 + $0x8c] sm:$0x1] }
 0x33b   :  { %v6123_v43 = vcombine.low %v3419_v53, %v3433_v6  ;;  %v3470_v13 = vrot.slane %v3469_v52, 4  ;;  %v6039_v17 = vrot.slane %v3184_v24, 9  ;;  %v3255_v47 = vrot.slane %v8860_v58, 5  ;;  %v8890_v52 = vld [vmem:[#allocation2 + $0x64] sm:$0x1] }
 0x33c   :  { %v3484_v15 = vrot.slane %v3483_v2, 4  ;;  %v3491_v9 = vshrl.u32 %v8865_v0, 16  ;;  %v3494_v26 = vshll.u32 %v8865_v0, 16  ;;  %v3500_v32 = vshll.u32 %v8867_v4, 16  ;;  %v8886_v2 = vld [vmem:[#allocation2 + $0x5c] sm:$0x1] }
 0x33d   :  { %3952 = vrot.lane.b32.xlu1 %v6123_v43, %s6926_s29  ;;  %v3475_v40 = vsel %vm7023_vm2, %v3470_v13, %v3474_v54  ;;  %v3252_v35 = vsel %vm8549_vm0, %v6038_v62, %v3251_v18  ;;  %v3256_v41 = vsel %vm8549_vm0, %v6039_v17, %v3255_v47  ;;  %v3505_v24 = vshrl.u32 %v8869_v39, 16  ;;  %v3185_v54 = vld [vmem:[#allocation2 + $0x58] sm:$0xe]  ;;  %v3186_v47 = vld [vmem:[#allocation2 + $0x60] sm:$0xe] }
 0x33e   :  { %v3489_v43 = vsel %vm7023_vm2, %v3484_v15, %v3488_v16  ;;  %v6107_v53 = vcombine.low %v3252_v35, %v3256_v41  ;;  %v3493_v37 = vrot.slane %v3491_v9, 4  ;;  %v3496_v6 = vrot.slane %v3494_v26, 5  ;;  %v8894_v21 = vld [vmem:[#allocation2 + $0x98] sm:$0xf]  ;;  %v8901_v9 = vld [vmem:[#allocation2 + $0x90] sm:$0xf] }
 0x33f   :  { %v3164_v62 = vshrl.u32 %v8791_v61, 16  ;;  %v6125_v13 = vcombine.low %v3475_v40, %v3489_v43  ;;  %v3507_v18 = vrot.slane %v3505_v24, 4  ;;  %v3508_v17 = vshll.u32 %v8869_v39, 16  ;;  %10044 = vst [vmem:[#allocation30_spill] sm:$0xff] %v8894_v21  ;;  %10045 = vst [vmem:[#allocation31_spill] sm:$0xff] %v8901_v9 }
 0x340   :  { %v8896_v0 = vrot.slane %v3150_v50, 4  ;;  %v3167_v3 = vshll.u32 %v8791_v61, 16  ;;  %v3497_v16 = vor.u32 %v3496_v6, %v3493_v37  ;;  %v3514_v15 = vshll.u32 %v8883_v49, 16  ;;  %v8906_v24 = vld [vmem:[#allocation2 + $0x94] sm:$0x1] }
 0x341   :  { %3872 = vrot.lane.b32.xlu1 %v6107_v53, %s6926_s29  ;;  %v8903_v26 = vrot.slane %v3153_v25, 5  ;;  %3956 = vrot.lane.b32.xlu0 %v6125_v13, %s6926_s29  ;;  %v3502_v40 = vrot.slane %v3500_v32, 5  ;;  %v3510_v35 = vrot.slane %v3508_v17, 5  ;;  %v6040_v41 = vrot.slane %v3185_v54, 9  ;;  %v8916_v54 = vld [vmem:[#allocation2 + $0x9c] sm:$0x1] }
 0x342   :  { %v3498_v50 = vrot.slane %v3497_v16, 4  ;;  %v3516_v43 = vrot.slane %v3514_v15, 5  ;;  %v3259_v61 = vrot.slane %v8886_v2, 5  ;;  %v6041_v39 = vrot.slane %v3186_v47, 9  ;;  %v8922_v36 = vld [vmem:[#allocation2 + $0x6c] sm:$0x1] }
 0x343   :  { %v3511_v53 = vor.u32 %v3510_v35, %v3507_v18  ;;  %v3263_v37 = vrot.slane %v8890_v52, 5  ;;  %v3519_v6 = vshrl.u32 %v8901_v9, 16  ;;  %v3522_v25 = vshll.u32 %v8901_v9, 16  ;;  %v8955_v31 = vld [vmem:[#allocation2 + $0x94] sm:$0x1] }
 0x344   :  { %v3503_v13 = vsel %vm7023_vm2, %v3498_v50, %v3502_v40  ;;  %v3260_v32 = vsel %vm8549_vm0, %v6040_v41, %v3259_v61  ;;  %v3528_v17 = vshll.u32 %v8906_v24, 16  ;;  %v3533_v16 = vshrl.u32 %v8894_v21, 16  ;;  %v3187_v41 = vld [vmem:[#allocation2 + $0x68] sm:$0xe] }
 0x345   :  { %v3512_v47 = vrot.slane %v3511_v53, 4  ;;  %v3264_v18 = vsel %vm8549_vm0, %v6041_v39, %v3263_v37  ;;  %v3521_v15 = vrot.slane %v3519_v6, 4  ;;  %v3524_v35 = vrot.slane %v3522_v25, 5  ;;  %v3188_v39 = vld [vmem:[#allocation2 + $0x70] sm:$0xe] }
 0x346   :  { %v3166_v9 = vrot.slane %v3164_v62, 4  ;;  %v6108_v56 = vcombine.low %v3260_v32, %v3264_v18  ;;  %v3535_v40 = vrot.slane %v3533_v16, 4  ;;  %v3536_v50 = vshll.u32 %v8894_v21, 16  ;;  %v8934_v32 = vld [vmem:[#allocation2 + $0x7c] sm:$0x1] }
 0x347   :  { %v3169_v61 = vrot.slane %v3167_v3, 5  ;;  %v3517_v22 = vsel %vm7023_vm2, %v3512_v47, %v3516_v43  ;;  %v3525_v42 = vor.u32 %v3524_v35, %v3521_v15  ;;  %v3542_v53 = vshll.u32 %v8916_v54, 16  ;;  %v3189_v3 = vld [vmem:[#allocation2 + $0x78] sm:$0xe]  ;;  %v3190_v15 = vld [vmem:[#allocation2 + $0x80] sm:$0xe]  ;;  %v8936_v35 = vpop.permute.xlu0 %3802 }
 0x348   :  { %v3156_v37 = vor.u32 %v8903_v26, %v8896_v0  ;;  %v6126_v6 = vcombine.low %v3503_v13, %v3517_v22  ;;  %3874 = vrot.lane.b32.xlu1 %v6108_v56, %s6926_s29  ;;  %v3538_v25 = vrot.slane %v3536_v50, 5  ;;  %v3530_v43 = vrot.slane %v3528_v17, 5  ;;  %v8941_v56 = vld [vmem:[#allocation2 + $0x84] sm:$0x1]  ;;  %v3191_v50 = vld [vmem:[#allocation2 + $0x88] sm:$0xe] }
 0x349   :  { %v3526_v16 = vrot.slane %v3525_v42, 4  ;;  %v3544_v47 = vrot.slane %v3542_v53, 5  ;;  %v6042_v18 = vrot.slane %v3187_v41, 9  ;;  %v3267_v0 = vrot.slane %v8922_v36, 5  ;;  %v2806_v41 = vld [vmem:[#allocation2] sm:$0xe] }
 0x34a   :  { %3958 = vrot.lane.b32.xlu0 %v6126_v6, %s6926_s29  ;;  %v3539_v21 = vor.u32 %v3538_v25, %v3535_v40  ;;  %v6043_v26 = vrot.slane %v3188_v39, 9  ;;  %v3271_v22 = vrot.slane %v8928_v34, 5  ;;  %v3170_v13 = vor.u32 %v3169_v61, %v3166_v9  ;;  %v6851_v53 = vld [vmem:[#allocation2] sm:$0xf]  ;;  %v6852_v62 = vld [vmem:[#allocation2 + $0x8] sm:$0xf] }
 0x34b   :  { %v3531_v42 = vsel %vm7023_vm2, %v3526_v16, %v3530_v43  ;;  %v6044_v17 = vrot.slane %v3189_v3, 9  ;;  %v6064_v63 = vcombine.low %v6851_v53, %v6852_v62  ;;  %v3268_v40 = vsel %vm8549_vm0, %v6042_v18, %v3267_v0  ;;  %v8950_v25 = vld [vmem:[#allocation2 + $0x8c] sm:$0x1]  ;;  %v3192_v9 = vld [vmem:[#allocation2 + $0x90] sm:$0xe] }
 0x34c   :  { %v3540_v19 = vrot.slane %v3539_v21, 4  ;;  %v3272_v39 = vsel %vm8549_vm0, %v6043_v26, %v3271_v22  ;;  %v3275_v6 = vrot.slane %v8934_v32, 5  ;;  %v8952_v61 = vrot.slane %v3156_v37, 4  ;;  %v2807_v26 = vld [vmem:[#allocation2 + $0x8] sm:$0xe] }
 0x34d   :  { %v6109_v3 = vcombine.low %v3268_v40, %v3272_v39  ;;  %v6045_v16 = vrot.slane %v3190_v15, 9  ;;  %v3279_v43 = vrot.slane %v8941_v56, 5  ;;  %v6046_v0 = vrot.slane %v3191_v50, 9  ;;  %v3805_v40 = vpop.permute.xlu0 %3804  ;;  %v2808_v39 = vld [vmem:[#allocation2 + $0x10] sm:$0xe]  ;;  %v3723_v50 = vpop.permute.xlu1 %3722 }
 0x34e   :  { %10046 = vst [vmem:[#allocation32_spill] sm:$0xff] %v8952_v61  ;;  %v3545_v62 = vsel %vm7023_vm2, %v3540_v19, %v3544_v47  ;;  %v3276_v18 = vsel %vm8549_vm0, %v6044_v17, %v3275_v6  ;;  %v3283_v15 = vrot.slane %v8950_v25, 5  ;;  %v6047_v53 = vrot.slane %v3192_v9, 9  ;;  %v6853_v61 = vld [vmem:[#allocation2 + $0x4] sm:$0x1] }
 0x34f   :  { %v6127_v22 = vcombine.low %v3531_v42, %v3545_v62  ;;  %3876 = vrot.lane.b32.xlu1 %v6109_v3, %s6926_s29  ;;  %v3280_v37 = vsel %vm8549_vm0, %v6045_v16, %v3279_v43  ;;  %v8966_v21 = vrot.slane %v3170_v13, 4  ;;  %v3287_v19 = vrot.slane %v8955_v31, 5  ;;  %v2809_v6 = vld [vmem:[#allocation2 + $0x18] sm:$0xe]  ;;  %v6854_v43 = vld [vmem:[#allocation2 + $0xc] sm:$0x1] }
 0x350   :  { %v6016_v47 = vrot.slane %v2806_v41, 9  ;;  %v2859_v17 = vrot.slane %v6853_v61, 5  ;;  %v6110_v42 = vcombine.low %v3276_v18, %v3280_v37  ;;  %v3284_v3 = vsel %vm8549_vm0, %v6046_v0, %v3283_v15  ;;  %v2810_v62 = vld [vmem:[#allocation2 + $0x20] sm:$0xe]  ;;  %v6855_v61 = vld [vmem:[#allocation2 + $0x14] sm:$0x1] }
 0x351   :  { %10047 = vst [vmem:[#allocation33_spill] sm:$0xff] %v8966_v21  ;;  %3960 = vrot.lane.b32.xlu0 %v6127_v22, %s6926_s29  ;;  %v6017_v16 = vrot.slane %v2807_v26, 9  ;;  %v2863_v9 = vrot.slane %v6854_v43, 5  ;;  %v3288_v13 = vsel %vm8549_vm0, %v6047_v53, %v3287_v19  ;;  %v6018_v21 = vrot.slane %v2808_v39, 9  ;;  %v6856_v22 = vld [vmem:[#allocation2 + $0x1c] sm:$0x1]  ;;  %v8982_v39 = vpop.permute.xlu0 %3806 }
 0x352   :  { %v2860_v41 = vsel %vm8549_vm0, %v6016_v47, %v2859_v17  ;;  %v2867_v27 = vrot.slane %v6855_v61, 5  ;;  %v3988_v0 = vsel %vm1290_vm4, %v6064_v63, %v3723_v50  ;;  %v6019_v26 = vrot.slane %v2809_v6, 9  ;;  %v6857_v17 = vld [vmem:[#allocation2 + $0x24] sm:$0x1] }
 0x353   :  { %3878 = vrot.lane.b32.xlu1 %v6110_v42, %s6926_s29  ;;  %v2864_v18 = vsel %vm8549_vm0, %v6017_v16, %v2863_v9  ;;  %v2871_v37 = vrot.slane %v6856_v22, 5  ;;  %v6111_v15 = vcombine.low %v3284_v3, %v3288_v13  ;;  %v6020_v19 = vrot.slane %v2810_v62, 9  ;;  %v6858_v16 = vld [vmem:[#allocation2 + $0x2c] sm:$0x1]  ;;  %v6859_v22 = vld [vmem:[#allocation2 + $0x34] sm:$0x1] }
 0x354   :  { %v6080_v43 = vcombine.low %v2860_v41, %v2864_v18  ;;  %v2868_v53 = vsel %vm8549_vm0, %v6018_v21, %v2867_v27  ;;  %v2875_v42 = vrot.slane %v6857_v17, 5  ;;  %v6021_v61 = vrot.slane %v2811_v11, 9  ;;  %v6810_v27 = vld [vmem:[%s9974_s2 + $0x110] sm:$0xff]   ;;  %v2813_v18 = vld [vmem:[#allocation2 + $0x38] sm:$0xe] }
 0x355   :  { %v2872_v47 = vsel %vm8549_vm0, %v6019_v26, %v2871_v37  ;;  %v2879_v9 = vrot.slane %v6858_v16, 5  ;;  %v3632_v63 = vrot.slane %v8778_v60, 5  ;;  %v3620_v50 = vrot.slane %v8820_v51, 5  ;;  %v2812_v21 = vld [vmem:[#allocation2 + $0x30] sm:$0xe]  ;;  %v9216_v60 = vld [vmem:[%s9977_s5 + $0x38] sm:$0xff] }
 0x356   :  { %v4020_v6 = vsel %vm1290_vm4, %v6080_v43, %v8936_v35  ;;  %v6081_v3 = vcombine.low %v2868_v53, %v2872_v47  ;;  %v3624_v62 = vrot.slane %v8823_v5, 5  ;;  %v3047_v41 = vshll.u32 %v8852_v30, 16  ;;  %v3725_v43 = vpop.permute.xlu1 %3724  ;;  %v2815_v11 = vld [vmem:[#allocation2 + $0x58] sm:$0xe] }
 0x357   :  { %3880 = vrot.lane.b32.xlu1 %v6111_v15, %s6926_s29  ;;  %4458 = vmatprep.mubr.bf16.mxu1 %v4020_v6  ;;  %v3061_v35 = vshll.u32 %v8860_v58, 16  ;;  %v2876_v53 = vsel %vm8549_vm0, %v6020_v19, %v2875_v42  ;;  %v2880_v15 = vsel %vm8549_vm0, %v6021_v61, %v2879_v9  ;;  %v10048_v47 = vshll.u32 %v8515_v12, 16  ;;  %v6817_v19 = vld [vmem:[%s9974_s2 + $0x108] sm:$0xff]   ;;  %v9015_v61 = vpop.permute.xlu0 %3808  ;;  %v6861_v12 = vld [vmem:[#allocation2 + $0x10] sm:$0xf] }
 0x358   :  { %4459 = vmatmul.mubr.bf16.vlgmr.msra.gmra.mxu1 %v3988_v0  ;;  %v4024_v37 = vsel %vm1290_vm4, %v6081_v3, %v3805_v40  ;;  %v10049_v16 = vshll.u32 %v8517_v28, 16  ;;  %v6022_v0 = vrot.slane %v2812_v21, 9  ;;  %v2883_v40 = vrot.slane %v6859_v22, 5  ;;  %v6862_v9 = vld [vmem:[#allocation2 + $0x18] sm:$0xf] }
 0x359   :  { %6575 = vmatpush3.bf16.msra.mxu1 %v8643_v7  ;;  %4466 = vmatprep.mubr.bf16.mxu1 %v4024_v37  ;;  %v2965_v17 = vrot.slane %v10048_v47, 5  ;;  %v6023_v3 = vrot.slane %v2813_v18, 9  ;;  %v6860_v7 = vld [vmem:[#allocation2 + $0x3c] sm:$0x1]  ;;  %v3075_v42 = vshll.u32 %v8886_v2, 16  ;;  %v6065_v47 = vcombine.low %v6861_v12, %v6862_v9 }
 0x35a   :  { %v2979_v6 = vrot.slane %v10049_v16, 5  ;;  %6576 = vmatprep.subr.bf16.mxu1 %v6810_v27  ;;  %v2887_v37 = vrot.slane %v6860_v7, 5  ;;  %v2814_v18 = vld [vmem:[#allocation2 + $0x50] sm:$0xe]  ;;  %v3089_v22 = vshll.u32 %v8890_v52, 16  ;;  %v6082_v9 = vcombine.low %v2876_v53, %v2880_v15 }
 0x35b   :  { %v2966_v28 = vsel %vm7023_vm2, %v8376_v46, %v2965_v17  ;;  %v3992_v12 = vsel %vm1290_vm4, %v6065_v47, %v3725_v43  ;;  %v10050_v46 = vshll.u32 %v8678_v55, 16  ;;  %v10051_v13 = vshll.u32 %v8682_v23, 16  ;;  %v6864_v53 = vld [vmem:[#allocation2 + $0x5c] sm:$0x1] }
 0x35c   :  { %v2980_v21 = vsel %vm7023_vm2, %v8347_v14, %v2979_v6  ;;  %v2884_v6 = vsel %vm8549_vm0, %v6022_v0, %v2883_v40  ;;  %v2888_v16 = vsel %vm8549_vm0, %v6023_v3, %v2887_v37  ;;  %v6024_v7 = vrot.slane %v2814_v18, 9 }
 0x35d   :  { %v9026_v26 = vcombine.low %v2966_v28, %v2980_v21  ;;  %6577 = vmatpush3.bf16.msra.mxu1 %v6810_v27  ;;  %v2993_v17 = vrot.slane %v10050_v46, 5  ;;  %v3007_v14 = vrot.slane %v10051_v13, 5  ;;  %v6863_v28 = vld [vmem:[#allocation2 + $0x54] sm:$0x1]  ;;  %v6823_v27 = vld [vmem:[%s9974_s2 + $0x100] sm:$0xff]   ;;  %v3727_v43 = vpop.permute.xlu1 %3726  ;;  %v6025_v55 = vrot.slane %v2815_v11, 9 }
 0x35e   :  { %v2891_v21 = vrot.slane %v6863_v28, 5  ;;  %6578 = vmatprep.subr.bf16.mxu1 %v6817_v19  ;;  %v2895_v15 = vrot.slane %v6864_v53, 5  ;;  %v3103_v0 = vshll.u32 %v8922_v36, 16  ;;  %v3117_v40 = vshll.u32 %v8928_v34, 16  ;;  %v2816_v11 = vld [vmem:[#allocation2 + $0x60] sm:$0xe] }
 0x35f   :  { %v2994_v23 = vsel %vm7023_vm2, %v8378_v8, %v2993_v17  ;;  %v3008_v13 = vsel %vm7023_vm2, %v8454_v1, %v3007_v14  ;;  %v4028_v3 = vsel %vm1290_vm4, %v6082_v9, %v8982_v39  ;;  %v3131_v47 = vshll.u32 %v8934_v32, 16  ;;  %v3811_v8 = vpop.permute.xlu0 %3810  ;;  %v2817_v46 = vld [vmem:[#allocation2 + $0x68] sm:$0xe]  ;;  %v6865_v28 = vld [vmem:[#allocation2 + $0x20] sm:$0xf]  ;;  %v10075_v32 = vld [vmem:[#allocation17_spill] sm:$0xff] }
 0x360   :  { %4467 = vmatmul.mubr.bf16.gmra.mxu1 %v3992_v12  ;;  %v9050_v37 = vcombine.low %v2994_v23, %v3008_v13  ;;  %v3145_v18 = vshll.u32 %v8941_v56, 16  ;;  %v10052_v1 = vshll.u32 %v8737_v44, 16  ;;  %v10053_v14 = vshll.u32 %v8739_v33, 16  ;;  %v6866_v53 = vld [vmem:[#allocation2 + $0x28] sm:$0xf]  ;;  %v10077_v56 = vld [vmem:[#allocation24_spill] sm:$0xff] }
 0x361   :  { %4474 = vmatprep.mubr.bf16.mxu1 %v4028_v3  ;;  %6579 = vmatpush3.bf16.msra.mxu1 %v6817_v19  ;;  %v6066_v39 = vcombine.low %v6865_v28, %v6866_v53  ;;  %v6083_v9 = vcombine.low %v2884_v6, %v2888_v16  ;;  %v2892_v23 = vsel %vm8549_vm0, %v6024_v7, %v2891_v21  ;;  %v6026_v3 = vrot.slane %v2816_v11, 9  ;;  %v6867_v16 = vld [vmem:[#allocation2 + $0x64] sm:$0x1]  ;;  %v6868_v7 = vld [vmem:[#allocation2 + $0x6c] sm:$0x1] }
 0x362   :  { %v3021_v17 = vrot.slane %v10052_v1, 5  ;;  %v3035_v12 = vrot.slane %v10053_v14, 5  ;;  %6580 = vmatprep.subr.bf16.mxu1 %v6823_v27  ;;  %v2896_v19 = vsel %vm8549_vm0, %v6025_v55, %v2895_v15  ;;  %v2899_v6 = vrot.slane %v6867_v16, 5  ;;  %v3729_v15 = vpop.permute.xlu1 %3728  ;;  %v6874_v55 = vld [vmem:[#allocation2 + $0x58] sm:$0xf] }
 0x363   :  { %v6027_v1 = vrot.slane %v2817_v46, 9  ;;  %v2903_v21 = vrot.slane %v6868_v7, 5  ;;  %v3159_v28 = vshll.u32 %v8950_v25, 16  ;;  %v3049_v11 = vrot.slane %v3047_v41, 5  ;;  %v6870_v46 = vld [vmem:[#allocation2 + $0x18] sm:$0xf] }
 0x364   :  { %v3022_v44 = vsel %vm7023_vm2, %v8465_v10, %v3021_v17  ;;  %v3036_v33 = vsel %vm7023_vm2, %v8612_v38, %v3035_v12  ;;  %v3063_v10 = vrot.slane %v3061_v35, 5  ;;  %v3996_v38 = vsel %vm1290_vm4, %v6066_v39, %v3727_v43  ;;  %v6869_v17 = vld [vmem:[#allocation2 + $0x10] sm:$0xf]  ;;  %v3731_v13 = vpop.permute.xlu0 %3730  ;;  %v10055_v35 = vld [vmem:[#allocation10_spill] sm:$0xff]  ;;  %v10056_v43 = vld [vmem:[#allocation11_spill] sm:$0xff] }
 0x365   :  { %v9070_v14 = vcombine.low %v3022_v44, %v3036_v33  ;;  %6581 = vmatpush3.bf16.msra.mxu1 %v6823_v27  ;;  %v6112_v12 = vcombine.low %v6869_v17, %v6870_v46  ;;  %v4032_v53 = vsel %vm1290_vm4, %v6083_v9, %v9015_v61  ;;  %v6871_v44 = vld [vmem:[#allocation2 + $0x30] sm:$0xf]  ;;  %v6872_v33 = vld [vmem:[#allocation2 + $0x38] sm:$0xf]  ;;  %v10054_v7 = vmov 0.0  }
 0x366   :  { %v6067_v16 = vcombine.low %v6871_v44, %v6872_v33  ;;  %6656 = vmatprep.subr.mxu1 %v10054_v7  ;;  %v6084_v30 = vcombine.low %v2892_v23, %v2896_v19  ;;  %v6873_v41 = vld [vmem:[#allocation2 + $0x50] sm:$0xf]  ;;  %v3050_v27 = vsel %vm7023_vm2, %v10055_v35, %v3049_v11  ;;  %v3064_v39 = vsel %vm7023_vm2, %v10056_v43, %v3063_v10  ;;  %v3547_v61 = vld [vmem:[#allocation2 + $0x18] sm:$0xe] }
 0x367   :  { %v6068_v58 = vcombine.low %v6873_v41, %v6874_v55  ;;  %v3546_v17 = vld [vmem:[#allocation2 + $0x10] sm:$0xe]  ;;  %v9091_v46 = vsel %vm8549_vm0, %v6026_v3, %v2899_v6  ;;  %v2904_v23 = vsel %vm8549_vm0, %v6027_v1, %v2903_v21  ;;  %v9095_v19 = vcombine.low %v3050_v27, %v3064_v39  ;;  %v10063_v41 = vld [vmem:[#allocation9_spill] sm:$0xff]  ;;  %v10065_v27 = vld [vmem:[#allocation14_spill] sm:$0xff] }
 0x368   :  { %4475 = vmatmul.mubr.bf16.gmra.mxu1 %v3996_v38  ;;  %v4000_v9 = vsel %vm1290_vm4, %v6067_v16, %v3729_v15  ;;  %v4036_v55 = vsel %vm1290_vm4, %v6084_v30, %v3811_v8  ;;  %v3077_v11 = vrot.slane %v3075_v42, 5  ;;  %v3091_v10 = vrot.slane %v3089_v22, 5  ;;  %v10057_v38 = vld [vmem:[#allocation27_spill] sm:$0xff]  ;;  %v10058_v15 = vld [vmem:[#allocation25_spill] sm:$0xff]  ;;  %v10059_v8 = vld [vmem:[#allocation12_spill] sm:$0xff] }
 0x369   :  { %4482 = vmatprep.mubr.bf16.mxu1 %v4032_v53  ;;  %v9105_v3 = vsel %vm1290_vm4, %v6068_v58, %v3731_v13  ;;  %v6048_v6 = vrot.slane %v3546_v17, 9  ;;  %v6049_v33 = vrot.slane %v3547_v61, 9  ;;  %v3105_v1 = vrot.slane %v3103_v0, 5  ;;  %v10060_v42 = vld [vmem:[#allocation13_spill] sm:$0xff]  ;;  %v3550_v13 = vld [vmem:[#allocation2 + $0x30] sm:$0xe] }
 0x36a   :  { %v6085_v21 = vcombine.low %v9091_v46, %v2904_v23  ;;  %v3078_v2 = vsel %vm7023_vm2, %v10059_v8, %v3077_v11  ;;  %v3092_v52 = vsel %vm7023_vm2, %v10060_v42, %v3091_v10  ;;  %v3119_v22 = vrot.slane %v3117_v40, 5  ;;  %v3551_v53 = vld [vmem:[#allocation2 + $0x38] sm:$0xe]  ;;  %v10061_v30 = vld [vmem:[#allocation8_spill] sm:$0xff]  ;;  %v3552_v40 = vld [vmem:[#allocation2 + $0x40] sm:$0xe] }
 0x36b   :  { %v9118_v16 = vcombine.low %v3078_v2, %v3092_v52  ;;  %v10062_v36 = vrot.slane %v10061_v30, 5  ;;  %v10064_v58 = vrot.slane %v10063_v41, 5  ;;  %v3106_v34 = vsel %vm7023_vm2, %v10065_v27, %v3105_v1  ;;  %v10066_v39 = vld [vmem:[#allocation15_spill] sm:$0xff]  ;;  %v10067_v61 = vld [vmem:[#allocation29_spill] sm:$0xff]  ;;  %v10068_v46 = vld [vmem:[#allocation28_spill] sm:$0xff] }
 0x36c   :  { %v3120_v17 = vsel %vm7023_vm2, %v10066_v39, %v3119_v22  ;;  %v10069_v11 = vld [vmem:[#allocation23_spill] sm:$0xff]  ;;  %v10070_v10 = vld [vmem:[#allocation18_spill] sm:$0xff]  ;;  %v6052_v42 = vrot.slane %v3550_v13, 9  ;;  %v6053_v1 = vrot.slane %v3551_v53, 9  ;;  %v3133_v52 = vrot.slane %v3131_v47, 5 }
 0x36d   :  { %v9124_v0 = vsel %vm8549_vm0, %v6048_v6, %v10062_v36  ;;  %v9130_v35 = vsel %vm8549_vm0, %v6049_v33, %v10064_v58  ;;  %v6129_v6 = vcombine.low %v10070_v10, %v10069_v11  ;;  %v3553_v33 = vld [vmem:[#allocation2 + $0x48] sm:$0xe]  ;;  %v9144_v2 = vcombine.low %v3106_v34, %v3120_v17  ;;  %v3554_v30 = vld [vmem:[#allocation2 + $0x60] sm:$0xe]  ;;  %v10073_v34 = vld [vmem:[#allocation16_spill] sm:$0xff] }
 0x36e   :  { %v6128_v43 = vcombine.low %v9124_v0, %v9130_v35  ;;  %v3147_v22 = vrot.slane %v3145_v18, 5  ;;  %v10071_v41 = vld [vmem:[#allocation30_spill] sm:$0xff]  ;;  %v10072_v58 = vld [vmem:[#allocation31_spill] sm:$0xff]  ;;  %v6054_v39 = vrot.slane %v3552_v40, 9  ;;  %v10074_v17 = vrot.slane %v10073_v34, 5 }
 0x36f   :  { %v3555_v23 = vld [vmem:[#allocation2 + $0x68] sm:$0xe]  ;;  %v10076_v47 = vrot.slane %v10075_v32, 5  ;;  %v3134_v18 = vsel %vm7023_vm2, %v10077_v56, %v3133_v52  ;;  %v6055_v53 = vrot.slane %v3553_v33, 9  ;;  %v10078_v40 = vld [vmem:[#allocation26_spill] sm:$0xff]  ;;  %v3161_v51 = vrot.slane %v3159_v28, 5 }
 0x370   :  { %v3947_v8 = vpop.permute.xlu1 %3946  ;;  %4483 = vmatmul.mubr.bf16.gmra.mxu1 %v4000_v9  ;;  %v9157_v13 = vsel %vm8549_vm0, %v6052_v42, %v10074_v17  ;;  %v9177_v42 = vsel %vm8549_vm0, %v6054_v39, %v3620_v50  ;;  %v3557_v34 = vld [vmem:[#allocation2 + $0x78] sm:$0xe]  ;;  %v3558_v32 = vld [vmem:[#allocation2 + $0x80] sm:$0xe]  ;;  %v3559_v50 = vld [vmem:[#allocation2 + $0x88] sm:$0xe] }
 0x371   :  { %v4084_v36 = vsel %vm1290_vm4, %v6112_v12, %v3947_v8  ;;  %v9163_v12 = vsel %vm8549_vm0, %v6053_v1, %v10076_v47  ;;  %4490 = vmatprep.mubr.bf16.mxu1 %v4036_v55  ;;  %v3148_v8 = vsel %vm7023_vm2, %v10078_v40, %v3147_v22  ;;  %v6056_v1 = vrot.slane %v3554_v30, 9  ;;  %v10079_v56 = vld [vmem:[#allocation20_spill] sm:$0xff]  ;;  %v10091_v27 = vld [vmem:[#allocation19_spill] sm:$0xff]  ;;  %v6894_v35 = vld [vmem:[#allocation2 + $0x60] sm:$0xf] }
 0x372   :  { %4555 = vmatprep.mubr.bf16.mxu0 %v4084_v36  ;;  %v6130_v9 = vcombine.low %v9157_v13, %v9163_v12  ;;  %v3556_v36 = vld [vmem:[#allocation2 + $0x70] sm:$0xe]  ;;  %v9179_v33 = vcombine.low %v3134_v18, %v3148_v8  ;;  %v9185_v55 = vsel %vm8549_vm0, %v6055_v53, %v3624_v62  ;;  %v6057_v22 = vrot.slane %v3555_v23, 9  ;;  %v3561_v18 = vld [vmem:[#allocation2 + $0x98] sm:$0xe] }
 0x373   :  { %v3813_v17 = vpop.permute.xlu0 %3812  ;;  %v6131_v47 = vcombine.low %v9177_v42, %v9185_v55  ;;  %v10080_v5 = vrot.slane %v10079_v56, 5  ;;  %v3560_v23 = vld [vmem:[#allocation2 + $0x90] sm:$0xe]  ;;  %v6058_v40 = vrot.slane %v3556_v36, 9  ;;  %v10086_v29 = vrot.slane %v8867_v4, 5 }
 0x374   :  { %v3867_v52 = vpop.permute.xlu1 %3866  ;;  %v4040_v39 = vsel %vm1290_vm4, %v6085_v21, %v3813_v17  ;;  %v9204_v25 = vsel %vm8549_vm0, %v6057_v22, %v3632_v63  ;;  %v10082_v21 = vshll.u32 %v8955_v31, 16  ;;  %v6060_v17 = vrot.slane %v3558_v32, 9  ;;  %v10083_v63 = vld [vmem:[#allocation33_spill] sm:$0xff] }
 0x375   :  { %v4052_v30 = vsel %vm1290_vm4, %v9026_v26, %v3867_v52  ;;  %v9198_v62 = vsel %vm8549_vm0, %v6056_v1, %v10080_v5  ;;  %v10081_v26 = vld [vmem:[#allocation32_spill] sm:$0xff]  ;;  %v6059_v1 = vrot.slane %v3557_v34, 9  ;;  %v6061_v52 = vrot.slane %v3559_v50, 9  ;;  %v6892_v4 = vld [vmem:[#allocation2 + $0x38] sm:$0xf] }
 0x376   :  { %4556 = vmatmul.mubr.bf16.vlgmr.msra.gmra.mxu0 %v4052_v30  ;;  %v3162_v28 = vsel %vm7023_vm2, %v10081_v26, %v3161_v51  ;;  %v3175_v53 = vrot.slane %v10082_v21, 5  ;;  %v6132_v8 = vcombine.low %v9198_v62, %v9204_v25  ;;  %v10084_v31 = vrot.slane %v8840_v48, 5  ;;  %v2818_v21 = vld [vmem:[#allocation2 + $0x70] sm:$0xe] }
 0x377   :  { %6599 = vmatpush3.msra.mxu0 %v9216_v60  ;;  %v6062_v34 = vrot.slane %v3560_v23, 9  ;;  %v6063_v51 = vrot.slane %v3561_v18, 9  ;;  %v10085_v50 = vrot.slane %v8843_v45, 5  ;;  %v9241_v48 = vsel %vm8549_vm0, %v6060_v17, %v10086_v29  ;;  %v9252_v45 = vld [vmem:[%s9977_s5 + $0x30] sm:$0xff]  ;;  %v9285_v17 = vld [vmem:[%s9977_s5 + $0x20] sm:$0xff] }
 0x378   :  { %v3176_v22 = vsel %vm7023_vm2, %v10083_v63, %v3175_v53  ;;  %v9226_v36 = vsel %vm8549_vm0, %v6058_v40, %v10084_v31  ;;  %6600 = vmatprep.subr.mxu0 %v10054_v7  ;;  %v10087_v56 = vrot.slane %v8883_v49, 5  ;;  %4491 = vmatmul.mubr.bf16.gmra.mxu1 %v9105_v3  ;;  %v10088_v49 = vrot.slane %v8906_v24, 5  ;;  %v2819_v53 = vld [vmem:[#allocation2 + $0x78] sm:$0xe]  ;;  %v9278_v24 = vld [vmem:[%s9977_s5 + $0x28] sm:$0xff] }
 0x379   :  { %v9229_v32 = vcombine.low %v3162_v28, %v3176_v22  ;;  %v9235_v30 = vsel %vm8549_vm0, %v6059_v1, %v10085_v50  ;;  %6601 = vmatpush3.msra.mxu0 %v9252_v45  ;;  %v10089_v26 = vrot.slane %v8916_v54, 5  ;;  %4498 = vmatprep.mubr.bf16.mxu1 %v4040_v39  ;;  %v6878_v40 = vld [vmem:[#allocation2 + $0x60] sm:$0xf]  ;;  %v6879_v1 = vld [vmem:[#allocation2 + $0x68] sm:$0xf]  ;;  %v6029_v31 = vrot.slane %v2819_v53, 9 }
 0x37a   :  { %v9247_v5 = vsel %vm8549_vm0, %v6061_v52, %v10087_v56  ;;  %v9264_v18 = vsel %vm8549_vm0, %v6062_v34, %v10088_v49  ;;  %6602 = vmatprep.subr.mxu0 %v10054_v7  ;;  %v6069_v39 = vcombine.low %v6878_v40, %v6879_v1  ;;  %v6028_v52 = vrot.slane %v2818_v21, 9  ;;  %v6881_v63 = vld [vmem:[#allocation2 + $0x74] sm:$0x1]  ;;  %v6882_v34 = vld [vmem:[#allocation2 + $0x7c] sm:$0x1]  ;;  %v9311_v40 = vld [vmem:[%s9977_s5 + $0x8] sm:$0xff] }
 0x37b   :  { %v9270_v28 = vsel %vm8549_vm0, %v6063_v51, %v10089_v26  ;;  %6603 = vmatpush3.msra.mxu0 %v9278_v24  ;;  %v2907_v22 = vrot.slane %v6881_v63, 5  ;;  %v2911_v51 = vrot.slane %v6882_v34, 5  ;;  %v9292_v50 = vld [vmem:[%s9977_s5 + $0x18] sm:$0xff]  ;;  %v9300_v56 = vld [vmem:[%s9977_s5 + $0x10] sm:$0xff]  ;;  %v6885_v21 = vld [vmem:[#allocation2 + $0x20] sm:$0xf]  ;;  %v10095_v13 = vcombine.low %v10058_v15, %v10057_v38 }
 0x37c   :  { %6604 = vmatprep.subr.mxu0 %v10054_v7  ;;  %v6886_v53 = vld [vmem:[#allocation2 + $0x28] sm:$0xf]  ;;  %v9319_v63 = vld [vmem:[%s9977_s5] sm:$0xff]  ;;  %v2915_v3 = vrot.slane %v10091_v27, 5  ;;  %v10097_v15 = vcombine.low %v9241_v48, %v9247_v5  ;;  %v10098_v55 = vcombine.low %v10068_v46, %v10067_v61  ;;  %v10099_v25 = vcombine.low %v9264_v18, %v9270_v28 }
 0x37d   :  { %v3733_v54 = vpop.permute.xlu0 %3732  ;;  %6605 = vmatpush3.msra.mxu0 %v9285_v17  ;;  %v2908_v49 = vsel %vm8549_vm0, %v6028_v52, %v2907_v22  ;;  %v2912_v26 = vsel %vm8549_vm0, %v6029_v31, %v2911_v51  ;;  %10090 = vst [vmem:[#allocation10_spill] sm:$0xff] %v9319_v63  ;;  %v10100_v61 = vcombine.low %v10072_v58, %v10071_v41 }
 0x37e   :  { %6606 = vmatprep.subr.mxu0 %v10054_v7  ;;  %v4008_v29 = vsel %vm1290_vm4, %v6069_v39, %v3733_v54  ;;  %v6113_v54 = vcombine.low %v6885_v21, %v6886_v53  ;;  %v6086_v52 = vcombine.low %v2908_v49, %v2912_v26  ;;  %v6890_v49 = vld [vmem:[#allocation2 + $0x78] sm:$0xf] }
 0x37f   :  { %6607 = vmatpush3.msra.mxu0 %v9292_v50 }
 0x380   :  { %6608 = vmatprep.subr.mxu0 %v10054_v7  ;;  %4499 = vmatmul.mubr.bf16.gmra.mxu1 %v4008_v29  ;;  %v6889_v29 = vld [vmem:[#allocation2 + $0x70] sm:$0xf] }
 0x381   :  { %6609 = vmatpush3.msra.mxu0 %v9300_v56  ;;  %v6070_v26 = vcombine.low %v6889_v29, %v6890_v49 }
 0x382   :  { %6610 = vmatprep.subr.mxu0 %v10054_v7 }
 0x383   :  { %6611 = vmatpush3.msra.mxu0 %v9311_v40 }
 0x384   :  { %v3949_v1 = vpop.permute.xlu1 %3948  ;;  %6612 = vmatprep.subr.mxu0 %v10054_v7 }
 0x385   :  { %v4088_v39 = vsel %vm1290_vm4, %v6113_v54, %v3949_v1  ;;  %6613 = vmatpush3.msra.mxu0 %v9319_v63  ;;  %v2820_v54 = vld [vmem:[#allocation2 + $0x80] sm:$0xe]  ;;  %v2821_v1 = vld [vmem:[#allocation2 + $0x88] sm:$0xe] }
 0x386   :  { %v3815_v22 = vpop.permute.xlu0 %3814  ;;  %4563 = vmatprep.mubr.bf16.mxu0 %v4088_v39  ;;  %6617 = vmatprep.subr.mxu0 %v10054_v7  ;;  %v6030_v39 = vrot.slane %v2820_v54, 9  ;;  %v6031_v23 = vrot.slane %v2821_v1, 9  ;;  %v10093_v54 = vld [vmem:[#allocation21_spill] sm:$0xff] }
 0x387   :  { %v4044_v31 = vsel %vm1290_vm4, %v6086_v52, %v3815_v22  ;;  %v10092_v52 = vld [vmem:[#allocation22_spill] sm:$0xff] }
 0x388   :  { %4506 = vmatprep.mubr.bf16.mxu1 %v4044_v31  ;;  %v2919_v22 = vrot.slane %v10092_v52, 5  ;;  %v6891_v31 = vld [vmem:[#allocation2 + $0x30] sm:$0xf] }
 0x389   :  { %v3869_v34 = vpop.permute.xlu1 %3868  ;;  %v6114_v44 = vcombine.low %v6891_v31, %v6892_v4  ;;  %v6893_v4 = vld [vmem:[#allocation2 + $0x80] sm:$0xf] }
 0x38a   :  { %v4056_v51 = vsel %vm1290_vm4, %v9050_v37, %v3869_v34  ;;  %v2920_v29 = vsel %vm8549_vm0, %v6031_v23, %v2919_v22 }
 0x38b   :  { %4564 = vmatmul.mubr.bf16.gmra.mxu0 %v4056_v51  ;;  %v2916_v51 = vsel %vm8549_vm0, %v6030_v39, %v2915_v3 }
 0x38f   :  { %v3735_v21 = vpop.permute.xlu0 %3734 }
 0x390   :  { %v4012_v53 = vsel %vm1290_vm4, %v6070_v26, %v3735_v21  ;;  %v6087_v26 = vcombine.low %v2916_v51, %v2920_v29 }
 0x391   :  { %4507 = vmatmul.mubr.bf16.gmra.mxu1 %v4012_v53 }
 0x398   :  { %v3951_v37 = vpop.permute.xlu1 %3950 }
 0x399   :  { %v4092_v34 = vsel %vm1290_vm4, %v6114_v44, %v3951_v37  ;;  %v6071_v44 = vcombine.low %v6893_v4, %v10093_v54 }
 0x39a   :  { %4571 = vmatprep.mubr.bf16.mxu0 %v4092_v34 }
 0x39c   :  { %v3871_v49 = vpop.permute.xlu1 %3870 }
 0x39d   :  { %v4060_v27 = vsel %vm1290_vm4, %v9070_v14, %v3871_v49  ;;  %v10094_v14 = vcombine.low %v8809_v59, %v8812_v57 }
 0x39e   :  { %v3817_v21 = vpop.permute.xlu0 %3816  ;;  %4572 = vmatmul.mubr.bf16.gmra.mxu0 %v4060_v27 }
 0x39f   :  { %v4048_v53 = vsel %vm1290_vm4, %v6087_v26, %v3817_v21 }
 0x3a0   :  { %4514 = vmatprep.mubr.bf16.mxu1 %v4048_v53 }
 0x3a7   :  { %v3737_v1 = vpop.permute.xlu0 %3736 }
 0x3a8   :  { %v4016_v3 = vsel %vm1290_vm4, %v6071_v44, %v3737_v1 }
 0x3a9   :  { %4515 = vmatmul.mubr.bf16.gmra.mxu1 %v4016_v3 }
 0x3aa   :  { %6582 = vmatprep.mubr.msk.bf16.mxu1 %vm1290_vm4, %v6128_v43  ;;  %v6895_v43 = vld [vmem:[#allocation2 + $0x68] sm:$0xf] }
 0x3ab   :  { %v3955_v39 = vpop.permute.xlu0 %3954  ;;  %v6116_v59 = vcombine.low %v6894_v35, %v6895_v43 }
 0x3ad   :  { %v4100_v11 = vsel %vm1290_vm4, %v6116_v59, %v3955_v39 }
 0x3af   :  { %v3953_v20 = vpop.permute.xlu1 %3952 }
 0x3b0   :  { %v4096_v23 = vsel %vm1290_vm4, %v10094_v14, %v3953_v20 }
 0x3b1   :  { %4579 = vmatprep.mubr.bf16.mxu0 %v4096_v23  ;;  %6583 = vmatmul.mubr.msk.bf16.vlgmr.msra.gmra.mxu1 %vm1290_vm4, %v6129_v6 }
 0x3b2   :  { %6586 = vmatprep.mubr.msk.bf16.mxu1 %vm1290_vm4, %v6130_v9  ;;  %6657 = vmatpush3.msra.mxu1 %v9216_v60 }
 0x3b3   :  { %v3873_v0 = vpop.permute.xlu1 %3872  ;;  %6658 = vmatprep.subr.mxu1 %v10054_v7 }
 0x3b4   :  { %v4064_v57 = vsel %vm1290_vm4, %v9095_v19, %v3873_v0  ;;  %6659 = vmatpush3.msra.mxu1 %v9252_v45  ;;  %v3957_v19 = vpop.permute.xlu0 %3956 }
 0x3b5   :  { %4580 = vmatmul.mubr.bf16.gmra.mxu0 %v4064_v57  ;;  %6660 = vmatprep.subr.mxu1 %v10054_v7  ;;  %v4104_v12 = vsel %vm1290_vm4, %v10095_v13, %v3957_v19 }
 0x3b6   :  { %4587 = vmatprep.mubr.bf16.mxu0 %v4100_v11  ;;  %6661 = vmatpush3.msra.mxu1 %v9278_v24 }
 0x3b7   :  { %6662 = vmatprep.subr.mxu1 %v10054_v7 }
 0x3b8   :  { %6663 = vmatpush3.msra.mxu1 %v9285_v17 }
 0x3b9   :  { %6587 = vmatmul.mubr.msk.bf16.gmra.mxu1 %vm1290_vm4, %v6131_v47  ;;  %6664 = vmatprep.subr.mxu1 %v10054_v7 }
 0x3ba   :  { %6590 = vmatprep.mubr.msk.bf16.mxu1 %vm1290_vm4, %v6132_v8  ;;  %6665 = vmatpush3.msra.mxu1 %v9292_v50  ;;  %v3875_v10 = vpop.permute.xlu1 %3874 }
 0x3bb   :  { %6666 = vmatprep.subr.mxu1 %v10054_v7  ;;  %v4068_v6 = vsel %vm1290_vm4, %v9118_v16, %v3875_v10  ;;  %v10096_v16 = vcombine.low %v9226_v36, %v9235_v30 }
 0x3bc   :  { %6667 = vmatpush3.msra.mxu1 %v9300_v56  ;;  %v3959_v9 = vpop.permute.xlu0 %3958 }
 0x3bd   :  { %4588 = vmatmul.mubr.bf16.gmra.mxu0 %v4068_v6  ;;  %6668 = vmatprep.subr.mxu1 %v10054_v7  ;;  %v4108_v47 = vsel %vm1290_vm4, %v10098_v55, %v3959_v9 }
 0x3be   :  { %4595 = vmatprep.mubr.bf16.mxu0 %v4104_v12  ;;  %6669 = vmatpush3.msra.mxu1 %v9311_v40 }
 0x3bf   :  { %6670 = vmatprep.subr.mxu1 %v10054_v7 }
 0x3c0   :  { %6671 = vmatpush3.msra.mxu1 %v9319_v63 }
 0x3c1   :  { %6591 = vmatmul.mubr.msk.bf16.gmra.mxu1 %vm1290_vm4, %v10096_v16  ;;  %6675 = vmatprep.subr.mxu1 %v10054_v7  ;;  %v3877_v38 = vpop.permute.xlu1 %3876 }
 0x3c2   :  { %6594 = vmatprep.mubr.msk.bf16.mxu1 %vm1290_vm4, %v10097_v15  ;;  %v4072_v42 = vsel %vm1290_vm4, %v9144_v2, %v3877_v38 }
 0x3c3   :  { %v3961_v8 = vpop.permute.xlu0 %3960 }
 0x3c4   :  { %v4112_v46 = vsel %vm1290_vm4, %v10100_v61, %v3961_v8 }
 0x3c5   :  { %4596 = vmatmul.mubr.bf16.gmra.mxu0 %v4072_v42  ;;  %v3879_v62 = vpop.permute.xlu1 %3878 }
 0x3c6   :  { %4603 = vmatprep.mubr.bf16.mxu0 %v4108_v47  ;;  %v4076_v2 = vsel %vm1290_vm4, %v9179_v33, %v3879_v62 }
 0x3c9   :  { %6595 = vmatmul.mubr.msk.bf16.gmra.mxu1 %vm1290_vm4, %v10099_v25  ;;  %v3881_v36 = vpop.permute.xlu1 %3880 }
 0x3ca   :  { %6672 = vmatprep.mubr.msk.f32.mxu1 %vm6930_vm6, %v10054_v7  ;;  %v4080_v30 = vsel %vm1290_vm4, %v9229_v32, %v3881_v36 }
 0x3cd   :  { %4604 = vmatmul.mubr.bf16.gmra.mxu0 %v4076_v2 }
 0x3ce   :  { %4611 = vmatprep.mubr.bf16.mxu0 %v4112_v46 }
 0x3d5   :  { %4612 = vmatmul.mubr.bf16.gmra.mxu0 %v4080_v30 }
 0x3d6   :  { %6614 = vmatprep.mubr.msk.f32.mxu0 %vm6930_vm6, %v10054_v7 }
 0x418   :  { %v6346_v48 = vpop.f32.mrf.mxu1 }
 0x41a   :  { %v6347_v5 = vpop.f32.mrf.mxu1 }
 0x41b   :  { %v6348_v18 = vadd.f32 %v6347_v5, %v6346_v48 }
 0x41c   :  { %v6349_v28 = vpop.f32.mrf.mxu1 }
 0x41e   :  { %v6350_v33 = vpop.f32.mrf.mxu1 }
 0x41f   :  { %v6351_v52 = vadd.f32 %v6350_v33, %v6349_v28 }
 0x420   :  { %v6352_v22 = vpop.f32.mrf.mxu1 }
 0x422   :  { %v6353_v31 = vpop.f32.mrf.mxu1 }
 0x423   :  { %v6354_v41 = vadd.f32 %v6353_v31, %v6352_v22 }
 0x424   :  { %v6355_v58 = vpop.f32.mrf.mxu1 }
 0x426   :  { %v6356_v37 = vpop.f32.mrf.mxu1 }
 0x427   :  { %v9418_v34 = vadd.f32 %v6356_v37, %v6355_v58 }
 0x428   :  { %v6358_v51 = vpop.f32.mrf.mxu1 }
 0x42a   :  { %v6359_v29 = vpop.f32.mrf.mxu1 }
 0x42b   :  { %v9420_v32 = vadd.f32 %v6359_v29, %v6358_v51 }
 0x42c   :  { %v6361_v49 = vpop.f32.mrf.mxu1 }
 0x42e   :  { %v6362_v26 = vpop.f32.mrf.mxu1 }
 0x42f   :  { %v9422_v21 = vadd.f32 %v6362_v26, %v6361_v49 }
 0x430   :  { %v6364_v27 = vpop.f32.mrf.mxu1 }
 0x432   :  { %v6365_v53 = vpop.f32.mrf.mxu1 }
 0x433   :  { %v9424_v4 = vadd.f32 %v6365_v53, %v6364_v27 }
 0x434   :  { %v6367_v54 = vpop.f32.mrf.mxu1 }
 0x436   :  { %v6368_v44 = vpop.f32.mrf.mxu1  ;;  %v6410_v23 = vpop.f32.mrf.mxu0 }
 0x437   :  { %v9426_v1 = vadd.f32 %v6368_v44, %v6367_v54 }
 0x438   :  { %v6370_v3 = vpop.f32.mrf.mxu1  ;;  %v6411_v0 = vpop.f32.mrf.mxu0 }
 0x439   :  { %v6412_v48 = vadd.f32 %v6411_v0, %v6410_v23 }
 0x43a   :  { %v6371_v20 = vpop.f32.mrf.mxu1  ;;  %v6413_v43 = vpop.f32.mrf.mxu0 }
 0x43b   :  { %v4558_v37 = vadd.f32 %v6412_v48, %v6348_v18 }
 0x43c   :  { %v9428_v14 = vpop.f32.mrf.mxu1  ;;  %v6414_v57 = vpop.f32.mrf.mxu0 }
 0x43d   :  { %v6415_v36 = vadd.f32 %v6414_v57, %v6413_v43 }
 0x43e   :  { %v9430_v39 = vpop.f32.mrf.mxu1 }
 0x43f   :  { %v4561_v22 = vadd.f32 %v6415_v36, %v6351_v52 }
 0x440   :  { %v9432_v35 = vpop.f32.mrf.mxu1 }
 0x442   :  { %v9434_v59 = vpop.f32.mrf.mxu1 }
 0x444   :  { %v9436_v11 = vpop.f32.mrf.mxu1 }
 0x446   :  { %v9438_v10 = vpop.f32.mrf.mxu1 }
 0x44b   :  { %v6416_v19 = vpop.f32.mrf.mxu0 }
 0x44d   :  { %v6417_v6 = vpop.f32.mrf.mxu0 }
 0x44e   :  { %v6418_v58 = vadd.f32 %v6417_v6, %v6416_v19 }
 0x44f   :  { %v6419_v12 = vpop.f32.mrf.mxu0 }
 0x450   :  { %v4566_v44 = vadd.f32 %v6418_v58, %v6354_v41 }
 0x451   :  { %v9440_v13 = vpop.f32.mrf.mxu1  ;;  %v6420_v9 = vpop.f32.mrf.mxu0 }
 0x452   :  { %v6421_v54 = vadd.f32 %v6420_v9, %v6419_v12 }
 0x453   :  { %v9442_v16 = vpop.f32.mrf.mxu1 }
 0x454   :  { %v4569_v48 = vadd.f32 %v6421_v54, %v9418_v34 }
 0x455   :  { %v9444_v38 = vpop.f32.mrf.mxu1 }
 0x457   :  { %v9446_v42 = vpop.f32.mrf.mxu1 }
 0x45e   :  { %v6422_v15 = vpop.f32.mrf.mxu0 }
 0x460   :  { %v6423_v55 = vpop.f32.mrf.mxu0 }
 0x461   :  { %v6424_v36 = vadd.f32 %v6423_v55, %v6422_v15  ;;  %v6375_v15 = vadd.f32 %v9430_v39, %v9428_v14 }
 0x462   :  { %v6425_v25 = vpop.f32.mrf.mxu0 }
 0x464   :  { %v6426_v61 = vpop.f32.mrf.mxu0 }
 0x465   :  { %v6427_v12 = vadd.f32 %v6426_v61, %v6425_v25 }
 0x469   :  { %v9448_v47 = vpop.f32.mrf.mxu1 }
 0x46b   :  { %v9450_v62 = vpop.f32.mrf.mxu1 }
 0x46d   :  { %v9452_v8 = vpop.f32.mrf.mxu1 }
 0x46f   :  { %v9454_v2 = vpop.f32.mrf.mxu1 }
 0x471   :  { %v6584_v46 = vpop.f32.mrf.mxu1 }
 0x472   :  { %v9466_v52 = vadd.f32 %v6584_v46, %v4566_v44 }
 0x473   :  { %v4654_v30 = vpop.f32.mrf.mxu1 }
 0x474   :  { %v9460_v26 = vadd.f32 %v4654_v30, %v4558_v37 }
 0x475   :  { %v6428_v5 = vpop.f32.mrf.mxu0  ;;  %v6585_v28 = vpop.f32.mrf.mxu1 }
 0x476   :  { %v4720_v18 = vsel %vm1290_vm4, %v9460_v26, 0.0  ;;  %v9473_v58 = vadd.f32 %v6585_v28, %v4569_v48  ;;  %v4762_v55 = vmul.f32 %v9460_v26, %v9460_v26 }
 0x477   :  { %v6429_v33 = vpop.f32.mrf.mxu0  ;;  %v4657_v31 = vpop.f32.mrf.mxu1 }
 0x478   :  { %v9456_v29 = vadd.f32 %v4657_v31, %v4561_v22  ;;  %v6372_v22 = vadd.f32 %v6371_v20, %v6370_v3  ;;  %v4723_v31 = vsel %vm1290_vm4, %v9466_v52, 0.0  ;;  %v4577_v3 = vadd.f32 %v6427_v12, %v9422_v21 }
 0x479   :  { %v6431_v51 = vpop.f32.mrf.mxu0  ;;  %v9458_v49 = vpop.f32.mrf.mxu1  ;;  %v4725_v25 = vsel %vm1290_vm4, %v9473_v58, 0.0  ;;  %v6430_v54 = vadd.f32 %v6429_v33, %v6428_v5  ;;  %v6381_v21 = vadd.f32 %v9438_v10, %v9436_v11  ;;  %v4778_v5 = vsel %vm1290_vm4, %v4762_v55, 0.0 }
 0x47a   :  { %v4721_v23 = vsel %vm1290_vm4, %v9456_v29, 0.0  ;;  %v4763_v61 = vmul.f32 %v9456_v29, %v9456_v29 }
 0x47b   :  { %v6432_v27 = vpop.f32.mrf.mxu0  ;;  %v4670_v53 = vpop.f32.mrf.mxu1  ;;  %v4722_v19 = vadd.f32 %v4721_v23, %v4720_v18  ;;  %v4574_v23 = vadd.f32 %v6424_v36, %v9420_v32 }
 0x47c   :  { %v6433_v48 = vadd.f32 %v6432_v27, %v6431_v51  ;;  %v4582_v51 = vadd.f32 %v6430_v54, %v9424_v4  ;;  %v4765_v4 = vmul.f32 %v9473_v58, %v9473_v58 }
 0x47d   :  { %v6434_v0 = vpop.f32.mrf.mxu0  ;;  %v9464_v43 = vpop.f32.mrf.mxu1  ;;  %v4724_v37 = vadd.f32 %v4723_v31, %v4722_v19  ;;  %v9485_v28 = vadd.f32 %v4670_v53, %v4574_v23  ;;  %v6378_v19 = vadd.f32 %v9434_v59, %v9432_v35  ;;  %v4764_v53 = vmul.f32 %v9466_v52, %v9466_v52 }
 0x47f   :  { %v6435_v57 = vpop.f32.mrf.mxu0  ;;  %v4673_v6 = vpop.f32.mrf.mxu1  ;;  %v4726_v14 = vadd.f32 %v4725_v25, %v4724_v37  ;;  %v4727_v35 = vsel %vm1290_vm4, %v9485_v28, 0.0  ;;  %v4585_v25 = vadd.f32 %v6433_v48, %v9426_v1 }
 0x480   :  { %v6436_v30 = vadd.f32 %v6435_v57, %v6434_v0 }
 0x481   :  { %v6437_v41 = vpop.f32.mrf.mxu0  ;;  %v6592_v9 = vpop.f32.mrf.mxu1  ;;  %v4728_v27 = vadd.f32 %v4727_v35, %v4726_v14 }
 0x482   :  { %v4590_v18 = vadd.f32 %v6436_v30, %v6372_v22  ;;  %v9493_v30 = vadd.f32 %v4673_v6, %v4577_v3  ;;  %v9522_v3 = vadd.f32 %v9458_v49, %v4582_v51  ;;  %v4781_v49 = vsel %vm1290_vm4, %v4764_v53, 0.0 }
 0x483   :  { %v6438_v46 = vpop.f32.mrf.mxu0  ;;  %v4686_v44 = vpop.f32.mrf.mxu1 }
 0x484   :  { %v6439_v63 = vadd.f32 %v6438_v46, %v6437_v41  ;;  %v9487_v32 = vadd.f32 %v4686_v44, %v4590_v18  ;;  %v4779_v41 = vsel %vm1290_vm4, %v4763_v61, 0.0  ;;  %v4729_v46 = vsel %vm1290_vm4, %v9493_v30, 0.0 }
 0x485   :  { %v6440_v34 = vpop.f32.mrf.mxu0  ;;  %v6593_v20 = vpop.f32.mrf.mxu1  ;;  %v4780_v18 = vadd.f32 %v4779_v41, %v4778_v5  ;;  %v9534_v5 = vadd.f32 %v9464_v43, %v4585_v25  ;;  %v6390_v25 = vadd.f32 %v9450_v62, %v9448_v47  ;;  %v6393_v62 = vadd.f32 %v9454_v2, %v9452_v8 }
 0x486   :  { %v4593_v39 = vadd.f32 %v6439_v63, %v6375_v15  ;;  %v4770_v11 = vmul.f32 %v9487_v32, %v9487_v32  ;;  %v4741_v44 = vsel %vm1290_vm4, %v9487_v32, 0.0 }
 0x487   :  { %v6441_v0 = vpop.f32.mrf.mxu0  ;;  %v4689_v57 = vpop.f32.mrf.mxu1  ;;  %v4782_v1 = vadd.f32 %v4781_v49, %v4780_v18 }
 0x488   :  { %v6442_v36 = vadd.f32 %v6441_v0, %v6440_v34  ;;  %v9498_v33 = vadd.f32 %v4689_v57, %v4593_v39  ;;  %v4799_v61 = vsel %vm1290_vm4, %v4770_v11, 0.0  ;;  %v4730_v0 = vadd.f32 %v4729_v46, %v4728_v27 }
 0x489   :  { %v6443_v12 = vpop.f32.mrf.mxu0  ;;  %v9500_v63 = vpop.f32.mrf.mxu1  ;;  %v4783_v11 = vsel %vm1290_vm4, %v4765_v4, 0.0  ;;  %v4733_v46 = vsel %vm1290_vm4, %v9534_v5, 0.0 }
 0x48a   :  { %v4598_v59 = vadd.f32 %v6442_v36, %v6378_v19  ;;  %v4742_v6 = vsel %vm1290_vm4, %v9498_v33, 0.0  ;;  %v4771_v22 = vmul.f32 %v9498_v33, %v9498_v33  ;;  %v6384_v19 = vadd.f32 %v9442_v16, %v9440_v13 }
 0x48b   :  { %v6444_v10 = vpop.f32.mrf.mxu0  ;;  %v4743_v15 = vadd.f32 %v4742_v6, %v4741_v44  ;;  %v4702_v55 = vpop.f32.mrf.mxu1  ;;  %v4731_v13 = vsel %vm1290_vm4, %v9522_v3, 0.0  ;;  %v4766_v6 = vmul.f32 %v9485_v28, %v9485_v28  ;;  %v4767_v44 = vmul.f32 %v9493_v30, %v9493_v30 }
 0x48c   :  { %v6445_v31 = vadd.f32 %v6444_v10, %v6443_v12  ;;  %v9514_v37 = vadd.f32 %v6592_v9, %v4598_v59  ;;  %v4800_v34 = vsel %vm1290_vm4, %v4771_v22, 0.0  ;;  %v4732_v51 = vadd.f32 %v4731_v13, %v4730_v0 }
 0x48d   :  { %v6446_v23 = vpop.f32.mrf.mxu0  ;;  %v4801_v57 = vadd.f32 %v4800_v34, %v4799_v61  ;;  %v6597_v59 = vpop.f32.mrf.mxu1  ;;  %v4784_v22 = vadd.f32 %v4783_v11, %v4782_v1  ;;  %v4785_v0 = vsel %vm1290_vm4, %v4766_v6, 0.0 }
 0x48e   :  { %v4772_v9 = vmul.f32 %v9514_v37, %v9514_v37  ;;  %v4744_v14 = vsel %vm1290_vm4, %v9514_v37, 0.0  ;;  %v4601_v39 = vadd.f32 %v6445_v31, %v6381_v21  ;;  %v6387_v21 = vadd.f32 %v9446_v42, %v9444_v38 }
 0x48f   :  { %v6447_v54 = vpop.f32.mrf.mxu0  ;;  %v4745_v12 = vadd.f32 %v4744_v14, %v4743_v15  ;;  %v4705_v4 = vpop.f32.mrf.mxu1  ;;  %v4734_v61 = vadd.f32 %v4733_v46, %v4732_v51 }
 0x490   :  { %v6448_v36 = vadd.f32 %v6447_v54, %v6446_v23  ;;  %v4802_v41 = vsel %vm1290_vm4, %v4772_v9, 0.0  ;;  %v9537_v35 = vadd.f32 %v6593_v20, %v4601_v39 }
 0x491   :  { %v6449_v48 = vpop.f32.mrf.mxu0  ;;  %v4803_v16 = vadd.f32 %v4802_v41, %v4801_v57  ;;  %v4735_v41 = vrot.slane %v4734_v61, 4 }
 0x492   :  { %v4606_v53 = vadd.f32 %v6448_v36, %v6384_v19  ;;  %v4746_v43 = vsel %vm1290_vm4, %v9537_v35, 0.0  ;;  %v4773_v20 = vmul.f32 %v9537_v35, %v9537_v35  ;;  %v4786_v19 = vadd.f32 %v4785_v0, %v4784_v22 }
 0x493   :  { %v6450_v10 = vpop.f32.mrf.mxu0  ;;  %v4747_v42 = vadd.f32 %v4746_v43, %v4745_v12  ;;  %v4787_v12 = vsel %vm1290_vm4, %v4767_v44, 0.0  ;;  %v4769_v22 = vmul.f32 %v9534_v5, %v9534_v5 }
 0x494   :  { %v6451_v27 = vadd.f32 %v6450_v10, %v6449_v48  ;;  %v9550_v38 = vadd.f32 %v4702_v55, %v4606_v53  ;;  %v4804_v23 = vsel %vm1290_vm4, %v4773_v20, 0.0  ;;  %v4788_v51 = vadd.f32 %v4787_v12, %v4786_v19 }
 0x495   :  { %v6452_v31 = vpop.f32.mrf.mxu0  ;;  %v4805_v34 = vadd.f32 %v4804_v23, %v4803_v16  ;;  %v4768_v16 = vmul.f32 %v9522_v3, %v9522_v3 }
 0x496   :  { %v4748_v18 = vsel %vm1290_vm4, %v9550_v38, 0.0  ;;  %v4774_v15 = vmul.f32 %v9550_v38, %v9550_v38  ;;  %v4609_v55 = vadd.f32 %v6451_v27, %v6387_v21  ;;  %v4736_v27 = vadd.f32 %v4735_v41, %v4734_v61 }
 0x497   :  { %v6453_v9 = vpop.f32.mrf.mxu0  ;;  %v4749_v54 = vadd.f32 %v4748_v18, %v4747_v42  ;;  %v4789_v42 = vsel %vm1290_vm4, %v4768_v16, 0.0 }
 0x498   :  { %v6454_v14 = vadd.f32 %v6453_v9, %v6452_v31  ;;  %v4806_v39 = vsel %vm1290_vm4, %v4774_v15, 0.0  ;;  %v9565_v57 = vadd.f32 %v4705_v4, %v4609_v55  ;;  %v4790_v46 = vadd.f32 %v4789_v42, %v4788_v51 }
 0x499   :  { %v6455_v49 = vpop.f32.mrf.mxu0  ;;  %v4807_v36 = vadd.f32 %v4806_v39, %v4805_v34  ;;  %v4737_v18 = vrot.slane %v4736_v27, 2  ;;  %v4791_v34 = vsel %vm1290_vm4, %v4769_v22, 0.0 }
 0x49a   :  { %v4614_v1 = vadd.f32 %v6454_v14, %v6390_v25  ;;  %v4750_v48 = vsel %vm1290_vm4, %v9565_v57, 0.0  ;;  %v4775_v47 = vmul.f32 %v9565_v57, %v9565_v57  ;;  %v4792_v25 = vadd.f32 %v4791_v34, %v4790_v46  ;;  %v9599_v14 = vld [vmem:[%s9976_s4 + $0x3] sm:$0x1] }
 0x49b   :  { %v6456_v21 = vpop.f32.mrf.mxu0  ;;  %v4751_v13 = vadd.f32 %v4750_v48, %v4749_v54  ;;  %v4738_v54 = vadd.f32 %v4737_v18, %v4736_v27  ;;  %v4843_v22 = vmul.f32 %v9599_v14, %v9599_v14 }
 0x49c   :  { %v6457_v53 = vadd.f32 %v6456_v21, %v6455_v49  ;;  %v9577_v11 = vadd.f32 %v9500_v63, %v4614_v1  ;;  %v4808_v10 = vsel %vm1290_vm4, %v4775_v47, 0.0  ;;  %v4793_v39 = vrot.slane %v4792_v25, 4  ;;  %v10101_v21 = vld [vmem:[#allocation6_spill] sm:$0xff] }
 0x49d   :  { %v4809_v43 = vadd.f32 %v4808_v10, %v4807_v36  ;;  %v4827_v36 = vmul.f32 2.0, %v9599_v14  ;;  %v4739_v12 = vrot.slane %v4738_v54, 1  ;;  %v4820_v47 = vmul.f32 64.0, %v9599_v14 }
 0x49e   :  { %v4752_v20 = vsel %vm1290_vm4, %v9577_v11, 0.0  ;;  %v4776_v8 = vmul.f32 %v9577_v11, %v9577_v11  ;;  %v4617_v2 = vadd.f32 %v6457_v53, %v6393_v62  ;;  %v4794_v62 = vadd.f32 %v4793_v39, %v4792_v25  ;;  %v6836_v39 = vld [vmem:[%s9972_s0 + $0x208] ss:$8 sps:$4 sm:$0xff]  }
 0x49f   :  { %v4753_v6 = vadd.f32 %v4752_v20, %v4751_v13  ;;  %v4831_v13 = vrot.slane %v4827_v36, %v10101_v21  ;;  %v4740_v53 = vadd.f32 %v4739_v12, %v4738_v54  ;;  %v4824_v51 = vrot.slane %v4820_v47, %v10101_v21  ;;  %v6833_v54 = vld [vmem:[%s9972_s0 + $0x1d0] ss:$8 sps:$4 sm:$0xff]  }
 0x4a0   :  { %v4810_v63 = vsel %vm1290_vm4, %v4776_v8, 0.0  ;;  %v9588_v31 = vadd.f32 %v6597_v59, %v4617_v2 }
 0x4a1   :  { %v4811_v44 = vadd.f32 %v4810_v63, %v4809_v43  ;;  %v4795_v43 = vrot.slane %v4794_v62, 2  ;;  %v4825_v27 = vadd.f32 %v4824_v51, %v4740_v53 }
 0x4a2   :  { %v4754_v23 = vsel %vm1290_vm4, %v9588_v31, 0.0  ;;  %v4777_v4 = vmul.f32 %v9588_v31, %v9588_v31 }
 0x4a3   :  { %v4755_v15 = vadd.f32 %v4754_v23, %v4753_v6  ;;  %v4796_v63 = vadd.f32 %v4795_v43, %v4794_v62 }
 0x4a4   :  { %v4812_v55 = vsel %vm1290_vm4, %v4777_v4, 0.0  ;;  %v4844_v4 = vmul.f32 64.0, %v4843_v22  ;;  %v5017_v22 = vrot.slane %v9599_v14, %v10101_v21 }
 0x4a5   :  { %v4756_v9 = vrot.slane %v4755_v15, 4  ;;  %v4813_v61 = vadd.f32 %v4812_v55, %v4811_v44  ;;  %v4797_v18 = vrot.slane %v4796_v63, 1 }
 0x4a6   :  { %v4848_v34 = vrot.slane %v4844_v4, %v10101_v21 }
 0x4a7   :  { %v4757_v59 = vadd.f32 %v4756_v9, %v4755_v15  ;;  %v4814_v0 = vrot.slane %v4813_v61, 4  ;;  %v6831_v9 = vld [vmem:[%s9972_s0 + $0x1b0] ss:$8 sps:$4 sm:$0xff]  }
 0x4a9   :  { %v4758_v19 = vrot.slane %v4757_v59, 2  ;;  %v4815_v49 = vadd.f32 %v4814_v0, %v4813_v61  ;;  %v6835_v0 = vld [vmem:[%s9972_s0 + $0x1f8] ss:$8 sps:$4 sm:$0xff]  }
 0x4ab   :  { %v4759_v1 = vadd.f32 %v4758_v19, %v4757_v59  ;;  %v4816_v48 = vrot.slane %v4815_v49, 2  ;;  %v6834_v59 = vld [vmem:[%s9972_s0 + $0x1e0] ss:$8 sps:$4 sm:$0xff]  }
 0x4ac   :  { %v6837_v19 = vld [vmem:[%s9972_s0 + $0x218] ss:$8 sps:$4 sm:$0xff]  }
 0x4ad   :  { %v4760_v41 = vrot.slane %v4759_v1, 1  ;;  %v4817_v16 = vadd.f32 %v4816_v48, %v4815_v49  ;;  %v6838_v49 = vld [vmem:[%s9972_s0 + $0x228] ss:$8 sps:$4 sm:$0xff]  }
 0x4af   :  { %v4761_v10 = vadd.f32 %v4760_v41, %v4759_v1  ;;  %v4818_v42 = vrot.slane %v4817_v16, 1 }
 0x4b1   :  { %v4826_v20 = vadd.f32 %v4824_v51, %v4761_v10  ;;  %v4834_v8 = vsel %vm1875_vm7, %v4761_v10, %v4740_v53  ;;  %v4819_v23 = vadd.f32 %v4818_v42, %v4817_v16 }
 0x4b2   :  { %v4836_v2 = vmul.f32 %v4834_v8, %v4831_v13 }
 0x4b3   :  { %v4853_v6 = vrot.slane %v4826_v20, 7 }
 0x4b4   :  { %v4838_v44 = vrot.slane %v4836_v2, 1 }
 0x4b5   :  { %v4854_v46 = vsel %vm1875_vm7, %v4853_v6, %v4825_v27 }
 0x4b6   :  { %6615 = vmatmul.mubr.msk.f32.vlgmr.msra.gmra.mxu0 %vm1290_vm4, %v4854_v46  ;;  %v4842_v15 = vadd.f32 %v4838_v44, %v4819_v23  ;;  %v6182_v46 = vld [vmem:[%s9976_s4 + $0x4] ss:$0 sm:$0xff] }
 0x4b7   :  { %6618 = vmatpush3.msra.mxu0 %v9216_v60  ;;  %6633 = vmatprep.mubr.msk.f32.mxu0 %vm6930_vm6, %v10054_v7  ;;  %v4798_v60 = vadd.f32 %v4797_v18, %v4796_v63 }
 0x4b8   :  { %6619 = vmatprep.subr.mxu0 %v10054_v7  ;;  %v4850_v55 = vadd.f32 %v4848_v34, %v4842_v15 }
 0x4b9   :  { %6620 = vmatpush3.msra.mxu0 %v9252_v45  ;;  %v4841_v25 = vadd.f32 %v4836_v2, %v4798_v60 }
 0x4ba   :  { %6621 = vmatprep.subr.mxu0 %v10054_v7  ;;  %v4930_v45 = vrot.slane %v4850_v55, 7 }
 0x4bb   :  { %6622 = vmatpush3.msra.mxu0 %v9278_v24  ;;  %v6829_v24 = vld [vmem:[%s9975_s3 + $0x8] sm:$0xff]  }
 0x4bc   :  { %6623 = vmatprep.subr.mxu0 %v10054_v7 }
 0x4bd   :  { %6624 = vmatpush3.msra.mxu0 %v9285_v17  ;;  %v4849_v17 = vadd.f32 %v4848_v34, %v4841_v25 }
 0x4be   :  { %6625 = vmatprep.subr.mxu0 %v10054_v7 }
 0x4bf   :  { %6626 = vmatpush3.msra.mxu0 %v9292_v50  ;;  %v6830_v50 = vld [vmem:[%s9975_s3] sm:$0xff]   ;;  %v4931_v61 = vsel %vm1875_vm7, %v4930_v45, %v4849_v17 }
 0x4c0   :  { %6627 = vmatprep.subr.mxu0 %v10054_v7 }
 0x4c1   :  { %6628 = vmatpush3.msra.mxu0 %v9300_v56  ;;  %v10102_v56 = vld [vmem:[#allocation10_spill] sm:$0xff] }
 0x4c2   :  { %6629 = vmatprep.subr.mxu0 %v10054_v7 }
 0x4c3   :  { %6630 = vmatpush3.msra.mxu0 %v9311_v40  ;;  %v6832_v40 = vld [vmem:[%s9972_s0 + $0x1c0] ss:$8 sps:$4 sm:$0xff]  }
 0x4c4   :  { %6631 = vmatprep.subr.mxu0 %v10054_v7 }
 0x4c5   :  { %6632 = vmatpush3.msra.mxu0 %v10102_v56 }
 0x4c6   :  { %6634 = vmatmul.mubr.msk.f32.vlgmr.msra.gmra.mxu0 %vm1290_vm4, %v4931_v61  ;;  %6636 = vmatprep.subr.bf16.mxu0 %v6829_v24 }
 0x4c7   :  { %6637 = vmatpush3.bf16.msra.mxu0 %v6829_v24  ;;  %6640 = vmatprep.mubr.msk.bf16.mxu0 %vm1265_vm3, %v6831_v9  ;;  %v6183_v9 = vld [vmem:[%s9976_s4 + $0x5] ss:$0 sm:$0xff] }
 0x4c8   :  { %6638 = vmatprep.subr.bf16.mxu0 %v6830_v50 }
 0x4cb   :  { %6639 = vmatpush3.bf16.msra.mxu0 %v6830_v50 }
 0x4ce   :  { %6641 = vmatmul.mubr.msk.bf16.vlgmr.msra.gmra.mxu0 %vm1265_vm3, %v6832_v40  ;;  %v10103_v40 = vld [vmem:[#allocation7_spill] sm:$0xff] }
 0x4cf   :  { %6644 = vmatprep.mubr.msk.bf16.mxu0 %vm1265_vm3, %v6833_v54 }
 0x4d6   :  { %6645 = vmatmul.mubr.msk.bf16.gmra.mxu0 %vm1265_vm3, %v6834_v59 }
 0x4d7   :  { %6648 = vmatprep.mubr.msk.bf16.mxu0 %vm1265_vm3, %v6835_v0 }
 0x4de   :  { %6649 = vmatmul.mubr.msk.bf16.gmra.mxu0 %vm1265_vm3, %v6836_v39 }
 0x4df   :  { %6652 = vmatprep.mubr.msk.bf16.mxu0 %vm1265_vm3, %v6837_v19 }
 0x4e6   :  { %6653 = vmatmul.mubr.msk.bf16.gmra.mxu0 %vm1265_vm3, %v6838_v49 }
 0x576   :  { %v4923_v36 = vpop.f32.mrf.mxu0 }
 0x577   :  { %v4927_v1 = vmul.f32 0.0009765625, %v4923_v36 }
 0x578   :  { %v6616_v12 = vpop.f32.mrf.mxu0 }
 0x579   :  { %v5005_v47 = vmul.f32 %v4927_v1, %v4927_v1  ;;  %v5018_v25 = vsub.f32 %v5017_v22, %v4927_v1 }
 0x586   :  { %v5000_v48 = vpop.f32.mrf.mxu0 }
 0x587   :  { %v5004_v62 = vmul.f32 0.0009765625, %v5000_v48 }
 0x588   :  { %v6635_v41 = vpop.f32.mrf.mxu0 }
 0x589   :  { %v5006_v13 = vsub.f32 %v5004_v62, %v5005_v47 }
 0x58b   :  { %v5007_v16 = vadd.f32 1e-05, %v5006_v13 }
 0x58d   :  { %6841 = vrsqrt.f32 %v5007_v16 }
 0x58e   :  { %v9668_v53 = vpop.f32.mrf.mxu0 }
 0x58f   :  { %v5322_v63 = vsel %vm1290_vm4, %v9668_v53, 0.0  ;;  %v5363_v18 = vmul.f32 %v9668_v53, %v9668_v53 }
 0x590   :  { %v9670_v10 = vpop.f32.mrf.mxu0 }
 0x591   :  { %v5319_v20 = vsel %vm1290_vm4, %v9670_v10, 0.0  ;;  %v5361_v27 = vmul.f32 %v9670_v10, %v9670_v10  ;;  %v5380_v59 = vsel %vm1290_vm4, %v5363_v18, 0.0 }
 0x592   :  { %v9672_v51 = vpop.f32.mrf.mxu0 }
 0x593   :  { %v5324_v15 = vsel %vm1290_vm4, %v9672_v51, 0.0  ;;  %v5377_v14 = vsel %vm1290_vm4, %v5361_v27, 0.0  ;;  %v5364_v39 = vmul.f32 %v9672_v51, %v9672_v51 }
 0x594   :  { %v9674_v43 = vpop.f32.mrf.mxu0 }
 0x595   :  { %v5320_v8 = vsel %vm1290_vm4, %v9674_v43, 0.0  ;;  %v5362_v2 = vmul.f32 %v9674_v43, %v9674_v43 }
 0x596   :  { %v5321_v6 = vadd.f32 %v5320_v8, %v5319_v20  ;;  %v9684_v42 = vpop.f32.mrf.mxu0  ;;  %v5382_v8 = vsel %vm1290_vm4, %v5364_v39, 0.0 }
 0x597   :  { %v5378_v23 = vsel %vm1290_vm4, %v5362_v2, 0.0  ;;  %v5330_v19 = vsel %vm1290_vm4, %v9684_v42, 0.0  ;;  %v9730_v2 = vmul.f32 %v9684_v42, %v9684_v42 }
 0x598   :  { %v5323_v44 = vadd.f32 %v5322_v63, %v5321_v6  ;;  %v9694_v4 = vpop.f32.mrf.mxu0  ;;  %v5379_v24 = vadd.f32 %v5378_v23, %v5377_v14 }
 0x599   :  { %v5326_v17 = vsel %vm1290_vm4, %v9694_v4, 0.0  ;;  %v5365_v49 = vmul.f32 %v9694_v4, %v9694_v4 }
 0x59a   :  { %v6842_v34 = vpop.eup %6841  ;;  %v5325_v60 = vadd.f32 %v5324_v15, %v5323_v44  ;;  %v9701_v55 = vpop.f32.mrf.mxu0  ;;  %v5381_v62 = vadd.f32 %v5380_v59, %v5379_v24 }
 0x59b   :  { %v5013_v45 = vmul.f32 %v6842_v34, %v6182_v46  ;;  %v5384_v27 = vsel %vm1290_vm4, %v5365_v49, 0.0  ;;  %v5332_v6 = vsel %vm1290_vm4, %v9701_v55, 0.0 }
 0x59c   :  { %v5327_v50 = vadd.f32 %v5326_v17, %v5325_v60  ;;  %v9708_v56 = vpop.f32.mrf.mxu0  ;;  %v5383_v44 = vadd.f32 %v5382_v8, %v5381_v62 }
 0x59d   :  { %v5019_v61 = vmul.f32 %v5018_v25, %v5013_v45  ;;  %v5032_v54 = vrot.slane %v5013_v45, %v10103_v40  ;;  %v5328_v0 = vsel %vm1290_vm4, %v9708_v56, 0.0  ;;  %v5366_v23 = vmul.f32 %v9708_v56, %v9708_v56 }
 0x59e   :  { %v5329_v36 = vadd.f32 %v5328_v0, %v5327_v50  ;;  %v9720_v12 = vpop.f32.mrf.mxu0 }
 0x59f   :  { %v5024_v1 = vadd.f32 %v6183_v9, %v5019_v61  ;;  %v5033_v48 = vcombine.high %v5032_v54, %v5032_v54  ;;  %v5040_v47 = vrot.slane %v5032_v54, %v10103_v40  ;;  %v5343_v15 = vsel %vm1290_vm4, %v9720_v12, 0.0 }
 0x5a0   :  { %v5331_v41 = vadd.f32 %v5330_v19, %v5329_v36  ;;  %v9723_v13 = vpop.f32.mrf.mxu0  ;;  %v5371_v34 = vmul.f32 %v9720_v12, %v9720_v12 }
 0x5a1   :  { %v5047_v16 = vrot.slane %v5033_v48, %v10103_v40  ;;  %v5051_v20 = vrot.slane %v5040_v47, %v10101_v21  ;;  %v5081_v46 = vrot.slane %v5024_v1, %v10103_v40  ;;  %v5340_v14 = vsel %vm1290_vm4, %v9723_v13, 0.0 }
 0x5a2   :  { %v9735_v22 = vpop.f32.mrf.mxu0  ;;  %v9741_v18 = vadd.f32 %v5332_v6, %v5331_v41  ;;  %v5369_v17 = vmul.f32 %v9723_v13, %v9723_v13 }
 0x5a3   :  { %v5055_v63 = vrot.slane %v5047_v16, %v10101_v21  ;;  %v5058_v25 = vmul.f32 %v5051_v20, %v9460_v26  ;;  %v5059_v45 = vmul.f32 %v5051_v20, %v9456_v29  ;;  %v5060_v24 = vmul.f32 %v5051_v20, %v9466_v52 }
 0x5a4   :  { %v9749_v60 = vpop.f32.mrf.mxu0  ;;  %v5061_v9 = vmul.f32 %v5051_v20, %v9473_v58  ;;  %v5062_v50 = vmul.f32 %v5051_v20, %v9485_v28  ;;  %v5063_v61 = vmul.f32 %v5051_v20, %v9493_v30  ;;  %v5064_v54 = vmul.f32 %v5051_v20, %v9522_v3 }
 0x5a5   :  { %v5065_v0 = vmul.f32 %v5051_v20, %v9534_v5  ;;  %v5066_v26 = vmul.f32 %v5055_v63, %v9487_v32  ;;  %v5082_v29 = vcombine.high %v5081_v46, %v5081_v46  ;;  %v5089_v52 = vrot.slane %v5081_v46, %v10103_v40 }
 0x5a6   :  { %v9760_v59 = vpop.f32.mrf.mxu0  ;;  %v5067_v39 = vmul.f32 %v5055_v63, %v9498_v33  ;;  %v5068_v19 = vmul.f32 %v5055_v63, %v9514_v37  ;;  %v5069_v58 = vmul.f32 %v5055_v63, %v9537_v35  ;;  %v5070_v28 = vmul.f32 %v5055_v63, %v9550_v38 }
 0x5a7   :  { %v5071_v30 = vmul.f32 %v5055_v63, %v9565_v57  ;;  %v5096_v3 = vrot.slane %v5082_v29, %v10103_v40  ;;  %v5100_v49 = vrot.slane %v5089_v52, %v10101_v21  ;;  %v5341_v32 = vsel %vm1290_vm4, %v9749_v60, 0.0 }
 0x5a8   :  { %v9774_v5 = vpop.f32.mrf.mxu0  ;;  %v5072_v36 = vmul.f32 %v5055_v63, %v9577_v11  ;;  %v5073_v33 = vmul.f32 %v5055_v63, %v9588_v31  ;;  %v5342_v37 = vadd.f32 %v5341_v32, %v5340_v14  ;;  %v5370_v35 = vmul.f32 %v9749_v60, %v9749_v60 }
 0x5a9   :  { %v5104_v38 = vrot.slane %v5096_v3, %v10101_v21  ;;  %v9781_v57 = vadd.f32 %v5100_v49, %v5058_v25  ;;  %v9783_v1 = vadd.f32 %v5100_v49, %v5059_v45  ;;  %v9785_v48 = vadd.f32 %v5100_v49, %v5060_v24 }
 0x5aa   :  { %v9787_v47 = vadd.f32 %v5100_v49, %v5061_v9  ;;  %v9789_v62 = vadd.f32 %v5100_v49, %v5062_v50  ;;  %v9791_v41 = vadd.f32 %v5100_v49, %v5063_v61  ;;  %v9793_v11 = vadd.f32 %v5100_v49, %v5064_v54  ;;  %v9803_v6 = vpop.f32.mrf.mxu0 }
 0x5ab   :  { %v9795_v31 = vadd.f32 %v5100_v49, %v5065_v0  ;;  %v9797_v16 = vadd.f32 %v5104_v38, %v5066_v26  ;;  %v9799_v20 = vadd.f32 %v5104_v38, %v5067_v39  ;;  %v9801_v8 = vadd.f32 %v5104_v38, %v5068_v19 }
 0x5ac   :  { %v9805_v63 = vadd.f32 %v5104_v38, %v5069_v58  ;;  %v9807_v46 = vadd.f32 %v5104_v38, %v5070_v28  ;;  %v9809_v14 = vadd.f32 %v5104_v38, %v5071_v30  ;;  %v9811_v25 = vadd.f32 %v5104_v38, %v5072_v36  ;;  %v9823_v19 = vpop.f32.mrf.mxu0 }
 0x5ad   :  { %v9813_v45 = vadd.f32 %v5104_v38, %v5073_v33  ;;  %v5385_v24 = vadd.f32 %v5384_v27, %v5383_v44  ;;  %v5386_v9 = vsel %vm1290_vm4, %v5366_v23, 0.0  ;;  %v5344_v50 = vadd.f32 %v5343_v15, %v5342_v37 }
 0x5ae   :  { %v5398_v61 = vsel %vm1290_vm4, %v5369_v17, 0.0  ;;  %v5345_v54 = vsel %vm1290_vm4, %v9735_v22, 0.0  ;;  %v5372_v0 = vmul.f32 %v9735_v22, %v9735_v22  ;;  %v5399_v26 = vsel %vm1290_vm4, %v5370_v35, 0.0 }
 0x5af   :  { %v5334_v29 = vrot.slane %v9741_v18, 4  ;;  %v5400_v52 = vadd.f32 %v5399_v26, %v5398_v61  ;;  %v5346_v39 = vadd.f32 %v5345_v54, %v5344_v50  ;;  %v5401_v27 = vsel %vm1290_vm4, %v5371_v34, 0.0 }
 0x5b0   :  { %v5347_v44 = vsel %vm1290_vm4, %v9774_v5, 0.0  ;;  %v5373_v23 = vmul.f32 %v9774_v5, %v9774_v5  ;;  %v5387_v15 = vadd.f32 %v5386_v9, %v5385_v24  ;;  %v5388_v28 = vsel %vm1290_vm4, %v9730_v2, 0.0 }
 0x5b1   :  { %v5402_v17 = vadd.f32 %v5401_v27, %v5400_v52  ;;  %v5348_v58 = vadd.f32 %v5347_v44, %v5346_v39  ;;  %v5403_v30 = vsel %vm1290_vm4, %v5372_v0, 0.0  ;;  %v5349_v3 = vsel %vm1290_vm4, %v9823_v19, 0.0 }
 0x5b2   :  { %v5374_v34 = vmul.f32 %v9823_v19, %v9823_v19  ;;  %v5368_v49 = vmul.f32 %v9701_v55, %v9701_v55  ;;  %v5335_v32 = vadd.f32 %v5334_v29, %v9741_v18  ;;  %v5351_v37 = vsel %vm1290_vm4, %v9760_v59, 0.0 }
 0x5b3   :  { %v5404_v36 = vadd.f32 %v5403_v30, %v5402_v17  ;;  %v5350_v33 = vadd.f32 %v5349_v3, %v5348_v58  ;;  %v5375_v2 = vmul.f32 %v9760_v59, %v9760_v59  ;;  %v5405_v35 = vsel %vm1290_vm4, %v5373_v23, 0.0 }
 0x5b4   :  { %v5407_v38 = vsel %vm1290_vm4, %v5374_v34, 0.0  ;;  %v5389_v24 = vadd.f32 %v5388_v28, %v5387_v15  ;;  %v5353_v61 = vsel %vm1290_vm4, %v9803_v6, 0.0  ;;  %v5376_v18 = vmul.f32 %v9803_v6, %v9803_v6  ;;  %v9856_v28 = vld [vmem:[%s9976_s4 + $0x6] sm:$0x1] }
 0x5b5   :  { %v5406_v9 = vadd.f32 %v5405_v35, %v5404_v36  ;;  %v5352_v50 = vadd.f32 %v5351_v37, %v5350_v33  ;;  %v5336_v54 = vrot.slane %v5335_v32, 2  ;;  %v5390_v29 = vsel %vm1290_vm4, %v5368_v49, 0.0 }
 0x5b6   :  { %v5409_v52 = vsel %vm1290_vm4, %v5375_v2, 0.0  ;;  %v5391_v39 = vadd.f32 %v5390_v29, %v5389_v24  ;;  %v5411_v23 = vsel %vm1290_vm4, %v5376_v18, 0.0  ;;  %v5426_v49 = vmul.f32 2.0, %v9856_v28 }
 0x5b7   :  { %v5354_v0 = vadd.f32 %v5353_v61, %v5352_v50  ;;  %v5408_v26 = vadd.f32 %v5407_v38, %v5406_v9  ;;  %v5337_v15 = vadd.f32 %v5336_v54, %v5335_v32  ;;  %v5419_v2 = vmul.f32 64.0, %v9856_v28 }
 0x5b8   :  { %v5392_v30 = vrot.slane %v5391_v39, 4  ;;  %v5430_v24 = vrot.slane %v5426_v49, %v10101_v21 }
 0x5b9   :  { %v5355_v27 = vrot.slane %v5354_v0, 4  ;;  %v5410_v44 = vadd.f32 %v5409_v52, %v5408_v26  ;;  %v5338_v36 = vrot.slane %v5337_v15, 1  ;;  %v5423_v18 = vrot.slane %v5419_v2, %v10101_v21  ;;  %v6899_v2 = vld [vmem:[%s9977_s5 + $0x20] sm:$0xff] }
 0x5ba   :  { %v5393_v35 = vadd.f32 %v5392_v30, %v5391_v39  ;;  %v5442_v39 = vmul.f32 %v9856_v28, %v9856_v28 }
 0x5bb   :  { %v5356_v17 = vadd.f32 %v5355_v27, %v5354_v0  ;;  %v5412_v58 = vadd.f32 %v5411_v23, %v5410_v44  ;;  %v5339_v9 = vadd.f32 %v5338_v36, %v5337_v15  ;;  %v6896_v15 = vld [vmem:[%s9977_s5 + $0x38] sm:$0xff] }
 0x5bc   :  { %v5394_v54 = vrot.slane %v5393_v35, 2 }
 0x5bd   :  { %v5357_v3 = vrot.slane %v5356_v17, 2  ;;  %v5413_v34 = vrot.slane %v5412_v58, 4  ;;  %v5424_v27 = vadd.f32 %v5423_v18, %v5339_v9 }
 0x5be   :  { %v5395_v23 = vadd.f32 %v5394_v54, %v5393_v35  ;;  %v6903_v54 = vld [vmem:[%s9977_s5] sm:$0xff] }
 0x5bf   :  { %v5358_v33 = vadd.f32 %v5357_v3, %v5356_v17  ;;  %v5414_v37 = vadd.f32 %v5413_v34, %v5412_v58  ;;  %v5443_v3 = vmul.f32 64.0, %v5442_v39  ;;  %v6897_v34 = vld [vmem:[%s9977_s5 + $0x30] sm:$0xff] }
 0x5c0   :  { %v5396_v49 = vrot.slane %v5395_v23, 1 }
 0x5c1   :  { %v5359_v38 = vrot.slane %v5358_v33, 1  ;;  %v5415_v32 = vrot.slane %v5414_v37, 2 }
 0x5c2   :  { %v5397_v35 = vadd.f32 %v5396_v49, %v5395_v23  ;;  %v6221_v49 = vld [vmem:[%s9976_s4 + $0x8] ss:$0 sm:$0xff] }
 0x5c3   :  { %v5360_v50 = vadd.f32 %v5359_v38, %v5358_v33  ;;  %v5416_v61 = vadd.f32 %v5415_v32, %v5414_v37  ;;  %v6898_v33 = vld [vmem:[%s9977_s5 + $0x28] sm:$0xff]  ;;  %v5447_v37 = vrot.slane %v5443_v3, %v10101_v21  ;;  %v6900_v32 = vld [vmem:[%s9977_s5 + $0x18] sm:$0xff] }
 0x5c5   :  { %v5425_v0 = vadd.f32 %v5423_v18, %v5360_v50  ;;  %v5433_v26 = vsel %vm1875_vm7, %v5360_v50, %v5339_v9  ;;  %v5417_v52 = vrot.slane %v5416_v61, 1  ;;  %v6901_v9 = vld [vmem:[%s9977_s5 + $0x10] sm:$0xff] }
 0x5c6   :  { %v5435_v29 = vmul.f32 %v5433_v26, %v5430_v24 }
 0x5c7   :  { %v5452_v44 = vrot.slane %v5425_v0, 7  ;;  %v5418_v30 = vadd.f32 %v5417_v52, %v5416_v61  ;;  %v6902_v61 = vld [vmem:[%s9977_s5 + $0x8] sm:$0xff] }
 0x5c8   :  { %v5437_v58 = vrot.slane %v5435_v29, 1  ;;  %v5440_v24 = vadd.f32 %v5435_v29, %v5397_v35 }
 0x5c9   :  { %v5453_v17 = vsel %vm1875_vm7, %v5452_v44, %v5424_v27 }
 0x5ca   :  { %6673 = vmatmul.mubr.msk.f32.vlgmr.msra.gmra.mxu1 %vm1290_vm4, %v5453_v17  ;;  %v5441_v36 = vadd.f32 %v5437_v58, %v5418_v30  ;;  %v5448_v18 = vadd.f32 %v5447_v37, %v5440_v24 }
 0x5cb   :  { %6676 = vmatpush3.msra.mxu1 %v6896_v15  ;;  %6691 = vmatprep.mubr.msk.f32.mxu1 %vm6930_vm6, %v10054_v7  ;;  %v6220_v15 = vld [vmem:[%s9976_s4 + $0x7] ss:$0 sm:$0xff]  ;;  %s6933_s4 = smov [#allocation3]  }
 0x5cc   :  { %6677 = vmatprep.subr.mxu1 %v10054_v7  ;;  %v5449_v38 = vadd.f32 %v5447_v37, %v5441_v36  ;;  %s5775_s27 = sshll.u32 %s6933_s4, 4  ;;  %s5776_s27 = int_to_ptr.vmem [resolvable:$true] %s5775_s27 }
 0x5cd   :  { %6678 = vmatpush3.msra.mxu1 %v6897_v34  ;;  %s6904_s28 = scalar_lea.vmem %s5776_s27, 2048  ;;  %p6909_p1 = scmp.lt.s32.totalorder %s5776_s27, %s5776_s27 }
 0x5ce   :  { %6679 = vmatprep.subr.mxu1 %v10054_v7  ;;  %v5529_v50 = vrot.slane %v5449_v38, 7  ;;  %p6905_p0 = scmp.ne.s32.totalorder %s5776_s27, %s6904_s28  ;;  %p6910_p2 = scmp.lt.s32.totalorder %s6904_s28, %s6904_s28 }
 0x5cf   :  { %6680 = vmatpush3.msra.mxu1 %v6898_v33 }
 0x5d0   :  { %6681 = vmatprep.subr.mxu1 %v10054_v7  ;;  %v5530_v0 = vsel %vm1875_vm7, %v5529_v50, %v5448_v18  ;;  %p6911_p3 = por %p6910_p2, %p6909_p1 }
 0x5d1   :  { %6682 = vmatpush3.msra.mxu1 %v6899_v2 }
 0x5d2   :  { %6683 = vmatprep.subr.mxu1 %v10054_v7  ;;  %p6912_p4 = pnand %p6911_p3, %p6905_p0 }
 0x5d3   :  { %6684 = vmatpush3.msra.mxu1 %v6900_v32 }
 0x5d4   :  { %6685 = vmatprep.subr.mxu1 %v10054_v7 }
 0x5d5   :  { %6686 = vmatpush3.msra.mxu1 %v6901_v9 }
 0x5d6   :  { %6687 = vmatprep.subr.mxu1 %v10054_v7 }
 0x5d7   :  { %6688 = vmatpush3.msra.mxu1 %v6902_v61 }
 0x5d8   :  { %6689 = vmatprep.subr.mxu1 %v10054_v7  ;;  %v5616_v7 = vrot.slane %v9856_v28, %v10101_v21 }
 0x5d9   :  { %6690 = vmatpush3.msra.mxu1 %v6903_v54 }
 0x5da   :  { %6692 = vmatmul.mubr.msk.f32.vlgmr.msra.gmra.mxu1 %vm1290_vm4, %v5530_v0 }
 0x68a   :  { %v5522_v26 = vpop.f32.mrf.mxu1 }
 0x68b   :  { %v5526_v52 = vmul.f32 0.0009765625, %v5522_v26 }
 0x68c   :  { %v6674_v29 = vpop.f32.mrf.mxu1 }
 0x68d   :  { %v5604_v44 = vmul.f32 %v5526_v52, %v5526_v52  ;;  %v5617_v3 = vsub.f32 %v5616_v7, %v5526_v52 }
 0x69a   :  { %v5599_v27 = vpop.f32.mrf.mxu1 }
 0x69b   :  { %v5603_v39 = vmul.f32 0.0009765625, %v5599_v27 }
 0x69c   :  { %v6693_v23 = vpop.f32.mrf.mxu1 }
 0x69d   :  { %v5605_v17 = vsub.f32 %v5603_v39, %v5604_v44 }
 0x69f   :  { %v5606_v58 = vadd.f32 1e-05, %v5605_v17 }
 0x6a1   :  { %6843 = vrsqrt.f32 %v5606_v58 }
 0x6ae   :  { %v6844_v30 = vpop.eup %6843 }
 0x6af   :  { %v5612_v34 = vmul.f32 %v6844_v30, %v6220_v15 }
 0x6b1   :  { %v5618_v36 = vmul.f32 %v5617_v3, %v5612_v34  ;;  %v5631_v33 = vrot.slane %v5612_v34, %v10103_v40 }
 0x6b3   :  { %v5623_v37 = vadd.f32 %v6221_v49, %v5618_v36  ;;  %v5632_v2 = vcombine.high %v5631_v33, %v5631_v33  ;;  %v5639_v35 = vrot.slane %v5631_v33, %v10103_v40 }
 0x6b5   :  { %v5646_v28 = vrot.slane %v5632_v2, %v10103_v40  ;;  %v5650_v38 = vrot.slane %v5639_v35, %v10101_v21  ;;  %v5680_v32 = vrot.slane %v5623_v37, %v10103_v40 }
 0x6b7   :  { %v5654_v24 = vrot.slane %v5646_v28, %v10101_v21  ;;  %v5657_v9 = vmul.f32 %v5650_v38, %v9670_v10  ;;  %v5658_v50 = vmul.f32 %v5650_v38, %v9674_v43  ;;  %v5659_v61 = vmul.f32 %v9668_v53, %v5650_v38 }
 0x6b8   :  { %v5660_v18 = vmul.f32 %v9672_v51, %v5650_v38  ;;  %v5661_v54 = vmul.f32 %v5650_v38, %v9694_v4  ;;  %v5662_v0 = vmul.f32 %v5650_v38, %v9708_v56  ;;  %v5681_v26 = vcombine.high %v5680_v32, %v5680_v32 }
 0x6b9   :  { %v5688_v29 = vrot.slane %v5680_v32, %v10103_v40  ;;  %v5663_v52 = vmul.f32 %v9684_v42, %v5650_v38  ;;  %v5664_v27 = vmul.f32 %v9701_v55, %v5650_v38  ;;  %v5665_v44 = vmul.f32 %v5654_v24, %v9723_v13 }
 0x6ba   :  { %v5666_v10 = vmul.f32 %v5654_v24, %v9749_v60  ;;  %v5667_v43 = vmul.f32 %v9720_v12, %v5654_v24  ;;  %v5668_v53 = vmul.f32 %v9735_v22, %v5654_v24  ;;  %v5695_v51 = vrot.slane %v5681_v26, %v10103_v40 }
 0x6bb   :  { %v5699_v4 = vrot.slane %v5688_v29, %v10101_v21  ;;  %v5669_v56 = vmul.f32 %v5654_v24, %v9774_v5  ;;  %v5670_v39 = vmul.f32 %v5654_v24, %v9823_v19  ;;  %v5671_v42 = vmul.f32 %v9760_v59, %v5654_v24 }
 0x6bc   :  { %v5672_v55 = vmul.f32 %v9803_v6, %v5654_v24  ;;  %v5703_v13 = vrot.slane %v5695_v51, %v10101_v21 }
 0x6bd   :  { %v5706_v23 = vadd.f32 %v5699_v4, %v5657_v9  ;;  %v5707_v60 = vadd.f32 %v5699_v4, %v5658_v50  ;;  %v5708_v17 = vadd.f32 %v5699_v4, %v5659_v61  ;;  %v5709_v12 = vadd.f32 %v5699_v4, %v5660_v18 }
 0x6be   :  { %v5710_v58 = vadd.f32 %v5699_v4, %v5661_v54  ;;  %v5711_v22 = vadd.f32 %v5699_v4, %v5662_v0  ;;  %v5712_v7 = vadd.f32 %v5699_v4, %v5663_v52  ;;  %v5713_v40 = vadd.f32 %v5699_v4, %v5664_v27 }
 0x6bf   :  { %v5714_v15 = vadd.f32 %v5703_v13, %v5665_v44  ;;  %v5715_v30 = vadd.f32 %v5703_v13, %v5666_v10  ;;  %v5716_v3 = vadd.f32 %v5703_v13, %v5667_v43  ;;  %v5717_v5 = vadd.f32 %v5703_v13, %v5668_v53 }
 0x6c0   :  { %v5718_v34 = vadd.f32 %v5703_v13, %v5669_v56  ;;  %v5719_v19 = vadd.f32 %v5703_v13, %v5670_v39  ;;  %v5720_v49 = vadd.f32 %v5703_v13, %v5671_v42  ;;  %v5721_v59 = vadd.f32 %v5703_v13, %v5672_v55 }
 0x6c1   :  { %v5722_v6 = vadd.f32 %v5706_v23, %v9781_v57  ;;  %v5723_v21 = vadd.f32 %v5707_v60, %v9783_v1  ;;  %v5724_v36 = vadd.f32 %v5708_v17, %v9785_v48  ;;  %v5725_v33 = vadd.f32 %v5709_v12, %v9787_v47 }
 0x6c2   :  { %v5726_v37 = vadd.f32 %v5710_v58, %v9789_v62  ;;  %v5727_v2 = vadd.f32 %v5711_v22, %v9791_v41  ;;  %v5728_v35 = vadd.f32 %v5712_v7, %v9793_v11  ;;  %v5729_v28 = vadd.f32 %v5713_v40, %v9795_v31 }
 0x6c3   :  { %v5730_v38 = vadd.f32 %v5714_v15, %v9797_v16  ;;  %v5731_v32 = vadd.f32 %v5715_v30, %v9799_v20  ;;  %v5732_v57 = vadd.f32 %v5716_v3, %v9801_v8  ;;  %v5733_v1 = vadd.f32 %v5717_v5, %v9805_v63 }
 0x6c4   :  { %v5734_v48 = vadd.f32 %v5718_v34, %v9807_v46  ;;  %v5735_v47 = vadd.f32 %v5719_v19, %v9809_v14  ;;  %v5736_v62 = vadd.f32 %v5720_v49, %v9811_v25  ;;  %v5737_v41 = vadd.f32 %v5721_v59, %v9813_v45 }
 0x6c5   :  { %v5738_v24 = vmax.f32 %v5722_v6, 0.0  ;;  %v5739_v11 = vmax.f32 %v5723_v21, 0.0  ;;  %v5740_v9 = vmax.f32 %v5724_v36, 0.0  ;;  %v5741_v31 = vmax.f32 %v5725_v33, 0.0 }
 0x6c6   :  { %v5742_v50 = vmax.f32 %v5726_v37, 0.0  ;;  %v5743_v16 = vmax.f32 %v5727_v2, 0.0  ;;  %v5744_v61 = vmax.f32 %v5728_v35, 0.0  ;;  %v5745_v20 = vmax.f32 %v5729_v28, 0.0 }
 0x6c7   :  { %v5746_v8 = vmax.f32 %v5730_v38, 0.0  ;;  %v5747_v63 = vmax.f32 %v5731_v32, 0.0  ;;  %v5748_v18 = vmax.f32 %v5732_v57, 0.0  ;;  %5754 = vst.msk [vmem:[#allocation3] sm:$0xff] %vm1290_vm4, %v5738_v24  ;;  %5755 = vst.msk [vmem:[#allocation3 + $0x8] sm:$0xff] %vm1290_vm4, %v5739_v11  ;;  %v5749_v46 = vmax.f32 %v5733_v1, 0.0 }
 0x6c8   :  { %5756 = vst.msk [vmem:[#allocation3 + $0x10] sm:$0xff] %vm1290_vm4, %v5740_v9  ;;  %v5750_v14 = vmax.f32 %v5734_v48, 0.0  ;;  %v5751_v25 = vmax.f32 %v5735_v47, 0.0  ;;  %v5752_v45 = vmax.f32 %v5736_v62, 0.0  ;;  %5757 = vst.msk [vmem:[#allocation3 + $0x18] sm:$0xff] %vm1290_vm4, %v5741_v31  ;;  %v5753_v54 = vmax.f32 %v5737_v41, 0.0 }
 0x6c9   :  { %5758 = vst.msk [vmem:[#allocation3 + $0x20] sm:$0xff] %vm1290_vm4, %v5742_v50  ;;  %5759 = vst.msk [vmem:[#allocation3 + $0x28] sm:$0xff] %vm1290_vm4, %v5743_v16 }
 0x6ca   :  { %5760 = vst.msk [vmem:[#allocation3 + $0x30] sm:$0xff] %vm1290_vm4, %v5744_v61  ;;  %5761 = vst.msk [vmem:[#allocation3 + $0x38] sm:$0xff] %vm1290_vm4, %v5745_v20 }
 0x6cb   :  { %5762 = vst.msk [vmem:[#allocation3 + $0x40] sm:$0xff] %vm1290_vm4, %v5746_v8  ;;  %5763 = vst.msk [vmem:[#allocation3 + $0x48] sm:$0xff] %vm1290_vm4, %v5747_v63 }
 0x6cc   :  { %5764 = vst.msk [vmem:[#allocation3 + $0x50] sm:$0xff] %vm1290_vm4, %v5748_v18  ;;  %5765 = vst.msk [vmem:[#allocation3 + $0x58] sm:$0xff] %vm1290_vm4, %v5749_v46 }
 0x6cd   :  { %5766 = vst.msk [vmem:[#allocation3 + $0x60] sm:$0xff] %vm1290_vm4, %v5750_v14  ;;  %5767 = vst.msk [vmem:[#allocation3 + $0x68] sm:$0xff] %vm1290_vm4, %v5751_v25 }
 0x6ce   :  { %5768 = vst.msk [vmem:[#allocation3 + $0x70] sm:$0xff] %vm1290_vm4, %v5752_v45  ;;  %5769 = vst.msk [vmem:[#allocation3 + $0x78] sm:$0xff] %vm1290_vm4, %v5753_v54 }
 0x6cf   :  { %6915 = shalt.err (!%p6912_p4)
}
 0x6d0   :  { %s6934_s30 = smov 128   ;;  %s6935_s0 = smov 8  }
 0x6d1   :  { %5781 = dma.vmem_to_hbm [thread:$0]  %s5776_s27, 2048, %s9978_s6, [#allocation4], %s6934_s30, %s6934_s30, %s6935_s0  }
 0x6d2   :  { %6924 = dma.done.wait [#allocation4], 2048  }
 0x6d3   :  { %6925 = vsyncadd [#allocation4], 4294965248 }
 0x6d4   :  { %5785 = vsyncpa [#allocation4], 1 }

</bundles_post_ra>
